<compile_context>
chip_gen: v7x
topology: tpu7x:2x2x1
jax: 0.10.0
libtpu: 0.0.40
codegen_flags: <defaults>
</compile_context>

<pallas_src>
import jax
import jax.numpy as jnp
from jax.experimental import pallas as pl
from jax.experimental.pallas import tpu as pltpu

INPUT_SIZE = 28 * 28
HIDDEN1 = 1024
HIDDEN2 = 512
OUTPUT_SIZE = 10
OUT_PAD = 128  # lane-dense padded logits width


def _round_up(n, m):
    return ((n + m - 1) // m) * m


def mlp_kernel(x_ref, w1_ref, b1_ref, w2_ref, b2_ref, w3_ref, b3_ref, o_ref):
    # fc1 + ReLU  (bf16 inputs, f32 accumulate on the MXU)
    h1 = jnp.dot(x_ref[...], w1_ref[...], preferred_element_type=jnp.float32)
    h1 = jnp.maximum(h1 + b1_ref[...], 0.0)
    # fc2 + ReLU
    h2 = jnp.dot(h1.astype(jnp.bfloat16), w2_ref[...],
                 preferred_element_type=jnp.float32)
    h2 = jnp.maximum(h2 + b2_ref[...], 0.0)
    # fc3 (logits, padded to 128 lanes, no activation)
    y = jnp.dot(h2.astype(jnp.bfloat16), w3_ref[...],
                preferred_element_type=jnp.float32)
    o_ref[...] = (y + b3_ref[...]).astype(o_ref.dtype)


def mlp_forward(x, w1, b1, w2, b2, w3, b3, *, block_b=256):
    """x: (B, 784) f32. Weights: (in, out) f32. Biases: (1, out) f32.
    Returns (B, 10) f32 logits."""
    B = x.shape[0]
    # Batch tile: up to 256 rows (MXU-friendly), rounded up to a sublane multiple.
    TB = min(block_b, _round_up(max(B, 1), 8))
    B_pad = _round_up(B, TB)

    x_p = x if B_pad == B else jnp.pad(x, ((0, B_pad - B), (0, 0)))

    # Pad the fc3 output path to a full 128-lane tile (unmasked stores).
    w3_p = jnp.pad(w3, ((0, 0), (0, OUT_PAD - OUTPUT_SIZE)))
    b3_p = jnp.pad(b3, ((0, 0), (0, OUT_PAD - OUTPUT_SIZE)))

    # bf16 weights / activations; biases stay f32 (tiny, added post-accumulate).
    x_bf = x_p.astype(jnp.bfloat16)
    w1_bf = w1.astype(jnp.bfloat16)
    w2_bf = w2.astype(jnp.bfloat16)
    w3_bf = w3_p.astype(jnp.bfloat16)
    # TODO(synk): for a serving loop, keep the bf16 weights VMEM-resident across
    # calls (cross-pallas_call prefetch / input_output_aliases) instead of
    # re-loading ~2.7 MiB from HBM every invocation.

    grid = (B_pad // TB,)

    flops = 2 * B_pad * (INPUT_SIZE * HIDDEN1 + HIDDEN1 * HIDDEN2 + HIDDEN2 * OUT_PAD)
    bytes_accessed = (
        x_bf.size * 2 + w1_bf.size * 2 + w2_bf.size * 2 + w3_bf.size * 2
        + b1.size * 4 + b2.size * 4 + b3_p.size * 4
        + B_pad * OUT_PAD * 4
    )

    out = pl.pallas_call(
        mlp_kernel,
        out_shape=jax.ShapeDtypeStruct((B_pad, OUT_PAD), jnp.float32),
        grid=grid,
        in_specs=[
            pl.BlockSpec((TB, INPUT_SIZE), lambda i: (i, 0)),        # x tile
            pl.BlockSpec((INPUT_SIZE, HIDDEN1), lambda i: (0, 0)),   # w1 (resident)
            pl.BlockSpec((1, HIDDEN1), lambda i: (0, 0)),            # b1
            pl.BlockSpec((HIDDEN1, HIDDEN2), lambda i: (0, 0)),      # w2 (resident)
            pl.BlockSpec((1, HIDDEN2), lambda i: (0, 0)),            # b2
            pl.BlockSpec((HIDDEN2, OUT_PAD), lambda i: (0, 0)),      # w3 (resident)
            pl.BlockSpec((1, OUT_PAD), lambda i: (0, 0)),            # b3
        ],
        out_specs=pl.BlockSpec((TB, OUT_PAD), lambda i: (i, 0)),
        compiler_params=pltpu.CompilerParams(
            dimension_semantics=("parallel",),
            vmem_limit_bytes=24 << 20,
        ),
        cost_estimate=pl.CostEstimate(
            flops=flops, transcendentals=0, bytes_accessed=bytes_accessed),
    )(x_bf, w1_bf, b1, w2_bf, b2, w3_bf, b3_p)

    return out[:B, :OUTPUT_SIZE]


def init_linear_params(key, in_features, out_features):
    """Deterministic init matching nn.Linear's default U(-1/sqrt(in), 1/sqrt(in)).
    Weight stored transposed: (in_features, out_features)."""
    kw, kb = jax.random.split(key)
    bound = 1.0 / (in_features ** 0.5)
    w = jax.random.uniform(kw, (in_features, out_features), jnp.float32, -bound, bound)
    b = jax.random.uniform(kb, (1, out_features), jnp.float32, -bound, bound)
    return w, b


def reference_forward_bf16(x, w1, b1, w2, b2, w3, b3):
    """Pure-JAX reference that mirrors the kernel's bf16 quantization points
    (inputs/weights/inter-layer activations) with f32 accumulation."""
    q = lambda a: a.astype(jnp.bfloat16).astype(jnp.float32)
    h1 = jnp.maximum(q(x) @ q(w1) + b1, 0.0)
    h2 = jnp.maximum(q(h1) @ q(w2) + b2, 0.0)
    return q(h2) @ q(w3) + b3


if __name__ == "__main__":
    key = jax.random.PRNGKey(0)
    kx, k1, k2, k3 = jax.random.split(key, 4)

    w1, b1 = init_linear_params(k1, INPUT_SIZE, HIDDEN1)
    w2, b2 = init_linear_params(k2, HIDDEN1, HIDDEN2)
    w3, b3 = init_linear_params(k3, HIDDEN2, OUTPUT_SIZE)

    mlp_jit = jax.jit(mlp_forward)

    # Small batch (exercises the single-tile path).
    B = 8
    x = jax.random.normal(kx, (B, INPUT_SIZE), jnp.float32)
    y = jax.block_until_ready(mlp_jit(x, w1, b1, w2, b2, w3, b3))
    y_ref = reference_forward_bf16(x, w1, b1, w2, b2, w3, b3)
    assert y.shape == (B, OUTPUT_SIZE)
    assert jnp.allclose(y, y_ref, atol=2e-3, rtol=2e-3), "mismatch vs reference (B=8)"

    # Ragged batch (exercises batch padding + output slice).
    B2 = 20
    x2 = jax.random.normal(kx, (B2, INPUT_SIZE), jnp.float32)
    y2 = jax.block_until_ready(mlp_jit(x2, w1, b1, w2, b2, w3, b3))
    y2_ref = reference_forward_bf16(x2, w1, b1, w2, b2, w3, b3)
    assert y2.shape == (B2, OUTPUT_SIZE)
    assert jnp.allclose(y2, y2_ref, atol=2e-3, rtol=2e-3), "mismatch vs reference (B=20)"

    print("KERNEL_OK")
</pallas_src>

<mosaic_0001>
module attributes {stable_mosaic.version = 11 : i64} {
  func.func @mlp_kernel(%arg0: i32, %arg1: memref<8x784xbf16, #tpu.memory_space<vmem>>, %arg2: memref<784x1024xbf16, #tpu.memory_space<vmem>>, %arg3: memref<1x1024xf32, #tpu.memory_space<vmem>>, %arg4: memref<1024x512xbf16, #tpu.memory_space<vmem>>, %arg5: memref<1x512xf32, #tpu.memory_space<vmem>>, %arg6: memref<512x128xbf16, #tpu.memory_space<vmem>>, %arg7: memref<1x128xf32, #tpu.memory_space<vmem>>, %arg8: memref<8x128xf32, #tpu.memory_space<vmem>>) attributes {dimension_semantics = [#tpu.dimension_semantics<parallel>], iteration_bounds = array<i64: 1>, scalar_prefetch = 0 : i64, scratch_operands = 0 : i64, tpu.core_type = #tpu.core_type<tc>, window_params = [{transform_indices = @transform_0, window_bounds = array<i64: 8, 784>}, {pipeline_mode = #tpu.pipeline_mode<synchronous>, transform_indices = @transform_1, window_bounds = array<i64: 784, 1024>}, {pipeline_mode = #tpu.pipeline_mode<synchronous>, transform_indices = @transform_2, window_bounds = array<i64: 1, 1024>}, {pipeline_mode = #tpu.pipeline_mode<synchronous>, transform_indices = @transform_3, window_bounds = array<i64: 1024, 512>}, {pipeline_mode = #tpu.pipeline_mode<synchronous>, transform_indices = @transform_4, window_bounds = array<i64: 1, 512>}, {pipeline_mode = #tpu.pipeline_mode<synchronous>, transform_indices = @transform_5, window_bounds = array<i64: 512, 128>}, {pipeline_mode = #tpu.pipeline_mode<synchronous>, transform_indices = @transform_6, window_bounds = array<i64: 1, 128>}, {transform_indices = @transform_7, window_bounds = array<i64: 8, 128>}]} {
    %c0 = arith.constant 0 : index
    %c0_0 = arith.constant 0 : index
    %0 = vector.load %arg1[%c0, %c0_0] : memref<8x784xbf16, #tpu.memory_space<vmem>>, vector<8x784xbf16>
    %c0_1 = arith.constant 0 : index
    %c0_2 = arith.constant 0 : index
    %1 = vector.load %arg2[%c0_1, %c0_2] : memref<784x1024xbf16, #tpu.memory_space<vmem>>, vector<784x1024xbf16>
    %cst = arith.constant dense<0.000000e+00> : vector<8x1024xf32>
    %2 = tpu.matmul %0, %1, %cst {dimension_numbers = #tpu.dot_dimension_numbers<[1], [0], [0], [1], [0, 0, 1, 1], [], []>} : vector<8x784xbf16>, vector<784x1024xbf16>, vector<8x1024xf32> -> vector<8x1024xf32>
    %c0_3 = arith.constant 0 : index
    %c0_4 = arith.constant 0 : index
    %3 = vector.load %arg3[%c0_3, %c0_4] : memref<1x1024xf32, #tpu.memory_space<vmem>>, vector<1x1024xf32>
    %4 = vector.broadcast %3 : vector<1x1024xf32> to vector<8x1024xf32>
    %5 = arith.addf %2, %4 : vector<8x1024xf32>
    %cst_5 = arith.constant 0.000000e+00 : f32
    %6 = vector.broadcast %cst_5 : f32 to vector<8x1024xf32>
    %7 = arith.maximumf %5, %6 : vector<8x1024xf32>
    %8 = arith.truncf %7 : vector<8x1024xf32> to vector<8x1024xbf16>
    %c0_6 = arith.constant 0 : index
    %c0_7 = arith.constant 0 : index
    %9 = vector.load %arg4[%c0_6, %c0_7] : memref<1024x512xbf16, #tpu.memory_space<vmem>>, vector<1024x512xbf16>
    %cst_8 = arith.constant dense<0.000000e+00> : vector<8x512xf32>
    %10 = tpu.matmul %8, %9, %cst_8 {dimension_numbers = #tpu.dot_dimension_numbers<[1], [0], [0], [1], [0, 0, 1, 1], [], []>} : vector<8x1024xbf16>, vector<1024x512xbf16>, vector<8x512xf32> -> vector<8x512xf32>
    %c0_9 = arith.constant 0 : index
    %c0_10 = arith.constant 0 : index
    %11 = vector.load %arg5[%c0_9, %c0_10] : memref<1x512xf32, #tpu.memory_space<vmem>>, vector<1x512xf32>
    %12 = vector.broadcast %11 : vector<1x512xf32> to vector<8x512xf32>
    %13 = arith.addf %10, %12 : vector<8x512xf32>
    %cst_11 = arith.constant 0.000000e+00 : f32
    %14 = vector.broadcast %cst_11 : f32 to vector<8x512xf32>
    %15 = arith.maximumf %13, %14 : vector<8x512xf32>
    %16 = arith.truncf %15 : vector<8x512xf32> to vector<8x512xbf16>
    %c0_12 = arith.constant 0 : index
    %c0_13 = arith.constant 0 : index
    %17 = vector.load %arg6[%c0_12, %c0_13] : memref<512x128xbf16, #tpu.memory_space<vmem>>, vector<512x128xbf16>
    %cst_14 = arith.constant dense<0.000000e+00> : vector<8x128xf32>
    %18 = tpu.matmul %16, %17, %cst_14 {dimension_numbers = #tpu.dot_dimension_numbers<[1], [0], [0], [1], [0, 0, 1, 1], [], []>} : vector<8x512xbf16>, vector<512x128xbf16>, vector<8x128xf32> -> vector<8x128xf32>
    %c0_15 = arith.constant 0 : index
    %c0_16 = arith.constant 0 : index
    %19 = vector.load %arg7[%c0_15, %c0_16] : memref<1x128xf32, #tpu.memory_space<vmem>>, vector<1x128xf32>
    %20 = vector.broadcast %19 : vector<1x128xf32> to vector<8x128xf32>
    %21 = arith.addf %18, %20 : vector<8x128xf32>
    %c0_17 = arith.constant 0 : index
    %c0_18 = arith.constant 0 : index
    %22 = vector.load %arg8[%c0_17, %c0_18] : memref<8x128xf32, #tpu.memory_space<vmem>>, vector<8x128xf32>
    tpu.vector_store %arg8[%c0_17, %c0_18], %21 {strides = array<i32>} : memref<8x128xf32, #tpu.memory_space<vmem>>, vector<8x128xf32>,
    return
  }
  func.func @transform_0(%arg0: i32) -> (i32, i32) {
    %c0_i32 = arith.constant 0 : i32
    %c0_i32_0 = arith.constant 0 : i32
    return %arg0, %c0_i32 : i32, i32
  }
  func.func @transform_1(%arg0: i32) -> (i32, i32) {
    %c0_i32 = arith.constant 0 : i32
    %c0_i32_0 = arith.constant 0 : i32
    %c0_i32_1 = arith.constant 0 : i32
    return %c0_i32, %c0_i32_0 : i32, i32
  }
  func.func @transform_2(%arg0: i32) -> (i32, i32) {
    %c0_i32 = arith.constant 0 : i32
    %c0_i32_0 = arith.constant 0 : i32
    %c0_i32_1 = arith.constant 0 : i32
    return %c0_i32, %c0_i32_0 : i32, i32
  }
  func.func @transform_3(%arg0: i32) -> (i32, i32) {
    %c0_i32 = arith.constant 0 : i32
    %c0_i32_0 = arith.constant 0 : i32
    %c0_i32_1 = arith.constant 0 : i32
    return %c0_i32, %c0_i32_0 : i32, i32
  }
  func.func @transform_4(%arg0: i32) -> (i32, i32) {
    %c0_i32 = arith.constant 0 : i32
    %c0_i32_0 = arith.constant 0 : i32
    %c0_i32_1 = arith.constant 0 : i32
    return %c0_i32, %c0_i32_0 : i32, i32
  }
  func.func @transform_5(%arg0: i32) -> (i32, i32) {
    %c0_i32 = arith.constant 0 : i32
    %c0_i32_0 = arith.constant 0 : i32
    %c0_i32_1 = arith.constant 0 : i32
    return %c0_i32, %c0_i32_0 : i32, i32
  }
  func.func @transform_6(%arg0: i32) -> (i32, i32) {
    %c0_i32 = arith.constant 0 : i32
    %c0_i32_0 = arith.constant 0 : i32
    %c0_i32_1 = arith.constant 0 : i32
    return %c0_i32, %c0_i32_0 : i32, i32
  }
  func.func @transform_7(%arg0: i32) -> (i32, i32) {
    %c0_i32 = arith.constant 0 : i32
    %c0_i32_0 = arith.constant 0 : i32
    return %arg0, %c0_i32 : i32, i32
  }
}

</mosaic_0001>

<bundles_post_ra>
// kernel: mlp_forward.1
= control target key start
LH: loop header
LB: loop body
LE: loop exit
PB: predicated region body
PF: predicated region fallthrough
CT: control target
= control target key end

     0   :  { %vm2450_vm0 = vcmask 130048   ;;  %s8879_s0 = inlined_call_operand.vmem [shape: bf16[8,784], index: 0, kind: input, shape index: {}]   ;;  %s8880_s1 = inlined_call_operand.vmem [shape: bf16[784,1024], index: 1, kind: input, shape index: {}]   ;;  %s8881_s2 = inlined_call_operand.vmem [shape: f32[1,1024], index: 2, kind: input, shape index: {}]   ;;  %s8882_s3 = inlined_call_operand.vmem [shape: bf16[1024,512], index: 3, kind: input, shape index: {}]   ;;  %s8883_s4 = inlined_call_operand.vmem [shape: f32[1,512], index: 4, kind: input, shape index: {}]   ;;  %s8884_s5 = inlined_call_operand.vmem [shape: bf16[512,128], index: 5, kind: input, shape index: {}]   ;;  %s8885_s6 = inlined_call_operand.vmem [shape: f32[1,128], index: 6, kind: input, shape index: {}]   ;;  %s8886_s7 = inlined_call_operand.hbm [shape: f32[8,128], index: 7, kind: output, shape index: {}]  }
   0x1   :  { %v32_v0 = vld [vmem:[%s8880_s1] sm:$0xff]  ;;  %v33_v2 = vld [vmem:[%s8880_s1 + $0x8] sm:$0xff] }
   0x2   :  { %v36_v1 = vld [vmem:[%s8880_s1 + $0x20] sm:$0xff]  ;;  %v37_v4 = vld [vmem:[%s8880_s1 + $0x28] sm:$0xff] }
   0x3   :  { %v5386_v3 = vcombine.high %v32_v0, %v36_v1  ;;  %v5385_v5 = vcombine.low %v32_v0, %v36_v1  ;;  %v40_v6 = vld [vmem:[%s8880_s1 + $0x40] sm:$0xff]  ;;  %v5388_v8 = vcombine.high %v33_v2, %v37_v4  ;;  %v5387_v9 = vcombine.low %v33_v2, %v37_v4  ;;  %v41_v11 = vld [vmem:[%s8880_s1 + $0x48] sm:$0xff] }
   0x4   :  { %v44_v7 = vld [vmem:[%s8880_s1 + $0x60] sm:$0xff]  ;;  %v45_v12 = vld [vmem:[%s8880_s1 + $0x68] sm:$0xff] }
   0x5   :  { %v5394_v10 = vcombine.high %v40_v6, %v44_v7  ;;  %v48_v13 = vld [vmem:[%s8880_s1 + $0x80] sm:$0xff]  ;;  %2454 = vmatprep.subr.bf16.mxu0 %v5386_v3  ;;  %v5396_v14 = vcombine.high %v41_v11, %v45_v12  ;;  %v49_v16 = vld [vmem:[%s8880_s1 + $0x88] sm:$0xff]  ;;  %2618 = vmatprep.subr.bf16.mxu1 %v5388_v8  ;;  %v5393_v18 = vcombine.low %v40_v6, %v44_v7 }
   0x6   :  { %v52_v15 = vld [vmem:[%s8880_s1 + $0xa0] sm:$0xff]  ;;  %v53_v17 = vld [vmem:[%s8880_s1 + $0xa8] sm:$0xff]  ;;  %2455 = vmatpush1.bf16.msra.mxu0 %v5385_v5  ;;  %2619 = vmatpush1.bf16.msra.mxu1 %v5387_v9  ;;  %v5395_v19 = vcombine.low %v41_v11, %v45_v12 }
   0x7   :  { %2456 = vmatprep.subr.bf16.mxu0 %v5394_v10  ;;  %v5402_v20 = vcombine.high %v48_v13, %v52_v15  ;;  %2620 = vmatprep.subr.bf16.mxu1 %v5396_v14  ;;  %v5404_v21 = vcombine.high %v49_v16, %v53_v17  ;;  %v56_v22 = vld [vmem:[%s8880_s1 + $0xc0] sm:$0xff]  ;;  %v57_v24 = vld [vmem:[%s8880_s1 + $0xc8] sm:$0xff]  ;;  %v5401_v26 = vcombine.low %v48_v13, %v52_v15 }
   0x8   :  { %v60_v23 = vld [vmem:[%s8880_s1 + $0xe0] sm:$0xff]  ;;  %v61_v25 = vld [vmem:[%s8880_s1 + $0xe8] sm:$0xff]  ;;  %v5403_v27 = vcombine.low %v49_v16, %v53_v17 }
   0x9   :  { %v5410_v28 = vcombine.high %v56_v22, %v60_v23  ;;  %v5412_v29 = vcombine.high %v57_v24, %v61_v25  ;;  %v64_v30 = vld [vmem:[%s8880_s1 + $0x100] sm:$0xff]  ;;  %v65_v32 = vld [vmem:[%s8880_s1 + $0x108] sm:$0xff]  ;;  %v5409_v34 = vcombine.low %v56_v22, %v60_v23  ;;  %v5411_v35 = vcombine.low %v57_v24, %v61_v25 }
   0xa   :  { %2457 = vmatpush1.bf16.msra.mxu0 %v5393_v18  ;;  %2621 = vmatpush1.bf16.msra.mxu1 %v5395_v19  ;;  %v68_v31 = vld [vmem:[%s8880_s1 + $0x120] sm:$0xff]  ;;  %v69_v33 = vld [vmem:[%s8880_s1 + $0x128] sm:$0xff] }
   0xb   :  { %2458 = vmatprep.subr.bf16.mxu0 %v5402_v20  ;;  %2622 = vmatprep.subr.bf16.mxu1 %v5404_v21  ;;  %v5418_v36 = vcombine.high %v64_v30, %v68_v31  ;;  %v5420_v37 = vcombine.high %v65_v32, %v69_v33  ;;  %v72_v38 = vld [vmem:[%s8880_s1 + $0x140] sm:$0xff]  ;;  %v73_v40 = vld [vmem:[%s8880_s1 + $0x148] sm:$0xff]  ;;  %v5417_v42 = vcombine.low %v64_v30, %v68_v31 }
   0xc   :  { %v76_v39 = vld [vmem:[%s8880_s1 + $0x160] sm:$0xff]  ;;  %v77_v41 = vld [vmem:[%s8880_s1 + $0x168] sm:$0xff]  ;;  %v5419_v43 = vcombine.low %v65_v32, %v69_v33 }
   0xd   :  { %v5426_v44 = vcombine.high %v72_v38, %v76_v39  ;;  %v5428_v45 = vcombine.high %v73_v40, %v77_v41  ;;  %v80_v46 = vld [vmem:[%s8880_s1 + $0x180] sm:$0xff]  ;;  %v81_v48 = vld [vmem:[%s8880_s1 + $0x188] sm:$0xff]  ;;  %v5425_v50 = vcombine.low %v72_v38, %v76_v39  ;;  %v5427_v51 = vcombine.low %v73_v40, %v77_v41 }
   0xe   :  { %2459 = vmatpush1.bf16.msra.mxu0 %v5401_v26  ;;  %2623 = vmatpush1.bf16.msra.mxu1 %v5403_v27  ;;  %v84_v47 = vld [vmem:[%s8880_s1 + $0x1a0] sm:$0xff]  ;;  %v85_v49 = vld [vmem:[%s8880_s1 + $0x1a8] sm:$0xff] }
   0xf   :  { %2460 = vmatprep.subr.bf16.mxu0 %v5410_v28  ;;  %2624 = vmatprep.subr.bf16.mxu1 %v5412_v29  ;;  %v5434_v52 = vcombine.high %v80_v46, %v84_v47  ;;  %v6778_v53 = vld [vmem:[%s8879_s0] sm:$0xff]  ;;  %v5436_v54 = vcombine.high %v81_v48, %v85_v49  ;;  %v89_v58 = vld [vmem:[%s8880_s1 + $0x1c8] sm:$0xff]  ;;  %v5433_v60 = vcombine.low %v80_v46, %v84_v47 }
  0x10   :  { %v88_v55 = vld [vmem:[%s8880_s1 + $0x1c0] sm:$0xff]  ;;  %v6788_v57 = vcombine.high %v6778_v53, %v6778_v53  ;;  %v93_v59 = vld [vmem:[%s8880_s1 + $0x1e8] sm:$0xff]  ;;  %v5435_v61 = vcombine.low %v81_v48, %v85_v49 }
  0x11   :  { %v92_v56 = vld [vmem:[%s8880_s1 + $0x1e0] sm:$0xff]  ;;  %v5444_v63 = vcombine.high %v89_v58, %v93_v59  ;;  %v97_v2 = vld [vmem:[%s8880_s1 + $0x208] sm:$0xff]  ;;  %v5443_v5 = vcombine.low %v89_v58, %v93_v59 }
  0x12   :  { %2461 = vmatpush1.bf16.msra.mxu0 %v5409_v34  ;;  %2625 = vmatpush1.bf16.msra.mxu1 %v5411_v35  ;;  %v5442_v62 = vcombine.high %v88_v55, %v92_v56  ;;  %v96_v0 = vld [vmem:[%s8880_s1 + $0x200] sm:$0xff]  ;;  %v101_v3 = vld [vmem:[%s8880_s1 + $0x228] sm:$0xff]  ;;  %v5441_v4 = vcombine.low %v88_v55, %v92_v56 }
  0x13   :  { %2462 = vmatprep.subr.bf16.mxu0 %v5418_v36  ;;  %2626 = vmatprep.subr.bf16.mxu1 %v5420_v37  ;;  %v100_v1 = vld [vmem:[%s8880_s1 + $0x220] sm:$0xff]  ;;  %v5452_v7 = vcombine.high %v97_v2, %v101_v3  ;;  %v105_v10 = vld [vmem:[%s8880_s1 + $0x248] sm:$0xff]  ;;  %v5451_v13 = vcombine.low %v97_v2, %v101_v3 }
  0x14   :  { %2486 = vmatprep.mubr.bf16.mxu0 %v6788_v57  ;;  %2650 = vmatprep.mubr.bf16.mxu1 %v6788_v57  ;;  %v5450_v6 = vcombine.high %v96_v0, %v100_v1  ;;  %v104_v8 = vld [vmem:[%s8880_s1 + $0x240] sm:$0xff]  ;;  %v109_v11 = vld [vmem:[%s8880_s1 + $0x268] sm:$0xff]  ;;  %v5449_v12 = vcombine.low %v96_v0, %v100_v1 }
  0x15   :  { %v108_v9 = vld [vmem:[%s8880_s1 + $0x260] sm:$0xff]  ;;  %v5460_v15 = vcombine.high %v105_v10, %v109_v11  ;;  %v113_v18 = vld [vmem:[%s8880_s1 + $0x288] sm:$0xff]  ;;  %v5459_v21 = vcombine.low %v105_v10, %v109_v11 }
  0x16   :  { %2463 = vmatpush1.bf16.msra.mxu0 %v5417_v42  ;;  %2627 = vmatpush1.bf16.msra.mxu1 %v5419_v43  ;;  %v5458_v14 = vcombine.high %v104_v8, %v108_v9  ;;  %v112_v16 = vld [vmem:[%s8880_s1 + $0x280] sm:$0xff]  ;;  %v117_v19 = vld [vmem:[%s8880_s1 + $0x2a8] sm:$0xff]  ;;  %v5457_v20 = vcombine.low %v104_v8, %v108_v9 }
  0x17   :  { %2464 = vmatprep.subr.bf16.mxu0 %v5426_v44  ;;  %2628 = vmatprep.subr.bf16.mxu1 %v5428_v45  ;;  %v116_v17 = vld [vmem:[%s8880_s1 + $0x2a0] sm:$0xff]  ;;  %v5468_v23 = vcombine.high %v113_v18, %v117_v19  ;;  %v121_v26 = vld [vmem:[%s8880_s1 + $0x2c8] sm:$0xff]  ;;  %v5467_v29 = vcombine.low %v113_v18, %v117_v19 }
  0x18   :  { %v5466_v22 = vcombine.high %v112_v16, %v116_v17  ;;  %v120_v24 = vld [vmem:[%s8880_s1 + $0x2c0] sm:$0xff]  ;;  %v125_v27 = vld [vmem:[%s8880_s1 + $0x2e8] sm:$0xff]  ;;  %v5465_v28 = vcombine.low %v112_v16, %v116_v17 }
  0x19   :  { %v124_v25 = vld [vmem:[%s8880_s1 + $0x2e0] sm:$0xff]  ;;  %v5476_v31 = vcombine.high %v121_v26, %v125_v27  ;;  %v129_v34 = vld [vmem:[%s8880_s1 + $0x308] sm:$0xff]  ;;  %v5475_v37 = vcombine.low %v121_v26, %v125_v27 }
  0x1a   :  { %2465 = vmatpush1.bf16.msra.mxu0 %v5425_v50  ;;  %2629 = vmatpush1.bf16.msra.mxu1 %v5427_v51  ;;  %v5474_v30 = vcombine.high %v120_v24, %v124_v25  ;;  %v128_v32 = vld [vmem:[%s8880_s1 + $0x300] sm:$0xff]  ;;  %v133_v35 = vld [vmem:[%s8880_s1 + $0x328] sm:$0xff]  ;;  %v5473_v36 = vcombine.low %v120_v24, %v124_v25 }
  0x1b   :  { %2466 = vmatprep.subr.bf16.mxu0 %v5434_v52  ;;  %2630 = vmatprep.subr.bf16.mxu1 %v5436_v54  ;;  %v132_v33 = vld [vmem:[%s8880_s1 + $0x320] sm:$0xff]  ;;  %v5484_v39 = vcombine.high %v129_v34, %v133_v35  ;;  %v137_v42 = vld [vmem:[%s8880_s1 + $0x348] sm:$0xff]  ;;  %v5483_v45 = vcombine.low %v129_v34, %v133_v35 }
  0x1c   :  { %v5482_v38 = vcombine.high %v128_v32, %v132_v33  ;;  %v136_v40 = vld [vmem:[%s8880_s1 + $0x340] sm:$0xff]  ;;  %v141_v43 = vld [vmem:[%s8880_s1 + $0x368] sm:$0xff]  ;;  %v5481_v44 = vcombine.low %v128_v32, %v132_v33 }
  0x1d   :  { %v140_v41 = vld [vmem:[%s8880_s1 + $0x360] sm:$0xff]  ;;  %v5492_v47 = vcombine.high %v137_v42, %v141_v43  ;;  %v145_v50 = vld [vmem:[%s8880_s1 + $0x388] sm:$0xff]  ;;  %v5491_v54 = vcombine.low %v137_v42, %v141_v43 }
  0x1e   :  { %2467 = vmatpush1.bf16.msra.mxu0 %v5433_v60  ;;  %2631 = vmatpush1.bf16.msra.mxu1 %v5435_v61  ;;  %v5490_v46 = vcombine.high %v136_v40, %v140_v41  ;;  %v144_v48 = vld [vmem:[%s8880_s1 + $0x380] sm:$0xff]  ;;  %v149_v51 = vld [vmem:[%s8880_s1 + $0x3a8] sm:$0xff]  ;;  %v5489_v52 = vcombine.low %v136_v40, %v140_v41 }
  0x1f   :  { %2468 = vmatprep.subr.bf16.mxu0 %v5442_v62  ;;  %2632 = vmatprep.subr.bf16.mxu1 %v5444_v63  ;;  %v148_v49 = vld [vmem:[%s8880_s1 + $0x3a0] sm:$0xff]  ;;  %v5500_v56 = vcombine.high %v145_v50, %v149_v51  ;;  %v153_v60 = vld [vmem:[%s8880_s1 + $0x3c8] sm:$0xff]  ;;  %v5499_v63 = vcombine.low %v145_v50, %v149_v51 }
  0x20   :  { %v5498_v55 = vcombine.high %v144_v48, %v148_v49  ;;  %v152_v58 = vld [vmem:[%s8880_s1 + $0x3c0] sm:$0xff]  ;;  %v157_v61 = vld [vmem:[%s8880_s1 + $0x3e8] sm:$0xff]  ;;  %v5497_v62 = vcombine.low %v144_v48, %v148_v49 }
  0x21   :  { %v156_v59 = vld [vmem:[%s8880_s1 + $0x3e0] sm:$0xff]  ;;  %v5508_v1 = vcombine.high %v153_v60, %v157_v61 }
  0x22   :  { %2469 = vmatpush1.bf16.msra.mxu0 %v5441_v4  ;;  %2633 = vmatpush1.bf16.msra.mxu1 %v5443_v5  ;;  %v5506_v0 = vcombine.high %v152_v58, %v156_v59  ;;  %v160_v2 = vld [vmem:[%s8880_s1 + $0x400] sm:$0xff]  ;;  %v161_v4 = vld [vmem:[%s8880_s1 + $0x408] sm:$0xff] }
  0x23   :  { %2470 = vmatprep.subr.bf16.mxu0 %v5450_v6  ;;  %2634 = vmatprep.subr.bf16.mxu1 %v5452_v7  ;;  %v164_v3 = vld [vmem:[%s8880_s1 + $0x420] sm:$0xff]  ;;  %v165_v5 = vld [vmem:[%s8880_s1 + $0x428] sm:$0xff]  ;;  %v5505_v6 = vcombine.low %v152_v58, %v156_v59  ;;  %v5507_v7 = vcombine.low %v153_v60, %v157_v61 }
  0x24   :  { %v5514_v8 = vcombine.high %v160_v2, %v164_v3  ;;  %v5516_v9 = vcombine.high %v161_v4, %v165_v5  ;;  %v168_v10 = vld [vmem:[%s8880_s1 + $0x440] sm:$0xff]  ;;  %v5513_v16 = vcombine.low %v160_v2, %v164_v3  ;;  %v5515_v18 = vcombine.low %v161_v4, %v165_v5 }
  0x25   :  { %v172_v11 = vld [vmem:[%s8880_s1 + $0x460] sm:$0xff] }
  0x26   :  { %2471 = vmatpush1.bf16.msra.mxu0 %v5449_v12  ;;  %2635 = vmatpush1.bf16.msra.mxu1 %v5451_v13  ;;  %v6914_v12 = vcombine.low %v6778_v53, %v6778_v53  ;;  %v169_v13 = vld [vmem:[%s8880_s1 + $0x448] sm:$0xff]  ;;  %v176_v53 = vld [vmem:[%s8880_s1 + $0x480] sm:$0xff]  ;;  %v5522_v19 = vcombine.high %v168_v10, %v172_v11  ;;  %v5521_v24 = vcombine.low %v168_v10, %v172_v11 }
  0x27   :  { %2472 = vmatprep.subr.bf16.mxu0 %v5458_v14  ;;  %2636 = vmatprep.subr.bf16.mxu1 %v5460_v15  ;;  %v173_v14 = vld [vmem:[%s8880_s1 + $0x468] sm:$0xff]  ;;  %v180_v17 = vld [vmem:[%s8880_s1 + $0x4a0] sm:$0xff] }
  0x28   :  { %v6925_v15 = vld [vmem:[%s8879_s0 + $0x8] sm:$0xff]  ;;  %v5523_v25 = vcombine.low %v169_v13, %v173_v14  ;;  %v5530_v26 = vcombine.high %v176_v53, %v180_v17  ;;  %v5529_v32 = vcombine.low %v176_v53, %v180_v17  ;;  %v192_v33 = vld [vmem:[%s8880_s1 + $0x500] sm:$0xff] }
  0x29   :  { %v196_v34 = vld [vmem:[%s8880_s1 + $0x520] sm:$0xff]  ;;  %v233_v53 = vld [vmem:[%s8880_s1 + $0x648] sm:$0xff] }
  0x2a   :  { %2473 = vmatpush1.bf16.msra.mxu0 %v5457_v20  ;;  %2637 = vmatpush1.bf16.msra.mxu1 %v5459_v21  ;;  %v5524_v20 = vcombine.high %v169_v13, %v173_v14  ;;  %v6935_v21 = vcombine.high %v6925_v15, %v6925_v15  ;;  %v200_v41 = vld [vmem:[%s8880_s1 + $0x540] sm:$0xff]  ;;  %v5545_v48 = vcombine.low %v192_v33, %v196_v34 }
  0x2b   :  { %2474 = vmatprep.subr.bf16.mxu0 %v5466_v22  ;;  %2638 = vmatprep.subr.bf16.mxu1 %v5468_v23  ;;  %v177_v22 = vld [vmem:[%s8880_s1 + $0x488] sm:$0xff]  ;;  %v204_v42 = vld [vmem:[%s8880_s1 + $0x560] sm:$0xff] }
  0x2c   :  { %v181_v23 = vld [vmem:[%s8880_s1 + $0x4a8] sm:$0xff]  ;;  %v5554_v50 = vcombine.high %v200_v41, %v204_v42  ;;  %v208_v51 = vld [vmem:[%s8880_s1 + $0x580] sm:$0xff]  ;;  %v5553_v58 = vcombine.low %v200_v41, %v204_v42 }
  0x2d   :  { %v5532_v27 = vcombine.high %v177_v22, %v181_v23  ;;  %v5531_v35 = vcombine.low %v177_v22, %v181_v23  ;;  %v216_v61 = vld [vmem:[%s8880_s1 + $0x5c0] sm:$0xff]  ;;  %v257_v41 = vld [vmem:[%s8880_s1 + $0x708] sm:$0xff] }
  0x2e   :  { %2475 = vmatpush1.bf16.msra.mxu0 %v5465_v28  ;;  %2639 = vmatpush1.bf16.msra.mxu1 %v5467_v29  ;;  %v184_v28 = vld [vmem:[%s8880_s1 + $0x4c0] sm:$0xff] }
  0x2f   :  { %2476 = vmatprep.subr.bf16.mxu0 %v5474_v30  ;;  %2640 = vmatprep.subr.bf16.mxu1 %v5476_v31  ;;  %v188_v29 = vld [vmem:[%s8880_s1 + $0x4e0] sm:$0xff]  ;;  %v185_v30 = vld [vmem:[%s8880_s1 + $0x4c8] sm:$0xff] }
  0x30   :  { %v189_v31 = vld [vmem:[%s8880_s1 + $0x4e8] sm:$0xff]  ;;  %v5537_v40 = vcombine.low %v184_v28, %v188_v29  ;;  %v224_v5 = vld [vmem:[%s8880_s1 + $0x600] sm:$0xff] }
  0x31   :  { %v5539_v43 = vcombine.low %v185_v30, %v189_v31  ;;  %v232_v14 = vld [vmem:[%s8880_s1 + $0x640] sm:$0xff] }
  0x32   :  { %2477 = vmatpush1.bf16.msra.mxu0 %v5473_v36  ;;  %2641 = vmatpush1.bf16.msra.mxu1 %v5475_v37  ;;  %v5538_v36 = vcombine.high %v184_v28, %v188_v29  ;;  %v193_v37 = vld [vmem:[%s8880_s1 + $0x508] sm:$0xff]  ;;  %v240_v23 = vld [vmem:[%s8880_s1 + $0x680] sm:$0xff] }
  0x33   :  { %2478 = vmatprep.subr.bf16.mxu0 %v5482_v38  ;;  %2642 = vmatprep.subr.bf16.mxu1 %v5484_v39  ;;  %v197_v38 = vld [vmem:[%s8880_s1 + $0x528] sm:$0xff]  ;;  %v5540_v39 = vcombine.high %v185_v30, %v189_v31  ;;  %v248_v31 = vld [vmem:[%s8880_s1 + $0x6c0] sm:$0xff] }
  0x34   :  { %v5547_v49 = vcombine.low %v193_v37, %v197_v38 }
  0x36   :  { %2479 = vmatpush1.bf16.msra.mxu0 %v5481_v44  ;;  %2643 = vmatpush1.bf16.msra.mxu1 %v5483_v45  ;;  %v5546_v44 = vcombine.high %v192_v33, %v196_v34  ;;  %v201_v45 = vld [vmem:[%s8880_s1 + $0x548] sm:$0xff] }
  0x37   :  { %2480 = vmatprep.subr.bf16.mxu0 %v5490_v46  ;;  %2644 = vmatprep.subr.bf16.mxu1 %v5492_v47  ;;  %v205_v46 = vld [vmem:[%s8880_s1 + $0x568] sm:$0xff]  ;;  %v5548_v47 = vcombine.high %v193_v37, %v197_v38 }
  0x38   :  { %v5555_v59 = vcombine.low %v201_v45, %v205_v46  ;;  %v249_v33 = vld [vmem:[%s8880_s1 + $0x6c8] sm:$0xff] }
  0x3a   :  { %2481 = vmatpush1.bf16.msra.mxu0 %v5489_v52  ;;  %2645 = vmatpush1.bf16.msra.mxu1 %v5491_v54  ;;  %v212_v52 = vld [vmem:[%s8880_s1 + $0x5a0] sm:$0xff]  ;;  %v209_v54 = vld [vmem:[%s8880_s1 + $0x588] sm:$0xff] }
  0x3b   :  { %2482 = vmatprep.subr.bf16.mxu0 %v5498_v55  ;;  %2646 = vmatprep.subr.bf16.mxu1 %v5500_v56  ;;  %v5556_v55 = vcombine.high %v201_v45, %v205_v46  ;;  %v213_v56 = vld [vmem:[%s8880_s1 + $0x5a8] sm:$0xff]  ;;  %v5562_v60 = vcombine.high %v208_v51, %v212_v52  ;;  %v5561_v2 = vcombine.low %v208_v51, %v212_v52 }
  0x3c   :  { %v5563_v3 = vcombine.low %v209_v54, %v213_v56  ;;  %v269_v51 = vld [vmem:[%s8880_s1 + $0x768] sm:$0xff] }
  0x3e   :  { %2483 = vmatpush1.bf16.msra.mxu0 %v5497_v62  ;;  %2647 = vmatpush1.bf16.msra.mxu1 %v5499_v63  ;;  %v220_v62 = vld [vmem:[%s8880_s1 + $0x5e0] sm:$0xff]  ;;  %v217_v63 = vld [vmem:[%s8880_s1 + $0x5c8] sm:$0xff] }
  0x3f   :  { %2484 = vmatprep.subr.bf16.mxu0 %v5506_v0  ;;  %2648 = vmatprep.subr.bf16.mxu1 %v5508_v1  ;;  %v5564_v0 = vcombine.high %v209_v54, %v213_v56  ;;  %v221_v1 = vld [vmem:[%s8880_s1 + $0x5e8] sm:$0xff]  ;;  %v5570_v4 = vcombine.high %v216_v61, %v220_v62  ;;  %v5569_v10 = vcombine.low %v216_v61, %v220_v62  ;;  %v272_v56 = vld [vmem:[%s8880_s1 + $0x780] sm:$0xff] }
  0x40   :  { %v5571_v11 = vcombine.low %v217_v63, %v221_v1  ;;  %v277_v61 = vld [vmem:[%s8880_s1 + $0x7a8] sm:$0xff] }
  0x42   :  { %2485 = vmatpush1.bf16.msra.mxu0 %v5505_v6  ;;  %2649 = vmatpush1.bf16.msra.mxu1 %v5507_v7  ;;  %v228_v6 = vld [vmem:[%s8880_s1 + $0x620] sm:$0xff]  ;;  %v225_v7 = vld [vmem:[%s8880_s1 + $0x608] sm:$0xff] }
  0x43   :  { %2495 = vmatprep.subr.bf16.mxu0 %v5514_v8  ;;  %2659 = vmatprep.subr.bf16.mxu1 %v5516_v9  ;;  %v5572_v8 = vcombine.high %v217_v63, %v221_v1  ;;  %v229_v9 = vld [vmem:[%s8880_s1 + $0x628] sm:$0xff]  ;;  %v5578_v13 = vcombine.high %v224_v5, %v228_v6  ;;  %v280_v1 = vld [vmem:[%s8880_s1 + $0x7c0] sm:$0xff] }
  0x44   :  { %v5580_v17 = vcombine.high %v225_v7, %v229_v9 }
  0x45   :  { %2487 = vmatmul.mubr.bf16.vlgmr.msra.gmra.mrb[0].mxu0 %v6914_v12  ;;  %2651 = vmatmul.mubr.bf16.vlgmr.msra.gmra.mrb[0].mxu1 %v6914_v12 }
  0x46   :  { %2496 = vmatpush1.bf16.msra.mxu0 %v5513_v16  ;;  %2660 = vmatpush1.bf16.msra.mxu1 %v5515_v18  ;;  %v236_v16 = vld [vmem:[%s8880_s1 + $0x660] sm:$0xff]  ;;  %v237_v18 = vld [vmem:[%s8880_s1 + $0x668] sm:$0xff] }
  0x47   :  { %2497 = vmatprep.subr.bf16.mxu0 %v5522_v19  ;;  %2661 = vmatprep.subr.bf16.mxu1 %v5524_v20  ;;  %v5577_v19 = vcombine.low %v224_v5, %v228_v6  ;;  %v5579_v20 = vcombine.low %v225_v7, %v229_v9  ;;  %v5586_v22 = vcombine.high %v232_v14, %v236_v16  ;;  %v285_v5 = vld [vmem:[%s8880_s1 + $0x7e8] sm:$0xff]  ;;  %v288_v9 = vld [vmem:[%s8880_s1 + $0x800] sm:$0xff] }
  0x48   :  { %2527 = vmatprep.mubr.bf16.mxu0 %v6935_v21  ;;  %2691 = vmatprep.mubr.bf16.mxu1 %v6935_v21  ;;  %v5585_v28 = vcombine.low %v232_v14, %v236_v16  ;;  %v5587_v29 = vcombine.low %v233_v53, %v237_v18  ;;  %v293_v14 = vld [vmem:[%s8880_s1 + $0x828] sm:$0xff] }
  0x4a   :  { %2498 = vmatpush1.bf16.msra.mxu0 %v5521_v24  ;;  %2662 = vmatpush1.bf16.msra.mxu1 %v5523_v25  ;;  %v244_v24 = vld [vmem:[%s8880_s1 + $0x6a0] sm:$0xff]  ;;  %v241_v25 = vld [vmem:[%s8880_s1 + $0x688] sm:$0xff] }
  0x4b   :  { %2499 = vmatprep.subr.bf16.mxu0 %v5530_v26  ;;  %2663 = vmatprep.subr.bf16.mxu1 %v5532_v27  ;;  %v5588_v26 = vcombine.high %v233_v53, %v237_v18  ;;  %v245_v27 = vld [vmem:[%s8880_s1 + $0x6a8] sm:$0xff]  ;;  %v5594_v30 = vcombine.high %v240_v23, %v244_v24  ;;  %v296_v53 = vld [vmem:[%s8880_s1 + $0x840] sm:$0xff] }
  0x4c   :  { %v5596_v34 = vcombine.high %v241_v25, %v245_v27  ;;  %v5595_v37 = vcombine.low %v241_v25, %v245_v27  ;;  %v7134_v25 = vcombine.low %v6925_v15, %v6925_v15 }
  0x4e   :  { %2500 = vmatpush1.bf16.msra.mxu0 %v5529_v32  ;;  %2664 = vmatpush1.bf16.msra.mxu1 %v5531_v35  ;;  %v252_v32 = vld [vmem:[%s8880_s1 + $0x6e0] sm:$0xff]  ;;  %v253_v35 = vld [vmem:[%s8880_s1 + $0x6e8] sm:$0xff] }
  0x4f   :  { %2501 = vmatprep.subr.bf16.mxu0 %v5538_v36  ;;  %2665 = vmatprep.subr.bf16.mxu1 %v5540_v39  ;;  %v5593_v36 = vcombine.low %v240_v23, %v244_v24  ;;  %v5602_v38 = vcombine.high %v248_v31, %v252_v32  ;;  %v256_v39 = vld [vmem:[%s8880_s1 + $0x700] sm:$0xff]  ;;  %v5604_v42 = vcombine.high %v249_v33, %v253_v35  ;;  %v7130_v24 = vld [vmem:[%s8879_s0 + $0x10] sm:$0xff] }
  0x50   :  { %v5603_v45 = vcombine.low %v249_v33, %v253_v35  ;;  %v7150_v33 = vcombine.high %v7130_v24, %v7130_v24 }
  0x52   :  { %2502 = vmatpush1.bf16.msra.mxu0 %v5537_v40  ;;  %2666 = vmatpush1.bf16.msra.mxu1 %v5539_v43  ;;  %v260_v40 = vld [vmem:[%s8880_s1 + $0x720] sm:$0xff]  ;;  %v261_v43 = vld [vmem:[%s8880_s1 + $0x728] sm:$0xff] }
  0x53   :  { %2503 = vmatprep.subr.bf16.mxu0 %v5546_v44  ;;  %2667 = vmatprep.subr.bf16.mxu1 %v5548_v47  ;;  %v5601_v44 = vcombine.low %v248_v31, %v252_v32  ;;  %v5610_v46 = vcombine.high %v256_v39, %v260_v40  ;;  %v264_v47 = vld [vmem:[%s8880_s1 + $0x740] sm:$0xff]  ;;  %v5609_v52 = vcombine.low %v256_v39, %v260_v40  ;;  %v305_v31 = vld [vmem:[%s8880_s1 + $0x888] sm:$0xff] }
  0x54   :  { %v5611_v54 = vcombine.low %v257_v41, %v261_v43  ;;  %v309_v32 = vld [vmem:[%s8880_s1 + $0x8a8] sm:$0xff] }
  0x55   :  { %v313_v39 = vld [vmem:[%s8880_s1 + $0x8c8] sm:$0xff]  ;;  %v5660_v40 = vcombine.high %v305_v31, %v309_v32 }
  0x56   :  { %2504 = vmatpush1.bf16.msra.mxu0 %v5545_v48  ;;  %2668 = vmatpush1.bf16.msra.mxu1 %v5547_v49  ;;  %v268_v48 = vld [vmem:[%s8880_s1 + $0x760] sm:$0xff]  ;;  %v265_v49 = vld [vmem:[%s8880_s1 + $0x748] sm:$0xff] }
  0x57   :  { %2505 = vmatprep.subr.bf16.mxu0 %v5554_v50  ;;  %2669 = vmatprep.subr.bf16.mxu1 %v5556_v55  ;;  %v5612_v50 = vcombine.high %v257_v41, %v261_v43  ;;  %v5618_v55 = vcombine.high %v264_v47, %v268_v48  ;;  %v5617_v62 = vcombine.low %v264_v47, %v268_v48  ;;  %v317_v41 = vld [vmem:[%s8880_s1 + $0x8e8] sm:$0xff] }
  0x58   :  { %v5619_v63 = vcombine.low %v265_v49, %v269_v51  ;;  %v5659_v43 = vcombine.low %v305_v31, %v309_v32  ;;  %v321_v47 = vld [vmem:[%s8880_s1 + $0x908] sm:$0xff]  ;;  %v5668_v48 = vcombine.high %v313_v39, %v317_v41 }
  0x59   :  { %v365_v31 = vld [vmem:[%s8880_s1 + $0xa68] sm:$0xff] }
  0x5a   :  { %2506 = vmatpush1.bf16.msra.mxu0 %v5553_v58  ;;  %2670 = vmatpush1.bf16.msra.mxu1 %v5555_v59  ;;  %v276_v58 = vld [vmem:[%s8880_s1 + $0x7a0] sm:$0xff]  ;;  %v273_v59 = vld [vmem:[%s8880_s1 + $0x788] sm:$0xff] }
  0x5b   :  { %2507 = vmatprep.subr.bf16.mxu0 %v5562_v60  ;;  %2671 = vmatprep.subr.bf16.mxu1 %v5564_v0  ;;  %v5620_v60 = vcombine.high %v265_v49, %v269_v51  ;;  %v5626_v0 = vcombine.high %v272_v56, %v276_v58  ;;  %v5625_v6 = vcombine.low %v272_v56, %v276_v58  ;;  %v325_v49 = vld [vmem:[%s8880_s1 + $0x928] sm:$0xff] }
  0x5c   :  { %v5627_v7 = vcombine.low %v273_v59, %v277_v61  ;;  %v5667_v51 = vcombine.low %v313_v39, %v317_v41  ;;  %v329_v56 = vld [vmem:[%s8880_s1 + $0x948] sm:$0xff]  ;;  %v5676_v58 = vcombine.high %v321_v47, %v325_v49 }
  0x5d   :  { %v373_v39 = vld [vmem:[%s8880_s1 + $0xaa8] sm:$0xff] }
  0x5e   :  { %2508 = vmatpush1.bf16.msra.mxu0 %v5561_v2  ;;  %2672 = vmatpush1.bf16.msra.mxu1 %v5563_v3  ;;  %v284_v2 = vld [vmem:[%s8880_s1 + $0x7e0] sm:$0xff]  ;;  %v281_v3 = vld [vmem:[%s8880_s1 + $0x7c8] sm:$0xff] }
  0x5f   :  { %2509 = vmatprep.subr.bf16.mxu0 %v5570_v4  ;;  %2673 = vmatprep.subr.bf16.mxu1 %v5572_v8  ;;  %v5628_v4 = vcombine.high %v273_v59, %v277_v61  ;;  %v5634_v8 = vcombine.high %v280_v1, %v284_v2  ;;  %v5633_v16 = vcombine.low %v280_v1, %v284_v2  ;;  %v333_v59 = vld [vmem:[%s8880_s1 + $0x968] sm:$0xff] }
  0x60   :  { %v5675_v61 = vcombine.low %v321_v47, %v325_v49  ;;  %v337_v1 = vld [vmem:[%s8880_s1 + $0x988] sm:$0xff]  ;;  %v5684_v2 = vcombine.high %v329_v56, %v333_v59 }
  0x61   :  { %v381_v47 = vld [vmem:[%s8880_s1 + $0xae8] sm:$0xff] }
  0x62   :  { %2510 = vmatpush1.bf16.msra.mxu0 %v5569_v10  ;;  %2674 = vmatpush1.bf16.msra.mxu1 %v5571_v11  ;;  %v292_v10 = vld [vmem:[%s8880_s1 + $0x820] sm:$0xff]  ;;  %v289_v11 = vld [vmem:[%s8880_s1 + $0x808] sm:$0xff] }
  0x63   :  { %2511 = vmatprep.subr.bf16.mxu0 %v5578_v13  ;;  %2675 = vmatprep.subr.bf16.mxu1 %v5580_v17  ;;  %v5636_v13 = vcombine.high %v281_v3, %v285_v5  ;;  %v5635_v17 = vcombine.low %v281_v3, %v285_v5  ;;  %v5642_v18 = vcombine.high %v288_v9, %v292_v10  ;;  %v341_v3 = vld [vmem:[%s8880_s1 + $0x9a8] sm:$0xff] }
  0x64   :  { %v5644_v23 = vcombine.high %v289_v11, %v293_v14  ;;  %v5643_v27 = vcombine.low %v289_v11, %v293_v14  ;;  %v5683_v5 = vcombine.low %v329_v56, %v333_v59  ;;  %v349_v11 = vld [vmem:[%s8880_s1 + $0x9e8] sm:$0xff]  ;;  %v5691_v14 = vcombine.low %v337_v1, %v341_v3 }
  0x65   :  { %v389_v56 = vld [vmem:[%s8880_s1 + $0xb28] sm:$0xff] }
  0x66   :  { %2512 = vmatpush1.bf16.msra.mxu0 %v5577_v19  ;;  %2676 = vmatpush1.bf16.msra.mxu1 %v5579_v20  ;;  %v300_v19 = vld [vmem:[%s8880_s1 + $0x860] sm:$0xff]  ;;  %v297_v20 = vld [vmem:[%s8880_s1 + $0x848] sm:$0xff] }
  0x67   :  { %2513 = vmatprep.subr.bf16.mxu0 %v5586_v22  ;;  %2677 = vmatprep.subr.bf16.mxu1 %v5588_v26  ;;  %v301_v22 = vld [vmem:[%s8880_s1 + $0x868] sm:$0xff]  ;;  %v5641_v26 = vcombine.low %v288_v9, %v292_v10  ;;  %v5692_v10 = vcombine.high %v337_v1, %v341_v3 }
  0x68   :  { %v5652_v15 = vcombine.high %v297_v20, %v301_v22  ;;  %v5651_v35 = vcombine.low %v297_v20, %v301_v22  ;;  %v345_v9 = vld [vmem:[%s8880_s1 + $0x9c8] sm:$0xff] }
  0x69   :  { %v357_v20 = vld [vmem:[%s8880_s1 + $0xa28] sm:$0xff] }
  0x6a   :  { %2514 = vmatpush1.bf16.msra.mxu0 %v5585_v28  ;;  %2678 = vmatpush1.bf16.msra.mxu1 %v5587_v29  ;;  %v5650_v28 = vcombine.high %v296_v53, %v300_v19  ;;  %v304_v29 = vld [vmem:[%s8880_s1 + $0x880] sm:$0xff]  ;;  %v397_v1 = vld [vmem:[%s8880_s1 + $0xb68] sm:$0xff] }
  0x6b   :  { %2515 = vmatprep.subr.bf16.mxu0 %v5594_v30  ;;  %2679 = vmatprep.subr.bf16.mxu1 %v5596_v34  ;;  %v308_v30 = vld [vmem:[%s8880_s1 + $0x8a0] sm:$0xff]  ;;  %v5649_v34 = vcombine.low %v296_v53, %v300_v19  ;;  %v5700_v19 = vcombine.high %v345_v9, %v349_v11 }
  0x6c   :  { %v352_v53 = vld [vmem:[%s8880_s1 + $0xa00] sm:$0xff] }
  0x6e   :  { %2516 = vmatpush1.bf16.msra.mxu0 %v5593_v36  ;;  %2680 = vmatpush1.bf16.msra.mxu1 %v5595_v37  ;;  %v5658_v36 = vcombine.high %v304_v29, %v308_v30  ;;  %v312_v37 = vld [vmem:[%s8880_s1 + $0x8c0] sm:$0xff] }
  0x6f   :  { %2517 = vmatprep.subr.bf16.mxu0 %v5602_v38  ;;  %2681 = vmatprep.subr.bf16.mxu1 %v5604_v42  ;;  %v316_v38 = vld [vmem:[%s8880_s1 + $0x8e0] sm:$0xff]  ;;  %v5657_v42 = vcombine.low %v304_v29, %v308_v30  ;;  %v361_v29 = vld [vmem:[%s8880_s1 + $0xa48] sm:$0xff] }
  0x70   :  { %v5715_v41 = vcombine.low %v361_v29, %v365_v31 }
  0x72   :  { %2518 = vmatpush1.bf16.msra.mxu0 %v5601_v44  ;;  %2682 = vmatpush1.bf16.msra.mxu1 %v5603_v45  ;;  %v5666_v44 = vcombine.high %v312_v37, %v316_v38  ;;  %v320_v45 = vld [vmem:[%s8880_s1 + $0x900] sm:$0xff] }
  0x73   :  { %2519 = vmatprep.subr.bf16.mxu0 %v5610_v46  ;;  %2683 = vmatprep.subr.bf16.mxu1 %v5612_v50  ;;  %v324_v46 = vld [vmem:[%s8880_s1 + $0x920] sm:$0xff]  ;;  %v5665_v50 = vcombine.low %v312_v37, %v316_v38  ;;  %v369_v37 = vld [vmem:[%s8880_s1 + $0xa88] sm:$0xff]  ;;  %v5716_v38 = vcombine.high %v361_v29, %v365_v31 }
  0x74   :  { %v5723_v49 = vcombine.low %v369_v37, %v373_v39  ;;  %v421_v29 = vld [vmem:[%s8880_s1 + $0xc28] sm:$0xff] }
  0x76   :  { %2520 = vmatpush1.bf16.msra.mxu0 %v5609_v52  ;;  %2684 = vmatpush1.bf16.msra.mxu1 %v5611_v54  ;;  %v5674_v52 = vcombine.high %v320_v45, %v324_v46  ;;  %v328_v54 = vld [vmem:[%s8880_s1 + $0x940] sm:$0xff] }
  0x77   :  { %2521 = vmatprep.subr.bf16.mxu0 %v5618_v55  ;;  %2685 = vmatprep.subr.bf16.mxu1 %v5620_v60  ;;  %v332_v55 = vld [vmem:[%s8880_s1 + $0x960] sm:$0xff]  ;;  %v5673_v60 = vcombine.low %v320_v45, %v324_v46  ;;  %v377_v45 = vld [vmem:[%s8880_s1 + $0xac8] sm:$0xff]  ;;  %v5724_v46 = vcombine.high %v369_v37, %v373_v39  ;;  %v39_v37 = vld [vmem:[%s8880_s1 + $0x38] sm:$0xff] }
  0x78   :  { %v5731_v59 = vcombine.low %v377_v45, %v381_v47 }
  0x7a   :  { %2522 = vmatpush1.bf16.msra.mxu0 %v5617_v62  ;;  %2686 = vmatpush1.bf16.msra.mxu1 %v5619_v63  ;;  %v5682_v62 = vcombine.high %v328_v54, %v332_v55  ;;  %v336_v63 = vld [vmem:[%s8880_s1 + $0x980] sm:$0xff] }
  0x7b   :  { %2523 = vmatprep.subr.bf16.mxu0 %v5626_v0  ;;  %2687 = vmatprep.subr.bf16.mxu1 %v5628_v4  ;;  %v340_v0 = vld [vmem:[%s8880_s1 + $0x9a0] sm:$0xff]  ;;  %v5681_v4 = vcombine.low %v328_v54, %v332_v55  ;;  %v385_v54 = vld [vmem:[%s8880_s1 + $0xb08] sm:$0xff]  ;;  %v5732_v55 = vcombine.high %v377_v45, %v381_v47  ;;  %v46_v45 = vld [vmem:[%s8880_s1 + $0x70] sm:$0xff] }
  0x7c   :  { %v5739_v3 = vcombine.low %v385_v54, %v389_v56  ;;  %v47_v47 = vld [vmem:[%s8880_s1 + $0x78] sm:$0xff] }
  0x7e   :  { %2524 = vmatpush1.bf16.msra.mxu0 %v5625_v6  ;;  %2688 = vmatpush1.bf16.msra.mxu1 %v5627_v7  ;;  %v5690_v6 = vcombine.high %v336_v63, %v340_v0  ;;  %v344_v7 = vld [vmem:[%s8880_s1 + $0x9c0] sm:$0xff] }
  0x7f   :  { %2525 = vmatprep.subr.bf16.mxu0 %v5634_v8  ;;  %2689 = vmatprep.subr.bf16.mxu1 %v5636_v13  ;;  %v348_v8 = vld [vmem:[%s8880_s1 + $0x9e0] sm:$0xff]  ;;  %v5689_v13 = vcombine.low %v336_v63, %v340_v0  ;;  %v393_v63 = vld [vmem:[%s8880_s1 + $0xb48] sm:$0xff]  ;;  %v5740_v0 = vcombine.high %v385_v54, %v389_v56  ;;  %v51_v54 = vld [vmem:[%s8880_s1 + $0x98] sm:$0xff] }
  0x80   :  { %v5697_v22 = vcombine.low %v344_v7, %v348_v8  ;;  %v55_v56 = vld [vmem:[%s8880_s1 + $0xb8] sm:$0xff] }
  0x82   :  { %2526 = vmatpush1.bf16.msra.mxu0 %v5633_v16  ;;  %2690 = vmatpush1.bf16.msra.mxu1 %v5635_v17  ;;  %v5698_v16 = vcombine.high %v344_v7, %v348_v8  ;;  %v356_v17 = vld [vmem:[%s8880_s1 + $0xa20] sm:$0xff]  ;;  %v401_v7 = vld [vmem:[%s8880_s1 + $0xb88] sm:$0xff]  ;;  %v5748_v8 = vcombine.high %v393_v63, %v397_v1 }
  0x83   :  { %2536 = vmatprep.subr.bf16.mxu0 %v5642_v18  ;;  %2700 = vmatprep.subr.bf16.mxu1 %v5644_v23  ;;  %v353_v18 = vld [vmem:[%s8880_s1 + $0xa08] sm:$0xff]  ;;  %v5699_v23 = vcombine.low %v345_v9, %v349_v11  ;;  %v5747_v11 = vcombine.low %v393_v63, %v397_v1  ;;  %v59_v63 = vld [vmem:[%s8880_s1 + $0xd8] sm:$0xff] }
  0x84   :  { %v5708_v30 = vcombine.high %v353_v18, %v357_v20  ;;  %v5707_v32 = vcombine.low %v353_v18, %v357_v20  ;;  %v405_v9 = vld [vmem:[%s8880_s1 + $0xba8] sm:$0xff]  ;;  %v63_v1 = vld [vmem:[%s8880_s1 + $0xf8] sm:$0xff] }
  0x85   :  { %2528 = vmatmul.mubr.bf16.vlgmr.msra.gmra.mrb[0].mxu0 %v7134_v25  ;;  %2692 = vmatmul.mubr.bf16.vlgmr.msra.gmra.mrb[0].mxu1 %v7134_v25  ;;  %v413_v18 = vld [vmem:[%s8880_s1 + $0xbe8] sm:$0xff]  ;;  %v5755_v20 = vcombine.low %v401_v7, %v405_v9 }
  0x86   :  { %2537 = vmatpush1.bf16.msra.mxu0 %v5641_v26  ;;  %2701 = vmatpush1.bf16.msra.mxu1 %v5643_v27  ;;  %v5706_v26 = vcombine.high %v352_v53, %v356_v17  ;;  %v360_v27 = vld [vmem:[%s8880_s1 + $0xa40] sm:$0xff] }
  0x87   :  { %2538 = vmatprep.subr.bf16.mxu0 %v5650_v28  ;;  %2702 = vmatprep.subr.bf16.mxu1 %v5652_v15  ;;  %v364_v28 = vld [vmem:[%s8880_s1 + $0xa60] sm:$0xff]  ;;  %v5705_v15 = vcombine.low %v352_v53, %v356_v17  ;;  %v409_v53 = vld [vmem:[%s8880_s1 + $0xbc8] sm:$0xff]  ;;  %v5756_v17 = vcombine.high %v401_v7, %v405_v9  ;;  %v67_v7 = vld [vmem:[%s8880_s1 + $0x118] sm:$0xff] }
  0x88   :  { %2568 = vmatprep.mubr.bf16.mxu0 %v7150_v33  ;;  %2732 = vmatprep.mubr.bf16.mxu1 %v7150_v33  ;;  %v5763_v31 = vcombine.low %v409_v53, %v413_v18 }
  0x8a   :  { %2539 = vmatpush1.bf16.msra.mxu0 %v5649_v34  ;;  %2703 = vmatpush1.bf16.msra.mxu1 %v5651_v35  ;;  %v5714_v34 = vcombine.high %v360_v27, %v364_v28  ;;  %v368_v35 = vld [vmem:[%s8880_s1 + $0xa80] sm:$0xff] }
  0x8b   :  { %2540 = vmatprep.subr.bf16.mxu0 %v5658_v36  ;;  %2704 = vmatprep.subr.bf16.mxu1 %v5660_v40  ;;  %v372_v36 = vld [vmem:[%s8880_s1 + $0xaa0] sm:$0xff]  ;;  %v5713_v40 = vcombine.low %v360_v27, %v364_v28  ;;  %v417_v27 = vld [vmem:[%s8880_s1 + $0xc08] sm:$0xff]  ;;  %v5764_v28 = vcombine.high %v409_v53, %v413_v18 }
  0x8e   :  { %2541 = vmatpush1.bf16.msra.mxu0 %v5657_v42  ;;  %2705 = vmatpush1.bf16.msra.mxu1 %v5659_v43  ;;  %v5722_v42 = vcombine.high %v368_v35, %v372_v36  ;;  %v376_v43 = vld [vmem:[%s8880_s1 + $0xac0] sm:$0xff] }
  0x8f   :  { %2542 = vmatprep.subr.bf16.mxu0 %v5666_v44  ;;  %2706 = vmatprep.subr.bf16.mxu1 %v5668_v48  ;;  %v380_v44 = vld [vmem:[%s8880_s1 + $0xae0] sm:$0xff]  ;;  %v5721_v48 = vcombine.low %v368_v35, %v372_v36  ;;  %v5772_v35 = vcombine.high %v417_v27, %v421_v29  ;;  %v35_v36 = vld [vmem:[%s8880_s1 + $0x18] sm:$0xff] }
  0x92   :  { %2543 = vmatpush1.bf16.msra.mxu0 %v5665_v50  ;;  %2707 = vmatpush1.bf16.msra.mxu1 %v5667_v51  ;;  %v5730_v50 = vcombine.high %v376_v43, %v380_v44  ;;  %v384_v51 = vld [vmem:[%s8880_s1 + $0xb00] sm:$0xff] }
  0x93   :  { %2544 = vmatprep.subr.bf16.mxu0 %v5674_v52  ;;  %2708 = vmatprep.subr.bf16.mxu1 %v5676_v58  ;;  %v388_v52 = vld [vmem:[%s8880_s1 + $0xb20] sm:$0xff]  ;;  %v5729_v58 = vcombine.low %v376_v43, %v380_v44  ;;  %v6649_v43 = vmov 0   ;;  %v42_v44 = vld [vmem:[%s8880_s1 + $0x50] sm:$0xff] }
  0x96   :  { %2545 = vmatpush1.bf16.msra.mxu0 %v5673_v60  ;;  %2709 = vmatpush1.bf16.msra.mxu1 %v5675_v61  ;;  %v5738_v60 = vcombine.high %v384_v51, %v388_v52  ;;  %v392_v61 = vld [vmem:[%s8880_s1 + $0xb40] sm:$0xff] }
  0x97   :  { %2546 = vmatprep.subr.bf16.mxu0 %v5682_v62  ;;  %2710 = vmatprep.subr.bf16.mxu1 %v5684_v2  ;;  %v396_v62 = vld [vmem:[%s8880_s1 + $0xb60] sm:$0xff]  ;;  %v5737_v2 = vcombine.low %v384_v51, %v388_v52  ;;  %v50_v51 = vld [vmem:[%s8880_s1 + $0x90] sm:$0xff] }
  0x98   :  { %v54_v52 = vld [vmem:[%s8880_s1 + $0xb0] sm:$0xff] }
  0x9a   :  { %2547 = vmatpush1.bf16.msra.mxu0 %v5681_v4  ;;  %2711 = vmatpush1.bf16.msra.mxu1 %v5683_v5  ;;  %v5746_v4 = vcombine.high %v392_v61, %v396_v62  ;;  %v400_v5 = vld [vmem:[%s8880_s1 + $0xb80] sm:$0xff] }
  0x9b   :  { %2548 = vmatprep.subr.bf16.mxu0 %v5690_v6  ;;  %2712 = vmatprep.subr.bf16.mxu1 %v5692_v10  ;;  %v404_v6 = vld [vmem:[%s8880_s1 + $0xba0] sm:$0xff]  ;;  %v5745_v10 = vcombine.low %v392_v61, %v396_v62  ;;  %v58_v61 = vld [vmem:[%s8880_s1 + $0xd0] sm:$0xff] }
  0x9c   :  { %v62_v62 = vld [vmem:[%s8880_s1 + $0xf0] sm:$0xff] }
  0x9d   :  { %v5413_v9 = vcombine.low %v58_v61, %v62_v62 }
  0x9e   :  { %2549 = vmatpush1.bf16.msra.mxu0 %v5689_v13  ;;  %2713 = vmatpush1.bf16.msra.mxu1 %v5691_v14  ;;  %v5754_v13 = vcombine.high %v400_v5, %v404_v6  ;;  %v408_v14 = vld [vmem:[%s8880_s1 + $0xbc0] sm:$0xff] }
  0x9f   :  { %2550 = vmatprep.subr.bf16.mxu0 %v5698_v16  ;;  %2714 = vmatprep.subr.bf16.mxu1 %v5700_v19  ;;  %v412_v16 = vld [vmem:[%s8880_s1 + $0xbe0] sm:$0xff]  ;;  %v5753_v19 = vcombine.low %v400_v5, %v404_v6  ;;  %v66_v5 = vld [vmem:[%s8880_s1 + $0x110] sm:$0xff] }
  0xa0   :  { %v70_v6 = vld [vmem:[%s8880_s1 + $0x130] sm:$0xff] }
  0xa1   :  { %v5421_v18 = vcombine.low %v66_v5, %v70_v6 }
  0xa2   :  { %2551 = vmatpush1.bf16.msra.mxu0 %v5697_v22  ;;  %2715 = vmatpush1.bf16.msra.mxu1 %v5699_v23  ;;  %v5762_v22 = vcombine.high %v408_v14, %v412_v16  ;;  %v416_v23 = vld [vmem:[%s8880_s1 + $0xc00] sm:$0xff] }
  0xa3   :  { %2552 = vmatprep.subr.bf16.mxu0 %v5706_v26  ;;  %2716 = vmatprep.subr.bf16.mxu1 %v5708_v30  ;;  %v420_v26 = vld [vmem:[%s8880_s1 + $0xc20] sm:$0xff]  ;;  %v5761_v30 = vcombine.low %v408_v14, %v412_v16  ;;  %v78_v14 = vld [vmem:[%s8880_s1 + $0x170] sm:$0xff]  ;;  %v75_v16 = vld [vmem:[%s8880_s1 + $0x158] sm:$0xff] }
  0xa4   :  { %v5769_v39 = vcombine.low %v416_v23, %v420_v26 }
  0xa6   :  { %2553 = vmatpush1.bf16.msra.mxu0 %v5705_v15  ;;  %2717 = vmatpush1.bf16.msra.mxu1 %v5707_v32  ;;  %v5770_v15 = vcombine.high %v416_v23, %v420_v26  ;;  %v34_v32 = vld [vmem:[%s8880_s1 + $0x10] sm:$0xff] }
  0xa7   :  { %2554 = vmatprep.subr.bf16.mxu0 %v5714_v34  ;;  %2718 = vmatprep.subr.bf16.mxu1 %v5716_v38  ;;  %v38_v34 = vld [vmem:[%s8880_s1 + $0x30] sm:$0xff]  ;;  %v7338_v38 = vcombine.low %v7130_v24, %v7130_v24  ;;  %v6206_v24 = vld [vmem:[%s8879_s0 + $0x18] ss:$0 sps:$4 sm:$0xff]  }
  0xa8   :  { %v86_v26 = vld [vmem:[%s8880_s1 + $0x1b0] sm:$0xff] }
  0xaa   :  { %2555 = vmatpush1.bf16.msra.mxu0 %v5713_v40  ;;  %2719 = vmatpush1.bf16.msra.mxu1 %v5715_v41  ;;  %v5771_v40 = vcombine.low %v417_v27, %v421_v29  ;;  %v5390_v41 = vcombine.high %v34_v32, %v38_v34  ;;  %v83_v27 = vld [vmem:[%s8880_s1 + $0x198] sm:$0xff] }
  0xab   :  { %2556 = vmatprep.subr.bf16.mxu0 %v5722_v42  ;;  %2720 = vmatprep.subr.bf16.mxu1 %v5724_v46  ;;  %v5392_v42 = vcombine.high %v35_v36, %v39_v37  ;;  %v43_v46 = vld [vmem:[%s8880_s1 + $0x58] sm:$0xff] }
  0xae   :  { %2557 = vmatpush1.bf16.msra.mxu0 %v5721_v48  ;;  %2721 = vmatpush1.bf16.msra.mxu1 %v5723_v49  ;;  %v5389_v48 = vcombine.low %v34_v32, %v38_v34  ;;  %v5391_v49 = vcombine.low %v35_v36, %v39_v37 }
  0xaf   :  { %2558 = vmatprep.subr.bf16.mxu0 %v5730_v50  ;;  %2722 = vmatprep.subr.bf16.mxu1 %v5732_v55  ;;  %v5398_v50 = vcombine.high %v42_v44, %v46_v45  ;;  %v5400_v55 = vcombine.high %v43_v46, %v47_v47 }
  0xb2   :  { %2559 = vmatpush1.bf16.msra.mxu0 %v5729_v58  ;;  %2723 = vmatpush1.bf16.msra.mxu1 %v5731_v59  ;;  %v5397_v58 = vcombine.low %v42_v44, %v46_v45  ;;  %v5399_v59 = vcombine.low %v43_v46, %v47_v47 }
  0xb3   :  { %2560 = vmatprep.subr.bf16.mxu0 %v5738_v60  ;;  %2724 = vmatprep.subr.bf16.mxu1 %v5740_v0  ;;  %v5406_v60 = vcombine.high %v50_v51, %v54_v52  ;;  %v5408_v0 = vcombine.high %v51_v54, %v55_v56 }
  0xb6   :  { %2561 = vmatpush1.bf16.msra.mxu0 %v5737_v2  ;;  %2725 = vmatpush1.bf16.msra.mxu1 %v5739_v3  ;;  %v5405_v2 = vcombine.low %v50_v51, %v54_v52  ;;  %v5407_v3 = vcombine.low %v51_v54, %v55_v56 }
  0xb7   :  { %2562 = vmatprep.subr.bf16.mxu0 %v5746_v4  ;;  %2726 = vmatprep.subr.bf16.mxu1 %v5748_v8  ;;  %v5414_v4 = vcombine.high %v58_v61, %v62_v62  ;;  %v71_v8 = vld [vmem:[%s8880_s1 + $0x138] sm:$0xff] }
  0xb8   :  { %v5424_v53 = vcombine.high %v67_v7, %v71_v8 }
  0xba   :  { %2563 = vmatpush1.bf16.msra.mxu0 %v5745_v10  ;;  %2727 = vmatpush1.bf16.msra.mxu1 %v5747_v11  ;;  %v5415_v10 = vcombine.low %v59_v63, %v63_v1  ;;  %v5422_v11 = vcombine.high %v66_v5, %v70_v6 }
  0xbb   :  { %2564 = vmatprep.subr.bf16.mxu0 %v5754_v13  ;;  %2728 = vmatprep.subr.bf16.mxu1 %v5756_v17  ;;  %v74_v13 = vld [vmem:[%s8880_s1 + $0x150] sm:$0xff]  ;;  %v79_v17 = vld [vmem:[%s8880_s1 + $0x178] sm:$0xff] }
  0xbc   :  { %v5432_v23 = vcombine.high %v75_v16, %v79_v17 }
  0xbe   :  { %2565 = vmatpush1.bf16.msra.mxu0 %v5753_v19  ;;  %2729 = vmatpush1.bf16.msra.mxu1 %v5755_v20  ;;  %v5423_v19 = vcombine.low %v67_v7, %v71_v8  ;;  %v5430_v20 = vcombine.high %v74_v13, %v78_v14 }
  0xbf   :  { %2566 = vmatprep.subr.bf16.mxu0 %v5762_v22  ;;  %2730 = vmatprep.subr.bf16.mxu1 %v5764_v28  ;;  %v82_v22 = vld [vmem:[%s8880_s1 + $0x190] sm:$0xff]  ;;  %v87_v28 = vld [vmem:[%s8880_s1 + $0x1b8] sm:$0xff] }
  0xc2   :  { %2567 = vmatpush1.bf16.msra.mxu0 %v5761_v30  ;;  %2731 = vmatpush1.bf16.msra.mxu1 %v5763_v31 }
  0xc3   :  { %2577 = vmatprep.subr.bf16.mxu0 %v5770_v15  ;;  %2741 = vmatprep.subr.bf16.mxu1 %v5772_v35 }
  0xc5   :  { %2569 = vmatmul.mubr.bf16.vlgmr.msra.gmra.mrb[0].mxu0 %v7338_v38  ;;  %2733 = vmatmul.mubr.bf16.vlgmr.msra.gmra.mrb[0].mxu1 %v7338_v38 }
  0xc6   :  { %2578 = vmatpush1.bf16.msra.mxu0 %v5769_v39  ;;  %2742 = vmatpush1.bf16.msra.mxu1 %v5771_v40 }
  0xc7   :  { %2609 = vmatprep.mubr.bf16.mxu0 %v6649_v43  ;;  %2773 = vmatprep.mubr.bf16.mxu1 %v6649_v43 }
  0xc8   :  { %2782 = vmatprep.subr.bf16.mxu0 %v5390_v41  ;;  %2946 = vmatprep.subr.bf16.mxu1 %v5392_v42 }
  0xd1   :  { %5777 = vmatmul.mubr.msk.bf16.vlgmr.msra.gmra.mrb[0].mxu0 %vm2450_vm0, %v6206_v24  ;;  %5778 = vmatmul.mubr.msk.bf16.vlgmr.msra.gmra.mrb[0].mxu1 %vm2450_vm0, %v6206_v24 }
  0xd2   :  { %2783 = vmatpush1.bf16.msra.mxu0 %v5389_v48  ;;  %2947 = vmatpush1.bf16.msra.mxu1 %v5391_v49 }
  0xd3   :  { %2784 = vmatprep.subr.bf16.mxu0 %v5398_v50  ;;  %2948 = vmatprep.subr.bf16.mxu1 %v5400_v55 }
  0xd4   :  { %2814 = vmatprep.mubr.bf16.mxu0 %v6788_v57  ;;  %2978 = vmatprep.mubr.bf16.mxu1 %v6788_v57  ;;  %v5416_v57 = vcombine.high %v59_v63, %v63_v1 }
  0xd6   :  { %2785 = vmatpush1.bf16.msra.mxu0 %v5397_v58  ;;  %2949 = vmatpush1.bf16.msra.mxu1 %v5399_v59 }
  0xd7   :  { %2786 = vmatprep.subr.bf16.mxu0 %v5406_v60  ;;  %2950 = vmatprep.subr.bf16.mxu1 %v5408_v0 }
  0xda   :  { %2787 = vmatpush1.bf16.msra.mxu0 %v5405_v2  ;;  %2951 = vmatpush1.bf16.msra.mxu1 %v5407_v3 }
  0xdb   :  { %2788 = vmatprep.subr.bf16.mxu0 %v5414_v4  ;;  %2952 = vmatprep.subr.bf16.mxu1 %v5416_v57 }
  0xde   :  { %2789 = vmatpush1.bf16.msra.mxu0 %v5413_v9  ;;  %2953 = vmatpush1.bf16.msra.mxu1 %v5415_v10 }
  0xdf   :  { %2790 = vmatprep.subr.bf16.mxu0 %v5422_v11  ;;  %2954 = vmatprep.subr.bf16.mxu1 %v5424_v53 }
  0xe0   :  { %12 = vsyncpa [#allocation3], 0  ;;  %v5429_v29 = vcombine.low %v74_v13, %v78_v14  ;;  %v5431_v30 = vcombine.low %v75_v16, %v79_v17  ;;  %v5438_v31 = vcombine.high %v82_v22, %v86_v26  ;;  %v5440_v15 = vcombine.high %v83_v27, %v87_v28  ;;  %v90_v32 = vld [vmem:[%s8880_s1 + $0x1d0] sm:$0xff]  ;;  %v91_v35 = vld [vmem:[%s8880_s1 + $0x1d8] sm:$0xff]  ;;  %s6650_s13 = smov [#allocation2]  }
  0xe1   :  { %v94_v34 = vld [vmem:[%s8880_s1 + $0x1f0] sm:$0xff]  ;;  %v95_v36 = vld [vmem:[%s8880_s1 + $0x1f8] sm:$0xff]  ;;  %v5437_v37 = vcombine.low %v82_v22, %v86_v26  ;;  %v5439_v39 = vcombine.low %v83_v27, %v87_v28  ;;  %s5370_s14 = sshll.u32 %s6650_s13, 4  ;;  %s5371_s14 = int_to_ptr.vmem [resolvable:$true] %s5370_s14 }
  0xe2   :  { %2791 = vmatpush1.bf16.msra.mxu0 %v5421_v18  ;;  %2955 = vmatpush1.bf16.msra.mxu1 %v5423_v19  ;;  %v5446_v40 = vcombine.high %v90_v32, %v94_v34  ;;  %v5448_v41 = vcombine.high %v91_v35, %v95_v36  ;;  %v98_v42 = vld [vmem:[%s8880_s1 + $0x210] sm:$0xff]  ;;  %v99_v44 = vld [vmem:[%s8880_s1 + $0x218] sm:$0xff]  ;;  %v5445_v46 = vcombine.low %v90_v32, %v94_v34  ;;  %s6625_s15 = scalar_lea.vmem %s5371_s14, 128  ;;  %p6630_p1 = scmp.lt.s32.totalorder %s5371_s14, %s5371_s14 }
  0xe3   :  { %2792 = vmatprep.subr.bf16.mxu0 %v5430_v20  ;;  %2956 = vmatprep.subr.bf16.mxu1 %v5432_v23  ;;  %v102_v24 = vld [vmem:[%s8880_s1 + $0x230] sm:$0xff]  ;;  %v103_v45 = vld [vmem:[%s8880_s1 + $0x238] sm:$0xff]  ;;  %v5447_v47 = vcombine.low %v91_v35, %v95_v36  ;;  %p6626_p0 = scmp.ne.s32.totalorder %s5371_s14, %s6625_s15  ;;  %p6631_p2 = scmp.lt.s32.totalorder %s6625_s15, %s6625_s15 }
  0xe4   :  { %v5454_v48 = vcombine.high %v98_v42, %v102_v24  ;;  %v5456_v49 = vcombine.high %v99_v44, %v103_v45  ;;  %v106_v50 = vld [vmem:[%s8880_s1 + $0x250] sm:$0xff]  ;;  %v107_v52 = vld [vmem:[%s8880_s1 + $0x258] sm:$0xff]  ;;  %v5453_v55 = vcombine.low %v98_v42, %v102_v24  ;;  %v5455_v56 = vcombine.low %v99_v44, %v103_v45 }
  0xe5   :  { %v110_v51 = vld [vmem:[%s8880_s1 + $0x270] sm:$0xff]  ;;  %v111_v54 = vld [vmem:[%s8880_s1 + $0x278] sm:$0xff]  ;;  %p6632_p3 = por %p6631_p2, %p6630_p1 }
  0xe6   :  { %2793 = vmatpush1.bf16.msra.mxu0 %v5429_v29  ;;  %2957 = vmatpush1.bf16.msra.mxu1 %v5431_v30  ;;  %v5462_v58 = vcombine.high %v106_v50, %v110_v51  ;;  %v5464_v59 = vcombine.high %v107_v52, %v111_v54  ;;  %v114_v60 = vld [vmem:[%s8880_s1 + $0x290] sm:$0xff]  ;;  %v115_v62 = vld [vmem:[%s8880_s1 + $0x298] sm:$0xff]  ;;  %v5461_v0 = vcombine.low %v106_v50, %v110_v51 }
  0xe7   :  { %2794 = vmatprep.subr.bf16.mxu0 %v5438_v31  ;;  %2958 = vmatprep.subr.bf16.mxu1 %v5440_v15  ;;  %v118_v61 = vld [vmem:[%s8880_s1 + $0x2b0] sm:$0xff]  ;;  %v119_v63 = vld [vmem:[%s8880_s1 + $0x2b8] sm:$0xff]  ;;  %v5463_v1 = vcombine.low %v107_v52, %v111_v54  ;;  %p6633_p4 = pnand %p6632_p3, %p6626_p0 }
  0xe8   :  { %v5470_v2 = vcombine.high %v114_v60, %v118_v61  ;;  %v5472_v3 = vcombine.high %v115_v62, %v119_v63  ;;  %v122_v4 = vld [vmem:[%s8880_s1 + $0x2d0] sm:$0xff]  ;;  %v123_v6 = vld [vmem:[%s8880_s1 + $0x2d8] sm:$0xff]  ;;  %v5469_v57 = vcombine.low %v114_v60, %v118_v61  ;;  %v5471_v8 = vcombine.low %v115_v62, %v119_v63 }
  0xe9   :  { %v126_v5 = vld [vmem:[%s8880_s1 + $0x2f0] sm:$0xff]  ;;  %v127_v7 = vld [vmem:[%s8880_s1 + $0x2f8] sm:$0xff] }
  0xea   :  { %2795 = vmatpush1.bf16.msra.mxu0 %v5437_v37  ;;  %2959 = vmatpush1.bf16.msra.mxu1 %v5439_v39  ;;  %v5478_v9 = vcombine.high %v122_v4, %v126_v5  ;;  %v5480_v10 = vcombine.high %v123_v6, %v127_v7  ;;  %v130_v11 = vld [vmem:[%s8880_s1 + $0x310] sm:$0xff]  ;;  %v131_v14 = vld [vmem:[%s8880_s1 + $0x318] sm:$0xff]  ;;  %v5477_v53 = vcombine.low %v122_v4, %v126_v5 }
  0xeb   :  { %2796 = vmatprep.subr.bf16.mxu0 %v5446_v40  ;;  %2960 = vmatprep.subr.bf16.mxu1 %v5448_v41  ;;  %v134_v13 = vld [vmem:[%s8880_s1 + $0x330] sm:$0xff]  ;;  %v135_v16 = vld [vmem:[%s8880_s1 + $0x338] sm:$0xff]  ;;  %v5479_v17 = vcombine.low %v123_v6, %v127_v7 }
  0xec   :  { %v5486_v18 = vcombine.high %v130_v11, %v134_v13  ;;  %v5488_v19 = vcombine.high %v131_v14, %v135_v16  ;;  %v138_v20 = vld [vmem:[%s8880_s1 + $0x350] sm:$0xff]  ;;  %v139_v23 = vld [vmem:[%s8880_s1 + $0x358] sm:$0xff]  ;;  %v5485_v27 = vcombine.low %v130_v11, %v134_v13  ;;  %v5487_v28 = vcombine.low %v131_v14, %v135_v16 }
  0xed   :  { %v142_v22 = vld [vmem:[%s8880_s1 + $0x370] sm:$0xff]  ;;  %v143_v26 = vld [vmem:[%s8880_s1 + $0x378] sm:$0xff] }
  0xee   :  { %2797 = vmatpush1.bf16.msra.mxu0 %v5445_v46  ;;  %2961 = vmatpush1.bf16.msra.mxu1 %v5447_v47  ;;  %v5494_v29 = vcombine.high %v138_v20, %v142_v22  ;;  %v5496_v30 = vcombine.high %v139_v23, %v143_v26  ;;  %v146_v31 = vld [vmem:[%s8880_s1 + $0x390] sm:$0xff]  ;;  %v147_v32 = vld [vmem:[%s8880_s1 + $0x398] sm:$0xff]  ;;  %v5493_v35 = vcombine.low %v138_v20, %v142_v22 }
  0xef   :  { %2798 = vmatprep.subr.bf16.mxu0 %v5454_v48  ;;  %2962 = vmatprep.subr.bf16.mxu1 %v5456_v49  ;;  %v150_v15 = vld [vmem:[%s8880_s1 + $0x3b0] sm:$0xff]  ;;  %v151_v34 = vld [vmem:[%s8880_s1 + $0x3b8] sm:$0xff]  ;;  %v5495_v36 = vcombine.low %v139_v23, %v143_v26 }
  0xf0   :  { %v5502_v37 = vcombine.high %v146_v31, %v150_v15  ;;  %v5504_v39 = vcombine.high %v147_v32, %v151_v34  ;;  %v154_v40 = vld [vmem:[%s8880_s1 + $0x3d0] sm:$0xff]  ;;  %v155_v42 = vld [vmem:[%s8880_s1 + $0x3d8] sm:$0xff]  ;;  %v5501_v44 = vcombine.low %v146_v31, %v150_v15  ;;  %v5503_v45 = vcombine.low %v147_v32, %v151_v34 }
  0xf1   :  { %v158_v41 = vld [vmem:[%s8880_s1 + $0x3f0] sm:$0xff]  ;;  %v159_v24 = vld [vmem:[%s8880_s1 + $0x3f8] sm:$0xff] }
  0xf2   :  { %2799 = vmatpush1.bf16.msra.mxu0 %v5453_v55  ;;  %2963 = vmatpush1.bf16.msra.mxu1 %v5455_v56  ;;  %v5510_v46 = vcombine.high %v154_v40, %v158_v41  ;;  %v5512_v47 = vcombine.high %v155_v42, %v159_v24  ;;  %v162_v48 = vld [vmem:[%s8880_s1 + $0x410] sm:$0xff]  ;;  %v163_v50 = vld [vmem:[%s8880_s1 + $0x418] sm:$0xff]  ;;  %v5509_v52 = vcombine.low %v154_v40, %v158_v41 }
  0xf3   :  { %2800 = vmatprep.subr.bf16.mxu0 %v5462_v58  ;;  %2964 = vmatprep.subr.bf16.mxu1 %v5464_v59  ;;  %v166_v49 = vld [vmem:[%s8880_s1 + $0x430] sm:$0xff]  ;;  %v167_v51 = vld [vmem:[%s8880_s1 + $0x438] sm:$0xff]  ;;  %v5511_v54 = vcombine.low %v155_v42, %v159_v24 }
  0xf4   :  { %v5518_v55 = vcombine.high %v162_v48, %v166_v49  ;;  %v5520_v56 = vcombine.high %v163_v50, %v167_v51  ;;  %v170_v58 = vld [vmem:[%s8880_s1 + $0x450] sm:$0xff]  ;;  %v171_v60 = vld [vmem:[%s8880_s1 + $0x458] sm:$0xff]  ;;  %v5517_v62 = vcombine.low %v162_v48, %v166_v49  ;;  %v5519_v63 = vcombine.low %v163_v50, %v167_v51 }
  0xf5   :  { %v174_v59 = vld [vmem:[%s8880_s1 + $0x470] sm:$0xff]  ;;  %v175_v61 = vld [vmem:[%s8880_s1 + $0x478] sm:$0xff] }
  0xf6   :  { %2801 = vmatpush1.bf16.msra.mxu0 %v5461_v0  ;;  %2965 = vmatpush1.bf16.msra.mxu1 %v5463_v1  ;;  %v5526_v0 = vcombine.high %v170_v58, %v174_v59  ;;  %v5528_v1 = vcombine.high %v171_v60, %v175_v61  ;;  %v179_v4 = vld [vmem:[%s8880_s1 + $0x498] sm:$0xff]  ;;  %v5525_v6 = vcombine.low %v170_v58, %v174_v59 }
  0xf7   :  { %2802 = vmatprep.subr.bf16.mxu0 %v5470_v2  ;;  %2966 = vmatprep.subr.bf16.mxu1 %v5472_v3  ;;  %v178_v2 = vld [vmem:[%s8880_s1 + $0x490] sm:$0xff]  ;;  %v183_v5 = vld [vmem:[%s8880_s1 + $0x4b8] sm:$0xff]  ;;  %v5527_v7 = vcombine.low %v171_v60, %v175_v61 }
  0xf8   :  { %v182_v3 = vld [vmem:[%s8880_s1 + $0x4b0] sm:$0xff]  ;;  %v191_v11 = vld [vmem:[%s8880_s1 + $0x4f8] sm:$0xff]  ;;  %v5535_v14 = vcombine.low %v179_v4, %v183_v5 }
  0xf9   :  { %v5533_v13 = vcombine.low %v178_v2, %v182_v3 }
  0xfa   :  { %2803 = vmatpush1.bf16.msra.mxu0 %v5469_v57  ;;  %2967 = vmatpush1.bf16.msra.mxu1 %v5471_v8  ;;  %v5534_v57 = vcombine.high %v178_v2, %v182_v3  ;;  %v5536_v8 = vcombine.high %v179_v4, %v183_v5 }
  0xfb   :  { %2804 = vmatprep.subr.bf16.mxu0 %v5478_v9  ;;  %2968 = vmatprep.subr.bf16.mxu1 %v5480_v10  ;;  %v186_v9 = vld [vmem:[%s8880_s1 + $0x4d0] sm:$0xff] }
  0xfc   :  { %v190_v10 = vld [vmem:[%s8880_s1 + $0x4f0] sm:$0xff] }
  0xfd   :  { %v5542_v16 = vcombine.high %v186_v9, %v190_v10  ;;  %v5541_v20 = vcombine.low %v186_v9, %v190_v10 }
  0xfe   :  { %2805 = vmatpush1.bf16.msra.mxu0 %v5477_v53  ;;  %2969 = vmatpush1.bf16.msra.mxu1 %v5479_v17  ;;  %v194_v17 = vld [vmem:[%s8880_s1 + $0x510] sm:$0xff] }
  0xff   :  { %2806 = vmatprep.subr.bf16.mxu0 %v5486_v18  ;;  %2970 = vmatprep.subr.bf16.mxu1 %v5488_v19  ;;  %v198_v18 = vld [vmem:[%s8880_s1 + $0x530] sm:$0xff]  ;;  %v199_v19 = vld [vmem:[%s8880_s1 + $0x538] sm:$0xff] }
 0x100   :  { %v5550_v23 = vcombine.high %v194_v17, %v198_v18  ;;  %v5549_v31 = vcombine.low %v194_v17, %v198_v18 }
 0x102   :  { %2807 = vmatpush1.bf16.msra.mxu0 %v5485_v27  ;;  %2971 = vmatpush1.bf16.msra.mxu1 %v5487_v28  ;;  %v202_v27 = vld [vmem:[%s8880_s1 + $0x550] sm:$0xff] }
 0x103   :  { %2808 = vmatprep.subr.bf16.mxu0 %v5494_v29  ;;  %2972 = vmatprep.subr.bf16.mxu1 %v5496_v30  ;;  %v206_v28 = vld [vmem:[%s8880_s1 + $0x570] sm:$0xff]  ;;  %v203_v29 = vld [vmem:[%s8880_s1 + $0x558] sm:$0xff] }
 0x104   :  { %v207_v30 = vld [vmem:[%s8880_s1 + $0x578] sm:$0xff]  ;;  %v5558_v32 = vcombine.high %v202_v27, %v206_v28  ;;  %v5557_v40 = vcombine.low %v202_v27, %v206_v28 }
 0x105   :  { %v5560_v34 = vcombine.high %v203_v29, %v207_v30  ;;  %v5559_v41 = vcombine.low %v203_v29, %v207_v30 }
 0x106   :  { %2809 = vmatpush1.bf16.msra.mxu0 %v5493_v35  ;;  %2973 = vmatpush1.bf16.msra.mxu1 %v5495_v36  ;;  %v210_v35 = vld [vmem:[%s8880_s1 + $0x590] sm:$0xff] }
 0x107   :  { %2810 = vmatprep.subr.bf16.mxu0 %v5502_v37  ;;  %2974 = vmatprep.subr.bf16.mxu1 %v5504_v39  ;;  %v214_v36 = vld [vmem:[%s8880_s1 + $0x5b0] sm:$0xff]  ;;  %v211_v37 = vld [vmem:[%s8880_s1 + $0x598] sm:$0xff] }
 0x108   :  { %v215_v39 = vld [vmem:[%s8880_s1 + $0x5b8] sm:$0xff]  ;;  %v5566_v42 = vcombine.high %v210_v35, %v214_v36  ;;  %v5565_v48 = vcombine.low %v210_v35, %v214_v36 }
 0x109   :  { %v5568_v24 = vcombine.high %v211_v37, %v215_v39  ;;  %v5567_v49 = vcombine.low %v211_v37, %v215_v39 }
 0x10a   :  { %2811 = vmatpush1.bf16.msra.mxu0 %v5501_v44  ;;  %2975 = vmatpush1.bf16.msra.mxu1 %v5503_v45  ;;  %v218_v44 = vld [vmem:[%s8880_s1 + $0x5d0] sm:$0xff] }
 0x10b   :  { %2812 = vmatprep.subr.bf16.mxu0 %v5510_v46  ;;  %2976 = vmatprep.subr.bf16.mxu1 %v5512_v47  ;;  %v222_v45 = vld [vmem:[%s8880_s1 + $0x5f0] sm:$0xff]  ;;  %v219_v46 = vld [vmem:[%s8880_s1 + $0x5d8] sm:$0xff] }
 0x10c   :  { %v223_v47 = vld [vmem:[%s8880_s1 + $0x5f8] sm:$0xff]  ;;  %v5574_v50 = vcombine.high %v218_v44, %v222_v45  ;;  %v5573_v58 = vcombine.low %v218_v44, %v222_v45 }
 0x10d   :  { %v5576_v51 = vcombine.high %v219_v46, %v223_v47  ;;  %v5575_v59 = vcombine.low %v219_v46, %v223_v47 }
 0x10e   :  { %2813 = vmatpush1.bf16.msra.mxu0 %v5509_v52  ;;  %2977 = vmatpush1.bf16.msra.mxu1 %v5511_v54  ;;  %v226_v52 = vld [vmem:[%s8880_s1 + $0x610] sm:$0xff] }
 0x10f   :  { %2823 = vmatprep.subr.bf16.mxu0 %v5518_v55  ;;  %2987 = vmatprep.subr.bf16.mxu1 %v5520_v56  ;;  %v230_v54 = vld [vmem:[%s8880_s1 + $0x630] sm:$0xff]  ;;  %v227_v55 = vld [vmem:[%s8880_s1 + $0x618] sm:$0xff] }
 0x110   :  { %v231_v56 = vld [vmem:[%s8880_s1 + $0x638] sm:$0xff]  ;;  %v5582_v60 = vcombine.high %v226_v52, %v230_v54  ;;  %v5581_v2 = vcombine.low %v226_v52, %v230_v54 }
 0x111   :  { %2815 = vmatmul.mubr.bf16.vlgmr.msra.gmra.mrb[4].mxu0 %v6914_v12  ;;  %2979 = vmatmul.mubr.bf16.vlgmr.msra.gmra.mrb[4].mxu1 %v6914_v12  ;;  %v187_v12 = vld [vmem:[%s8880_s1 + $0x4d8] sm:$0xff]  ;;  %v5584_v61 = vcombine.high %v227_v55, %v231_v56  ;;  %v5583_v3 = vcombine.low %v227_v55, %v231_v56 }
 0x112   :  { %2824 = vmatpush1.bf16.msra.mxu0 %v5517_v62  ;;  %2988 = vmatpush1.bf16.msra.mxu1 %v5519_v63  ;;  %v5544_v53 = vcombine.high %v187_v12, %v191_v11  ;;  %v5543_v22 = vcombine.low %v187_v12, %v191_v11  ;;  %v234_v62 = vld [vmem:[%s8880_s1 + $0x650] sm:$0xff] }
 0x113   :  { %2825 = vmatprep.subr.bf16.mxu0 %v5526_v0  ;;  %2989 = vmatprep.subr.bf16.mxu1 %v5528_v1  ;;  %v238_v63 = vld [vmem:[%s8880_s1 + $0x670] sm:$0xff]  ;;  %v235_v0 = vld [vmem:[%s8880_s1 + $0x658] sm:$0xff] }
 0x114   :  { %2855 = vmatprep.mubr.bf16.mxu0 %v6935_v21  ;;  %3019 = vmatprep.mubr.bf16.mxu1 %v6935_v21  ;;  %v195_v21 = vld [vmem:[%s8880_s1 + $0x518] sm:$0xff]  ;;  %v5590_v4 = vcombine.high %v234_v62, %v238_v63  ;;  %v5589_v9 = vcombine.low %v234_v62, %v238_v63 }
 0x115   :  { %v5552_v26 = vcombine.high %v195_v21, %v199_v19  ;;  %v5551_v15 = vcombine.low %v195_v21, %v199_v19  ;;  %v239_v1 = vld [vmem:[%s8880_s1 + $0x678] sm:$0xff] }
 0x116   :  { %2826 = vmatpush1.bf16.msra.mxu0 %v5525_v6  ;;  %2990 = vmatpush1.bf16.msra.mxu1 %v5527_v7  ;;  %v5592_v5 = vcombine.high %v235_v0, %v239_v1  ;;  %v242_v6 = vld [vmem:[%s8880_s1 + $0x690] sm:$0xff]  ;;  %v5591_v10 = vcombine.low %v235_v0, %v239_v1 }
 0x117   :  { %2827 = vmatprep.subr.bf16.mxu0 %v5534_v57  ;;  %2991 = vmatprep.subr.bf16.mxu1 %v5536_v8  ;;  %v246_v7 = vld [vmem:[%s8880_s1 + $0x6b0] sm:$0xff]  ;;  %v243_v57 = vld [vmem:[%s8880_s1 + $0x698] sm:$0xff] }
 0x118   :  { %v247_v8 = vld [vmem:[%s8880_s1 + $0x6b8] sm:$0xff]  ;;  %v5598_v12 = vcombine.high %v242_v6, %v246_v7  ;;  %v5597_v17 = vcombine.low %v242_v6, %v246_v7 }
 0x119   :  { %v5600_v11 = vcombine.high %v243_v57, %v247_v8  ;;  %v5599_v18 = vcombine.low %v243_v57, %v247_v8 }
 0x11a   :  { %2828 = vmatpush1.bf16.msra.mxu0 %v5533_v13  ;;  %2992 = vmatpush1.bf16.msra.mxu1 %v5535_v14  ;;  %v250_v13 = vld [vmem:[%s8880_s1 + $0x6d0] sm:$0xff] }
 0x11b   :  { %2829 = vmatprep.subr.bf16.mxu0 %v5542_v16  ;;  %2993 = vmatprep.subr.bf16.mxu1 %v5544_v53  ;;  %v254_v14 = vld [vmem:[%s8880_s1 + $0x6f0] sm:$0xff]  ;;  %v251_v16 = vld [vmem:[%s8880_s1 + $0x6d8] sm:$0xff] }
 0x11c   :  { %v255_v53 = vld [vmem:[%s8880_s1 + $0x6f8] sm:$0xff]  ;;  %v5606_v21 = vcombine.high %v250_v13, %v254_v14  ;;  %v5605_v27 = vcombine.low %v250_v13, %v254_v14 }
 0x11d   :  { %v5608_v19 = vcombine.high %v251_v16, %v255_v53  ;;  %v5607_v28 = vcombine.low %v251_v16, %v255_v53 }
 0x11e   :  { %2830 = vmatpush1.bf16.msra.mxu0 %v5541_v20  ;;  %2994 = vmatpush1.bf16.msra.mxu1 %v5543_v22  ;;  %v258_v20 = vld [vmem:[%s8880_s1 + $0x710] sm:$0xff] }
 0x11f   :  { %2831 = vmatprep.subr.bf16.mxu0 %v5550_v23  ;;  %2995 = vmatprep.subr.bf16.mxu1 %v5552_v26  ;;  %v262_v22 = vld [vmem:[%s8880_s1 + $0x730] sm:$0xff]  ;;  %v259_v23 = vld [vmem:[%s8880_s1 + $0x718] sm:$0xff] }
 0x120   :  { %v263_v26 = vld [vmem:[%s8880_s1 + $0x738] sm:$0xff]  ;;  %v5614_v29 = vcombine.high %v258_v20, %v262_v22  ;;  %v5613_v35 = vcombine.low %v258_v20, %v262_v22 }
 0x121   :  { %v5616_v30 = vcombine.high %v259_v23, %v263_v26  ;;  %v5615_v36 = vcombine.low %v259_v23, %v263_v26  ;;  %v322_v26 = vld [vmem:[%s8880_s1 + $0x910] sm:$0xff] }
 0x122   :  { %2832 = vmatpush1.bf16.msra.mxu0 %v5549_v31  ;;  %2996 = vmatpush1.bf16.msra.mxu1 %v5551_v15  ;;  %v266_v31 = vld [vmem:[%s8880_s1 + $0x750] sm:$0xff] }
 0x123   :  { %2833 = vmatprep.subr.bf16.mxu0 %v5558_v32  ;;  %2997 = vmatprep.subr.bf16.mxu1 %v5560_v34  ;;  %v270_v15 = vld [vmem:[%s8880_s1 + $0x770] sm:$0xff]  ;;  %v267_v32 = vld [vmem:[%s8880_s1 + $0x758] sm:$0xff] }
 0x124   :  { %v271_v34 = vld [vmem:[%s8880_s1 + $0x778] sm:$0xff]  ;;  %v5622_v37 = vcombine.high %v266_v31, %v270_v15  ;;  %v5621_v44 = vcombine.low %v266_v31, %v270_v15 }
 0x125   :  { %v5624_v39 = vcombine.high %v267_v32, %v271_v34  ;;  %v5623_v45 = vcombine.low %v267_v32, %v271_v34  ;;  %v330_v32 = vld [vmem:[%s8880_s1 + $0x950] sm:$0xff] }
 0x126   :  { %2834 = vmatpush1.bf16.msra.mxu0 %v5557_v40  ;;  %2998 = vmatpush1.bf16.msra.mxu1 %v5559_v41  ;;  %v274_v40 = vld [vmem:[%s8880_s1 + $0x790] sm:$0xff] }
 0x127   :  { %2835 = vmatprep.subr.bf16.mxu0 %v5566_v42  ;;  %2999 = vmatprep.subr.bf16.mxu1 %v5568_v24  ;;  %v278_v41 = vld [vmem:[%s8880_s1 + $0x7b0] sm:$0xff]  ;;  %v275_v42 = vld [vmem:[%s8880_s1 + $0x798] sm:$0xff] }
 0x128   :  { %v279_v24 = vld [vmem:[%s8880_s1 + $0x7b8] sm:$0xff]  ;;  %v5630_v46 = vcombine.high %v274_v40, %v278_v41  ;;  %v5629_v52 = vcombine.low %v274_v40, %v278_v41  ;;  %v334_v34 = vld [vmem:[%s8880_s1 + $0x970] sm:$0xff] }
 0x129   :  { %v5632_v47 = vcombine.high %v275_v42, %v279_v24  ;;  %v5631_v54 = vcombine.low %v275_v42, %v279_v24  ;;  %v5686_v40 = vcombine.high %v330_v32, %v334_v34  ;;  %v338_v42 = vld [vmem:[%s8880_s1 + $0x990] sm:$0xff] }
 0x12a   :  { %2836 = vmatpush1.bf16.msra.mxu0 %v5565_v48  ;;  %3000 = vmatpush1.bf16.msra.mxu1 %v5567_v49  ;;  %v282_v48 = vld [vmem:[%s8880_s1 + $0x7d0] sm:$0xff] }
 0x12b   :  { %2837 = vmatprep.subr.bf16.mxu0 %v5574_v50  ;;  %3001 = vmatprep.subr.bf16.mxu1 %v5576_v51  ;;  %v286_v49 = vld [vmem:[%s8880_s1 + $0x7f0] sm:$0xff]  ;;  %v283_v50 = vld [vmem:[%s8880_s1 + $0x7d8] sm:$0xff] }
 0x12c   :  { %v287_v51 = vld [vmem:[%s8880_s1 + $0x7f8] sm:$0xff]  ;;  %v5638_v55 = vcombine.high %v282_v48, %v286_v49  ;;  %v5637_v62 = vcombine.low %v282_v48, %v286_v49  ;;  %v342_v24 = vld [vmem:[%s8880_s1 + $0x9b0] sm:$0xff] }
 0x12d   :  { %v5640_v56 = vcombine.high %v283_v50, %v287_v51  ;;  %v5639_v63 = vcombine.low %v283_v50, %v287_v51  ;;  %v5694_v48 = vcombine.high %v338_v42, %v342_v24  ;;  %v346_v50 = vld [vmem:[%s8880_s1 + $0x9d0] sm:$0xff] }
 0x12e   :  { %2838 = vmatpush1.bf16.msra.mxu0 %v5573_v58  ;;  %3002 = vmatpush1.bf16.msra.mxu1 %v5575_v59  ;;  %v290_v58 = vld [vmem:[%s8880_s1 + $0x810] sm:$0xff] }
 0x12f   :  { %2839 = vmatprep.subr.bf16.mxu0 %v5582_v60  ;;  %3003 = vmatprep.subr.bf16.mxu1 %v5584_v61  ;;  %v294_v59 = vld [vmem:[%s8880_s1 + $0x830] sm:$0xff]  ;;  %v291_v60 = vld [vmem:[%s8880_s1 + $0x818] sm:$0xff] }
 0x130   :  { %v295_v61 = vld [vmem:[%s8880_s1 + $0x838] sm:$0xff]  ;;  %v5646_v0 = vcombine.high %v290_v58, %v294_v59  ;;  %v5645_v6 = vcombine.low %v290_v58, %v294_v59  ;;  %v350_v51 = vld [vmem:[%s8880_s1 + $0x9f0] sm:$0xff] }
 0x131   :  { %v5648_v1 = vcombine.high %v291_v60, %v295_v61  ;;  %v5647_v7 = vcombine.low %v291_v60, %v295_v61  ;;  %v5702_v58 = vcombine.high %v346_v50, %v350_v51  ;;  %v354_v60 = vld [vmem:[%s8880_s1 + $0xa10] sm:$0xff] }
 0x132   :  { %2840 = vmatpush1.bf16.msra.mxu0 %v5581_v2  ;;  %3004 = vmatpush1.bf16.msra.mxu1 %v5583_v3  ;;  %v298_v2 = vld [vmem:[%s8880_s1 + $0x850] sm:$0xff] }
 0x133   :  { %2841 = vmatprep.subr.bf16.mxu0 %v5590_v4  ;;  %3005 = vmatprep.subr.bf16.mxu1 %v5592_v5  ;;  %v302_v3 = vld [vmem:[%s8880_s1 + $0x870] sm:$0xff]  ;;  %v299_v4 = vld [vmem:[%s8880_s1 + $0x858] sm:$0xff] }
 0x134   :  { %v303_v5 = vld [vmem:[%s8880_s1 + $0x878] sm:$0xff]  ;;  %v5654_v57 = vcombine.high %v298_v2, %v302_v3  ;;  %v5653_v13 = vcombine.low %v298_v2, %v302_v3  ;;  %v358_v61 = vld [vmem:[%s8880_s1 + $0xa30] sm:$0xff] }
 0x135   :  { %v5656_v8 = vcombine.high %v299_v4, %v303_v5  ;;  %v5655_v14 = vcombine.low %v299_v4, %v303_v5  ;;  %v5710_v2 = vcombine.high %v354_v60, %v358_v61  ;;  %v362_v4 = vld [vmem:[%s8880_s1 + $0xa50] sm:$0xff] }
 0x136   :  { %2842 = vmatpush1.bf16.msra.mxu0 %v5589_v9  ;;  %3006 = vmatpush1.bf16.msra.mxu1 %v5591_v10  ;;  %v306_v9 = vld [vmem:[%s8880_s1 + $0x890] sm:$0xff] }
 0x137   :  { %2843 = vmatprep.subr.bf16.mxu0 %v5598_v12  ;;  %3007 = vmatprep.subr.bf16.mxu1 %v5600_v11  ;;  %v310_v10 = vld [vmem:[%s8880_s1 + $0x8b0] sm:$0xff]  ;;  %v307_v12 = vld [vmem:[%s8880_s1 + $0x898] sm:$0xff] }
 0x138   :  { %v311_v11 = vld [vmem:[%s8880_s1 + $0x8b8] sm:$0xff]  ;;  %v5662_v16 = vcombine.high %v306_v9, %v310_v10  ;;  %v366_v5 = vld [vmem:[%s8880_s1 + $0xa70] sm:$0xff] }
 0x139   :  { %v5664_v53 = vcombine.high %v307_v12, %v311_v11  ;;  %v5663_v20 = vcombine.low %v307_v12, %v311_v11  ;;  %v370_v12 = vld [vmem:[%s8880_s1 + $0xa90] sm:$0xff] }
 0x13a   :  { %2844 = vmatpush1.bf16.msra.mxu0 %v5597_v17  ;;  %3008 = vmatpush1.bf16.msra.mxu1 %v5599_v18  ;;  %v314_v17 = vld [vmem:[%s8880_s1 + $0x8d0] sm:$0xff] }
 0x13b   :  { %2845 = vmatprep.subr.bf16.mxu0 %v5606_v21  ;;  %3009 = vmatprep.subr.bf16.mxu1 %v5608_v19  ;;  %v318_v18 = vld [vmem:[%s8880_s1 + $0x8f0] sm:$0xff]  ;;  %v319_v21 = vld [vmem:[%s8880_s1 + $0x8f8] sm:$0xff]  ;;  %v5661_v19 = vcombine.low %v306_v9, %v310_v10  ;;  %v5718_v9 = vcombine.high %v362_v4, %v366_v5 }
 0x13c   :  { %v5670_v22 = vcombine.high %v314_v17, %v318_v18  ;;  %v374_v11 = vld [vmem:[%s8880_s1 + $0xab0] sm:$0xff] }
 0x13e   :  { %2846 = vmatpush1.bf16.msra.mxu0 %v5605_v27  ;;  %3010 = vmatpush1.bf16.msra.mxu1 %v5607_v28  ;;  %v326_v27 = vld [vmem:[%s8880_s1 + $0x930] sm:$0xff]  ;;  %v327_v28 = vld [vmem:[%s8880_s1 + $0x938] sm:$0xff] }
 0x13f   :  { %2847 = vmatprep.subr.bf16.mxu0 %v5614_v29  ;;  %3011 = vmatprep.subr.bf16.mxu1 %v5616_v30  ;;  %v5669_v29 = vcombine.low %v314_v17, %v318_v18  ;;  %v5678_v31 = vcombine.high %v322_v26, %v326_v27  ;;  %v5726_v17 = vcombine.high %v370_v12, %v374_v11 }
 0x142   :  { %2848 = vmatpush1.bf16.msra.mxu0 %v5613_v35  ;;  %3012 = vmatpush1.bf16.msra.mxu1 %v5615_v36  ;;  %v331_v35 = vld [vmem:[%s8880_s1 + $0x958] sm:$0xff] }
 0x143   :  { %2849 = vmatprep.subr.bf16.mxu0 %v5622_v37  ;;  %3013 = vmatprep.subr.bf16.mxu1 %v5624_v39  ;;  %v335_v36 = vld [vmem:[%s8880_s1 + $0x978] sm:$0xff]  ;;  %v5677_v37 = vcombine.low %v322_v26, %v326_v27 }
 0x144   :  { %v5688_v41 = vcombine.high %v331_v35, %v335_v36 }
 0x146   :  { %2850 = vmatpush1.bf16.msra.mxu0 %v5621_v44  ;;  %3014 = vmatpush1.bf16.msra.mxu1 %v5623_v45  ;;  %v339_v44 = vld [vmem:[%s8880_s1 + $0x998] sm:$0xff] }
 0x147   :  { %2851 = vmatprep.subr.bf16.mxu0 %v5630_v46  ;;  %3015 = vmatprep.subr.bf16.mxu1 %v5632_v47  ;;  %v343_v45 = vld [vmem:[%s8880_s1 + $0x9b8] sm:$0xff]  ;;  %v5685_v46 = vcombine.low %v330_v32, %v334_v34  ;;  %v5687_v47 = vcombine.low %v331_v35, %v335_v36  ;;  %v394_v35 = vld [vmem:[%s8880_s1 + $0xb50] sm:$0xff] }
 0x148   :  { %v5696_v49 = vcombine.high %v339_v44, %v343_v45  ;;  %v398_v36 = vld [vmem:[%s8880_s1 + $0xb70] sm:$0xff] }
 0x14a   :  { %2852 = vmatpush1.bf16.msra.mxu0 %v5629_v52  ;;  %3016 = vmatpush1.bf16.msra.mxu1 %v5631_v54  ;;  %v347_v52 = vld [vmem:[%s8880_s1 + $0x9d8] sm:$0xff] }
 0x14b   :  { %2853 = vmatprep.subr.bf16.mxu0 %v5638_v55  ;;  %3017 = vmatprep.subr.bf16.mxu1 %v5640_v56  ;;  %v351_v54 = vld [vmem:[%s8880_s1 + $0x9f8] sm:$0xff]  ;;  %v5693_v55 = vcombine.low %v338_v42, %v342_v24  ;;  %v5695_v56 = vcombine.low %v339_v44, %v343_v45  ;;  %v5750_v42 = vcombine.high %v394_v35, %v398_v36  ;;  %v402_v44 = vld [vmem:[%s8880_s1 + $0xb90] sm:$0xff] }
 0x14c   :  { %v5704_v59 = vcombine.high %v347_v52, %v351_v54  ;;  %v406_v45 = vld [vmem:[%s8880_s1 + $0xbb0] sm:$0xff] }
 0x14e   :  { %2854 = vmatpush1.bf16.msra.mxu0 %v5637_v62  ;;  %3018 = vmatpush1.bf16.msra.mxu1 %v5639_v63  ;;  %v355_v62 = vld [vmem:[%s8880_s1 + $0xa18] sm:$0xff] }
 0x14f   :  { %2864 = vmatprep.subr.bf16.mxu0 %v5646_v0  ;;  %3028 = vmatprep.subr.bf16.mxu1 %v5648_v1  ;;  %v359_v63 = vld [vmem:[%s8880_s1 + $0xa38] sm:$0xff]  ;;  %v5701_v0 = vcombine.low %v346_v50, %v350_v51  ;;  %v5703_v1 = vcombine.low %v347_v52, %v351_v54  ;;  %v5758_v50 = vcombine.high %v402_v44, %v406_v45  ;;  %v410_v52 = vld [vmem:[%s8880_s1 + $0xbd0] sm:$0xff] }
 0x150   :  { %v5712_v3 = vcombine.high %v355_v62, %v359_v63  ;;  %v414_v54 = vld [vmem:[%s8880_s1 + $0xbf0] sm:$0xff] }
 0x151   :  { %2856 = vmatmul.mubr.bf16.vlgmr.msra.gmra.mrb[4].mxu0 %v7134_v25  ;;  %3020 = vmatmul.mubr.bf16.vlgmr.msra.gmra.mrb[4].mxu1 %v7134_v25  ;;  %v315_v25 = vld [vmem:[%s8880_s1 + $0x8d8] sm:$0xff] }
 0x152   :  { %2865 = vmatpush1.bf16.msra.mxu0 %v5645_v6  ;;  %3029 = vmatpush1.bf16.msra.mxu1 %v5647_v7  ;;  %v5672_v23 = vcombine.high %v315_v25, %v319_v21  ;;  %v5671_v30 = vcombine.low %v315_v25, %v319_v21  ;;  %v363_v6 = vld [vmem:[%s8880_s1 + $0xa58] sm:$0xff]  ;;  %v378_v25 = vld [vmem:[%s8880_s1 + $0xad0] sm:$0xff] }
 0x153   :  { %2866 = vmatprep.subr.bf16.mxu0 %v5654_v57  ;;  %3030 = vmatprep.subr.bf16.mxu1 %v5656_v8  ;;  %v367_v7 = vld [vmem:[%s8880_s1 + $0xa78] sm:$0xff]  ;;  %v5709_v57 = vcombine.low %v354_v60, %v358_v61  ;;  %v5711_v8 = vcombine.low %v355_v62, %v359_v63  ;;  %v382_v21 = vld [vmem:[%s8880_s1 + $0xaf0] sm:$0xff]  ;;  %v5766_v60 = vcombine.high %v410_v52, %v414_v54 }
 0x154   :  { %2896 = vmatprep.mubr.bf16.mxu0 %v7150_v33  ;;  %3060 = vmatprep.mubr.bf16.mxu1 %v7150_v33  ;;  %v323_v33 = vld [vmem:[%s8880_s1 + $0x918] sm:$0xff]  ;;  %v5720_v10 = vcombine.high %v363_v6, %v367_v7  ;;  %v5734_v26 = vcombine.high %v378_v25, %v382_v21  ;;  %v418_v62 = vld [vmem:[%s8880_s1 + $0xc10] sm:$0xff] }
 0x155   :  { %v5680_v15 = vcombine.high %v323_v33, %v327_v28  ;;  %v5679_v39 = vcombine.low %v323_v33, %v327_v28  ;;  %v386_v33 = vld [vmem:[%s8880_s1 + $0xb10] sm:$0xff] }
 0x156   :  { %2867 = vmatpush1.bf16.msra.mxu0 %v5653_v13  ;;  %3031 = vmatpush1.bf16.msra.mxu1 %v5655_v14  ;;  %v371_v13 = vld [vmem:[%s8880_s1 + $0xa98] sm:$0xff]  ;;  %v390_v28 = vld [vmem:[%s8880_s1 + $0xb30] sm:$0xff] }
 0x157   :  { %2868 = vmatprep.subr.bf16.mxu0 %v5662_v16  ;;  %3032 = vmatprep.subr.bf16.mxu1 %v5664_v53  ;;  %v375_v14 = vld [vmem:[%s8880_s1 + $0xab8] sm:$0xff]  ;;  %v5717_v16 = vcombine.low %v362_v4, %v366_v5  ;;  %v5719_v53 = vcombine.low %v363_v6, %v367_v7  ;;  %v5742_v32 = vcombine.high %v386_v33, %v390_v28  ;;  %v422_v63 = vld [vmem:[%s8880_s1 + $0xc30] sm:$0xff] }
 0x158   :  { %v5728_v18 = vcombine.high %v371_v13, %v375_v14  ;;  %v5774_v4 = vcombine.high %v418_v62, %v422_v63  ;;  %v5773_v6 = vcombine.low %v418_v62, %v422_v63  ;;  %v6266_v62 = vld [vmem:[%s8882_s3 + $0x12c] ss:$16 sps:$4 sm:$0xff]   ;;  %v6261_v63 = vld [vmem:[%s8882_s3 + $0x120] ss:$16 sps:$4 sm:$0xff]  }
 0x15a   :  { %2869 = vmatpush1.bf16.msra.mxu0 %v5661_v19  ;;  %3033 = vmatpush1.bf16.msra.mxu1 %v5663_v20  ;;  %v379_v19 = vld [vmem:[%s8880_s1 + $0xad8] sm:$0xff] }
 0x15b   :  { %2870 = vmatprep.subr.bf16.mxu0 %v5670_v22  ;;  %3034 = vmatprep.subr.bf16.mxu1 %v5672_v23  ;;  %v383_v20 = vld [vmem:[%s8880_s1 + $0xaf8] sm:$0xff]  ;;  %v5725_v22 = vcombine.low %v370_v12, %v374_v11  ;;  %v5727_v23 = vcombine.low %v371_v13, %v375_v14  ;;  %v6213_v14 = vld [vmem:[%s8882_s3 + $0x20] ss:$16 sps:$4 sm:$0xff]  }
 0x15c   :  { %v5736_v27 = vcombine.high %v379_v19, %v383_v20  ;;  %v6210_v11 = vld [vmem:[%s8882_s3 + $0x8] ss:$16 sps:$4 sm:$0xff]  }
 0x15d   :  { %v6623_v13 = vld [vmem:[%s8879_s0 + $0x18] ss:$0 sps:$4 sm:$0xff]  }
 0x15e   :  { %2871 = vmatpush1.bf16.msra.mxu0 %v5669_v29  ;;  %3035 = vmatpush1.bf16.msra.mxu1 %v5671_v30  ;;  %v387_v29 = vld [vmem:[%s8880_s1 + $0xb18] sm:$0xff] }
 0x15f   :  { %2872 = vmatprep.subr.bf16.mxu0 %v5678_v31  ;;  %3036 = vmatprep.subr.bf16.mxu1 %v5680_v15  ;;  %v391_v30 = vld [vmem:[%s8880_s1 + $0xb38] sm:$0xff]  ;;  %v5733_v31 = vcombine.low %v378_v25, %v382_v21  ;;  %v5735_v15 = vcombine.low %v379_v19, %v383_v20  ;;  %v6219_v21 = vld [vmem:[%s8882_s3 + $0x40] ss:$16 sps:$4 sm:$0xff]  }
 0x160   :  { %v5744_v34 = vcombine.high %v387_v29, %v391_v30  ;;  %v6224_v25 = vld [vmem:[%s8882_s3 + $0x4c] ss:$16 sps:$4 sm:$0xff]   ;;  %v6222_v20 = vld [vmem:[%s8882_s3 + $0x48] ss:$16 sps:$4 sm:$0xff]  }
 0x162   :  { %2873 = vmatpush1.bf16.msra.mxu0 %v5677_v37  ;;  %3037 = vmatpush1.bf16.msra.mxu1 %v5679_v39  ;;  %v395_v37 = vld [vmem:[%s8880_s1 + $0xb58] sm:$0xff] }
 0x163   :  { %2874 = vmatprep.subr.bf16.mxu0 %v5686_v40  ;;  %3038 = vmatprep.subr.bf16.mxu1 %v5688_v41  ;;  %v399_v39 = vld [vmem:[%s8880_s1 + $0xb78] sm:$0xff]  ;;  %v5741_v40 = vcombine.low %v386_v33, %v390_v28  ;;  %v5743_v41 = vcombine.low %v387_v29, %v391_v30 }
 0x164   :  { %v5752_v24 = vcombine.high %v395_v37, %v399_v39 }
 0x166   :  { %2875 = vmatpush1.bf16.msra.mxu0 %v5685_v46  ;;  %3039 = vmatpush1.bf16.msra.mxu1 %v5687_v47  ;;  %v403_v46 = vld [vmem:[%s8880_s1 + $0xb98] sm:$0xff] }
 0x167   :  { %2876 = vmatprep.subr.bf16.mxu0 %v5694_v48  ;;  %3040 = vmatprep.subr.bf16.mxu1 %v5696_v49  ;;  %v407_v47 = vld [vmem:[%s8880_s1 + $0xbb8] sm:$0xff]  ;;  %v5749_v48 = vcombine.low %v394_v35, %v398_v36  ;;  %v5751_v49 = vcombine.low %v395_v37, %v399_v39  ;;  %v6233_v35 = vld [vmem:[%s8882_s3 + $0x84] ss:$16 sps:$4 sm:$0xff]  }
 0x168   :  { %v5760_v51 = vcombine.high %v403_v46, %v407_v47  ;;  %v6236_v39 = vld [vmem:[%s8882_s3 + $0x8c] ss:$16 sps:$4 sm:$0xff]  }
 0x16a   :  { %2877 = vmatpush1.bf16.msra.mxu0 %v5693_v55  ;;  %3041 = vmatpush1.bf16.msra.mxu1 %v5695_v56  ;;  %v411_v55 = vld [vmem:[%s8880_s1 + $0xbd8] sm:$0xff] }
 0x16b   :  { %2878 = vmatprep.subr.bf16.mxu0 %v5702_v58  ;;  %3042 = vmatprep.subr.bf16.mxu1 %v5704_v59  ;;  %v415_v56 = vld [vmem:[%s8880_s1 + $0xbf8] sm:$0xff]  ;;  %v5757_v58 = vcombine.low %v402_v44, %v406_v45  ;;  %v5759_v59 = vcombine.low %v403_v46, %v407_v47  ;;  %v6237_v45 = vld [vmem:[%s8882_s3 + $0xa0] ss:$16 sps:$4 sm:$0xff]   ;;  %v6245_v47 = vld [vmem:[%s8882_s3 + $0xc4] ss:$16 sps:$4 sm:$0xff]  }
 0x16c   :  { %v5768_v61 = vcombine.high %v411_v55, %v415_v56  ;;  %v6242_v44 = vld [vmem:[%s8882_s3 + $0xac] ss:$16 sps:$4 sm:$0xff]   ;;  %v6240_v46 = vld [vmem:[%s8882_s3 + $0xa8] ss:$16 sps:$4 sm:$0xff]  }
 0x16e   :  { %2879 = vmatpush1.bf16.msra.mxu0 %v5701_v0  ;;  %3043 = vmatpush1.bf16.msra.mxu1 %v5703_v1  ;;  %v419_v0 = vld [vmem:[%s8880_s1 + $0xc18] sm:$0xff] }
 0x16f   :  { %2880 = vmatprep.subr.bf16.mxu0 %v5710_v2  ;;  %3044 = vmatprep.subr.bf16.mxu1 %v5712_v3  ;;  %v423_v1 = vld [vmem:[%s8880_s1 + $0xc38] sm:$0xff]  ;;  %v5765_v2 = vcombine.low %v410_v52, %v414_v54  ;;  %v5767_v3 = vcombine.low %v411_v55, %v415_v56  ;;  %v6249_v54 = vld [vmem:[%s8882_s3 + $0xe0] ss:$16 sps:$4 sm:$0xff]   ;;  %v6257_v56 = vld [vmem:[%s8882_s3 + $0x104] ss:$16 sps:$4 sm:$0xff]  }
 0x170   :  { %v5776_v5 = vcombine.high %v419_v0, %v423_v1  ;;  %v5775_v7 = vcombine.low %v419_v0, %v423_v1  ;;  %v6254_v52 = vld [vmem:[%s8882_s3 + $0xec] ss:$16 sps:$4 sm:$0xff]   ;;  %v6252_v55 = vld [vmem:[%s8882_s3 + $0xe8] ss:$16 sps:$4 sm:$0xff]   ;;  %v6269_v1 = vld [vmem:[%s8882_s3 + $0x144] ss:$16 sps:$4 sm:$0xff]  }
 0x171   :  { %v6264_v0 = vld [vmem:[%s8882_s3 + $0x128] ss:$16 sps:$4 sm:$0xff]  }
 0x172   :  { %2881 = vmatpush1.bf16.msra.mxu0 %v5709_v57  ;;  %3045 = vmatpush1.bf16.msra.mxu1 %v5711_v8  ;;  %v6209_v57 = vld [vmem:[%s8882_s3 + $0x4] ss:$16 sps:$4 sm:$0xff]   ;;  %v6212_v8 = vld [vmem:[%s8882_s3 + $0xc] ss:$16 sps:$4 sm:$0xff]  }
 0x173   :  { %2882 = vmatprep.subr.bf16.mxu0 %v5718_v9  ;;  %3046 = vmatprep.subr.bf16.mxu1 %v5720_v10  ;;  %v426_v9 = vlaneseq  ;;  %v6207_v10 = vld [vmem:[%s8882_s3] ss:$16 sps:$4 sm:$0xff]  }
 0x175   :  { %v7948_v12 = vshrl.u32 %v426_v9, 7  ;;  %v6284_v9 = vld [vmem:[%s8882_s3 + $0x18c] ss:$16 sps:$4 sm:$0xff]  }
 0x176   :  { %2883 = vmatpush1.bf16.msra.mxu0 %v5717_v16  ;;  %3047 = vmatpush1.bf16.msra.mxu1 %v5719_v53  ;;  %v6216_v53 = vld [vmem:[%s8882_s3 + $0x28] ss:$16 sps:$4 sm:$0xff]  }
 0x177   :  { %2884 = vmatprep.subr.bf16.mxu0 %v5726_v17  ;;  %3048 = vmatprep.subr.bf16.mxu1 %v5728_v18  ;;  %v432_v16 = vsub.s32 1, %v7948_v12  ;;  %v6221_v17 = vld [vmem:[%s8882_s3 + $0x44] ss:$16 sps:$4 sm:$0xff]  }
 0x178   :  { %v7977_v18 = vld [vmem:[%s8881_s2] sm:$0xff] }
 0x179   :  { %v433_v19 = vrot.slane %v7977_v18, %v432_v16 }
 0x17a   :  { %2885 = vmatpush1.bf16.msra.mxu0 %v5725_v22  ;;  %3049 = vmatpush1.bf16.msra.mxu1 %v5727_v23  ;;  %v6227_v22 = vld [vmem:[%s8882_s3 + $0x64] ss:$16 sps:$4 sm:$0xff]  }
 0x17b   :  { %2886 = vmatprep.subr.bf16.mxu0 %v5734_v26  ;;  %3050 = vmatprep.subr.bf16.mxu1 %v5736_v27  ;;  %v6230_v26 = vld [vmem:[%s8882_s3 + $0x6c] ss:$16 sps:$4 sm:$0xff]  }
 0x17e   :  { %2887 = vmatpush1.bf16.msra.mxu0 %v5733_v31  ;;  %3051 = vmatpush1.bf16.msra.mxu1 %v5735_v15  ;;  %v6225_v31 = vld [vmem:[%s8882_s3 + $0x60] ss:$16 sps:$4 sm:$0xff]  }
 0x17f   :  { %2888 = vmatprep.subr.bf16.mxu0 %v5742_v32  ;;  %3052 = vmatprep.subr.bf16.mxu1 %v5744_v34  ;;  %v6228_v34 = vld [vmem:[%s8882_s3 + $0x68] ss:$16 sps:$4 sm:$0xff]  }
 0x182   :  { %2889 = vmatpush1.bf16.msra.mxu0 %v5741_v40  ;;  %3053 = vmatpush1.bf16.msra.mxu1 %v5743_v41  ;;  %v6231_v41 = vld [vmem:[%s8882_s3 + $0x80] ss:$16 sps:$4 sm:$0xff]  }
 0x183   :  { %2890 = vmatprep.subr.bf16.mxu0 %v5750_v42  ;;  %3054 = vmatprep.subr.bf16.mxu1 %v5752_v24  ;;  %v6234_v42 = vld [vmem:[%s8882_s3 + $0x88] ss:$16 sps:$4 sm:$0xff]   ;;  %v6239_v24 = vld [vmem:[%s8882_s3 + $0xa4] ss:$16 sps:$4 sm:$0xff]  }
 0x186   :  { %2891 = vmatpush1.bf16.msra.mxu0 %v5749_v48  ;;  %3055 = vmatpush1.bf16.msra.mxu1 %v5751_v49  ;;  %v6248_v48 = vld [vmem:[%s8882_s3 + $0xcc] ss:$16 sps:$4 sm:$0xff]   ;;  %v6243_v49 = vld [vmem:[%s8882_s3 + $0xc0] ss:$16 sps:$4 sm:$0xff]  }
 0x187   :  { %2892 = vmatprep.subr.bf16.mxu0 %v5758_v50  ;;  %3056 = vmatprep.subr.bf16.mxu1 %v5760_v51  ;;  %v6246_v50 = vld [vmem:[%s8882_s3 + $0xc8] ss:$16 sps:$4 sm:$0xff]   ;;  %v6251_v51 = vld [vmem:[%s8882_s3 + $0xe4] ss:$16 sps:$4 sm:$0xff]  }
 0x18a   :  { %2893 = vmatpush1.bf16.msra.mxu0 %v5757_v58  ;;  %3057 = vmatpush1.bf16.msra.mxu1 %v5759_v59  ;;  %v6260_v58 = vld [vmem:[%s8882_s3 + $0x10c] ss:$16 sps:$4 sm:$0xff]   ;;  %v6255_v59 = vld [vmem:[%s8882_s3 + $0x100] ss:$16 sps:$4 sm:$0xff]  }
 0x18b   :  { %2894 = vmatprep.subr.bf16.mxu0 %v5766_v60  ;;  %3058 = vmatprep.subr.bf16.mxu1 %v5768_v61  ;;  %v6258_v60 = vld [vmem:[%s8882_s3 + $0x108] ss:$16 sps:$4 sm:$0xff]   ;;  %v6263_v61 = vld [vmem:[%s8882_s3 + $0x124] ss:$16 sps:$4 sm:$0xff]  }
 0x18e   :  { %2895 = vmatpush1.bf16.msra.mxu0 %v5765_v2  ;;  %3059 = vmatpush1.bf16.msra.mxu1 %v5767_v3  ;;  %v6272_v2 = vld [vmem:[%s8882_s3 + $0x14c] ss:$16 sps:$4 sm:$0xff]   ;;  %v6267_v3 = vld [vmem:[%s8882_s3 + $0x140] ss:$16 sps:$4 sm:$0xff]  }
 0x18f   :  { %2905 = vmatprep.subr.bf16.mxu0 %v5774_v4  ;;  %3069 = vmatprep.subr.bf16.mxu1 %v5776_v5  ;;  %v6270_v4 = vld [vmem:[%s8882_s3 + $0x148] ss:$16 sps:$4 sm:$0xff]   ;;  %v6275_v5 = vld [vmem:[%s8882_s3 + $0x164] ss:$16 sps:$4 sm:$0xff]  }
 0x191   :  { %2897 = vmatmul.mubr.bf16.vlgmr.msra.gmra.mrb[4].mxu0 %v7338_v38  ;;  %3061 = vmatmul.mubr.bf16.vlgmr.msra.gmra.mrb[4].mxu1 %v7338_v38  ;;  %v6215_v38 = vld [vmem:[%s8882_s3 + $0x24] ss:$16 sps:$4 sm:$0xff]  }
 0x192   :  { %2906 = vmatpush1.bf16.msra.mxu0 %v5773_v6  ;;  %3070 = vmatpush1.bf16.msra.mxu1 %v5775_v7  ;;  %v6278_v6 = vld [vmem:[%s8882_s3 + $0x16c] ss:$16 sps:$4 sm:$0xff]   ;;  %v6273_v7 = vld [vmem:[%s8882_s3 + $0x160] ss:$16 sps:$4 sm:$0xff]  }
 0x193   :  { %2937 = vmatprep.mubr.bf16.mxu0 %v6649_v43  ;;  %3101 = vmatprep.mubr.bf16.mxu1 %v6649_v43  ;;  %v6218_v43 = vld [vmem:[%s8882_s3 + $0x2c] ss:$16 sps:$4 sm:$0xff]  }
 0x194   :  { %4684 = vmatprep.subr.bf16.mxu0 %v6209_v57  ;;  %4848 = vmatprep.subr.bf16.mxu1 %v6212_v8  ;;  %v6276_v57 = vld [vmem:[%s8882_s3 + $0x168] ss:$16 sps:$4 sm:$0xff]   ;;  %v6281_v8 = vld [vmem:[%s8882_s3 + $0x184] ss:$16 sps:$4 sm:$0xff]  }
 0x19d   :  { %5779 = vmatmul.mubr.msk.bf16.vlgmr.msra.gmra.mrb[4].mxu0 %vm2450_vm0, %v6623_v13  ;;  %5780 = vmatmul.mubr.msk.bf16.vlgmr.msra.gmra.mrb[4].mxu1 %vm2450_vm0, %v6623_v13  ;;  %v6290_v13 = vld [vmem:[%s8882_s3 + $0x1ac] ss:$16 sps:$4 sm:$0xff]  }
 0x19e   :  { %4685 = vmatpush1.bf16.msra.mxu0 %v6207_v10  ;;  %4849 = vmatpush1.bf16.msra.mxu1 %v6210_v11  ;;  %v6279_v10 = vld [vmem:[%s8882_s3 + $0x180] ss:$16 sps:$4 sm:$0xff]   ;;  %v428_v11 = vsub.s32 0, %v7948_v12 }
 0x19f   :  { %4686 = vmatprep.subr.bf16.mxu0 %v6215_v38  ;;  %4850 = vmatprep.subr.bf16.mxu1 %v6218_v43  ;;  %v6282_v38 = vld [vmem:[%s8882_s3 + $0x188] ss:$16 sps:$4 sm:$0xff]   ;;  %v6287_v43 = vld [vmem:[%s8882_s3 + $0x1a4] ss:$16 sps:$4 sm:$0xff]  }
 0x1a2   :  { %4687 = vmatpush1.bf16.msra.mxu0 %v6213_v14  ;;  %4851 = vmatpush1.bf16.msra.mxu1 %v6216_v53  ;;  %v440_v14 = vsub.s32 3, %v7948_v12  ;;  %v6285_v53 = vld [vmem:[%s8882_s3 + $0x1a0] ss:$16 sps:$4 sm:$0xff]  }
 0x1a3   :  { %4688 = vmatprep.subr.bf16.mxu0 %v6221_v17  ;;  %4852 = vmatprep.subr.bf16.mxu1 %v6224_v25  ;;  %v429_v17 = vrot.slane %v7977_v18, %v428_v11  ;;  %v6288_v25 = vld [vmem:[%s8882_s3 + $0x1a8] ss:$16 sps:$4 sm:$0xff]  }
 0x1a4   :  { %v7994_v23 = vpop.f32.mrb[0].mxu0  ;;  %v7999_v27 = vpop.f32.mrb[0].mxu1 }
 0x1a5   :  { %v2613_v33 = vpop.f32.mrb[1].mxu0  ;;  %v8001_v29 = vpop.f32.mrb[1].mxu1 }
 0x1a6   :  { %4689 = vmatpush1.bf16.msra.mxu0 %v6219_v21  ;;  %v6115_v28 = vadd.f32 %v2613_v33, %v433_v19  ;;  %v2615_v30 = vpop.f32.mrb[2].mxu0  ;;  %4853 = vmatpush1.bf16.msra.mxu1 %v6222_v20  ;;  %v2779_v15 = vpop.f32.mrb[2].mxu1  ;;  %v6293_v21 = vld [vmem:[%s8882_s3 + $0x1c4] ss:$16 sps:$4 sm:$0xff]   ;;  %v6296_v19 = vld [vmem:[%s8882_s3 + $0x1cc] ss:$16 sps:$4 sm:$0xff]   ;;  %v441_v20 = vrot.slane %v7977_v18, %v440_v14 }
 0x1a7   :  { %v2616_v32 = vpop.f32.mrb[3].mxu0  ;;  %4690 = vmatprep.subr.bf16.mxu0 %v6227_v22  ;;  %v2780_v37 = vpop.f32.mrb[3].mxu1  ;;  %4854 = vmatprep.subr.bf16.mxu1 %v6230_v26  ;;  %v6291_v22 = vld [vmem:[%s8882_s3 + $0x1c0] ss:$16 sps:$4 sm:$0xff]   ;;  %v6114_v26 = vadd.f32 %v7994_v23, %v429_v17  ;;  %v6294_v33 = vld [vmem:[%s8882_s3 + $0x1c8] ss:$16 sps:$4 sm:$0xff]  }
 0x1a8   :  { %v3111_v36 = vmax.f32 %v6115_v28, 0.0  ;;  %v6299_v28 = vld [vmem:[%s8882_s3 + $0x1e4] ss:$16 sps:$4 sm:$0xff]   ;;  %v6302_v30 = vld [vmem:[%s8882_s3 + $0x1ec] ss:$16 sps:$4 sm:$0xff]  }
 0x1a9   :  { %v6297_v23 = vld [vmem:[%s8882_s3 + $0x1e0] ss:$16 sps:$4 sm:$0xff]   ;;  %v3110_v15 = vmax.f32 %v6114_v26, 0.0  ;;  %v6300_v32 = vld [vmem:[%s8882_s3 + $0x1e8] ss:$16 sps:$4 sm:$0xff]  }
 0x1aa   :  { %v3119_v40 = vpack.c.bf16 %v3111_v36, %v3111_v36  ;;  %4691 = vmatpush1.bf16.msra.mxu0 %v6225_v31  ;;  %4855 = vmatpush1.bf16.msra.mxu1 %v6228_v34  ;;  %v6117_v31 = vadd.f32 %v8001_v29, %v441_v20  ;;  %v6305_v34 = vld [vmem:[%s8882_s3 + $0x204] ss:$16 sps:$4 sm:$0xff]   ;;  %v6308_v29 = vld [vmem:[%s8882_s3 + $0x20c] ss:$16 sps:$4 sm:$0xff]   ;;  %v6303_v36 = vld [vmem:[%s8882_s3 + $0x200] ss:$16 sps:$4 sm:$0xff]  }
 0x1ab   :  { %4692 = vmatprep.subr.bf16.mxu0 %v6233_v35  ;;  %4856 = vmatprep.subr.bf16.mxu1 %v6236_v39  ;;  %v3118_v37 = vpack.c.bf16 %v3110_v15, %v3110_v15  ;;  %v6306_v39 = vld [vmem:[%s8882_s3 + $0x208] ss:$16 sps:$4 sm:$0xff]   ;;  %v6368_v17 = vld [vmem:[%s8882_s3 + $0x34c] ss:$16 sps:$4 sm:$0xff]   ;;  %v6383_v15 = vld [vmem:[%s8882_s3 + $0x3a4] ss:$16 sps:$4 sm:$0xff]  }
 0x1ac   :  { %4716 = vmatprep.mubr.bf16.mxu0 %v3119_v40  ;;  %4880 = vmatprep.mubr.bf16.mxu1 %v3119_v40  ;;  %v3113_v35 = vmax.f32 %v6117_v31, 0.0  ;;  %v6311_v40 = vld [vmem:[%s8882_s3 + $0x224] ss:$16 sps:$4 sm:$0xff]   ;;  %v6374_v20 = vld [vmem:[%s8882_s3 + $0x36c] ss:$16 sps:$4 sm:$0xff]   ;;  %v436_v31 = vsub.s32 2, %v7948_v12 }
 0x1ad   :  { %v6372_v26 = vld [vmem:[%s8882_s3 + $0x368] ss:$16 sps:$4 sm:$0xff]  }
 0x1ae   :  { %4693 = vmatpush1.bf16.msra.mxu0 %v6231_v41  ;;  %4857 = vmatpush1.bf16.msra.mxu1 %v6234_v42  ;;  %v3121_v41 = vpack.c.bf16 %v3113_v35, %v3113_v35  ;;  %v6314_v42 = vld [vmem:[%s8882_s3 + $0x22c] ss:$16 sps:$4 sm:$0xff]   ;;  %v6384_v35 = vld [vmem:[%s8882_s3 + $0x3a8] ss:$16 sps:$4 sm:$0xff]  }
 0x1af   :  { %4694 = vmatprep.subr.bf16.mxu0 %v6239_v24  ;;  %4858 = vmatprep.subr.bf16.mxu1 %v6242_v44  ;;  %v6309_v24 = vld [vmem:[%s8882_s3 + $0x220] ss:$16 sps:$4 sm:$0xff]   ;;  %v6312_v44 = vld [vmem:[%s8882_s3 + $0x228] ss:$16 sps:$4 sm:$0xff]  }
 0x1b2   :  { %4695 = vmatpush1.bf16.msra.mxu0 %v6237_v45  ;;  %4859 = vmatpush1.bf16.msra.mxu1 %v6240_v46  ;;  %v6317_v45 = vld [vmem:[%s8882_s3 + $0x244] ss:$16 sps:$4 sm:$0xff]   ;;  %v6320_v46 = vld [vmem:[%s8882_s3 + $0x24c] ss:$16 sps:$4 sm:$0xff]  }
 0x1b3   :  { %4696 = vmatprep.subr.bf16.mxu0 %v6245_v47  ;;  %4860 = vmatprep.subr.bf16.mxu1 %v6248_v48  ;;  %v6315_v47 = vld [vmem:[%s8882_s3 + $0x240] ss:$16 sps:$4 sm:$0xff]   ;;  %v6318_v48 = vld [vmem:[%s8882_s3 + $0x248] ss:$16 sps:$4 sm:$0xff]  }
 0x1b6   :  { %4697 = vmatpush1.bf16.msra.mxu0 %v6243_v49  ;;  %4861 = vmatpush1.bf16.msra.mxu1 %v6246_v50  ;;  %v6323_v49 = vld [vmem:[%s8882_s3 + $0x264] ss:$16 sps:$4 sm:$0xff]   ;;  %v6326_v50 = vld [vmem:[%s8882_s3 + $0x26c] ss:$16 sps:$4 sm:$0xff]  }
 0x1b7   :  { %4698 = vmatprep.subr.bf16.mxu0 %v6251_v51  ;;  %4862 = vmatprep.subr.bf16.mxu1 %v6254_v52  ;;  %v6321_v51 = vld [vmem:[%s8882_s3 + $0x260] ss:$16 sps:$4 sm:$0xff]   ;;  %v6324_v52 = vld [vmem:[%s8882_s3 + $0x268] ss:$16 sps:$4 sm:$0xff]  }
 0x1ba   :  { %4699 = vmatpush1.bf16.msra.mxu0 %v6249_v54  ;;  %4863 = vmatpush1.bf16.msra.mxu1 %v6252_v55  ;;  %v6329_v54 = vld [vmem:[%s8882_s3 + $0x284] ss:$16 sps:$4 sm:$0xff]   ;;  %v6332_v55 = vld [vmem:[%s8882_s3 + $0x28c] ss:$16 sps:$4 sm:$0xff]  }
 0x1bb   :  { %4700 = vmatprep.subr.bf16.mxu0 %v6257_v56  ;;  %4864 = vmatprep.subr.bf16.mxu1 %v6260_v58  ;;  %v6327_v56 = vld [vmem:[%s8882_s3 + $0x280] ss:$16 sps:$4 sm:$0xff]   ;;  %v6330_v58 = vld [vmem:[%s8882_s3 + $0x288] ss:$16 sps:$4 sm:$0xff]  }
 0x1be   :  { %4701 = vmatpush1.bf16.msra.mxu0 %v6255_v59  ;;  %4865 = vmatpush1.bf16.msra.mxu1 %v6258_v60  ;;  %v6335_v59 = vld [vmem:[%s8882_s3 + $0x2a4] ss:$16 sps:$4 sm:$0xff]   ;;  %v6338_v60 = vld [vmem:[%s8882_s3 + $0x2ac] ss:$16 sps:$4 sm:$0xff]  }
 0x1bf   :  { %4702 = vmatprep.subr.bf16.mxu0 %v6263_v61  ;;  %4866 = vmatprep.subr.bf16.mxu1 %v6266_v62  ;;  %v6333_v61 = vld [vmem:[%s8882_s3 + $0x2a0] ss:$16 sps:$4 sm:$0xff]   ;;  %v6336_v62 = vld [vmem:[%s8882_s3 + $0x2a8] ss:$16 sps:$4 sm:$0xff]  }
 0x1c2   :  { %4703 = vmatpush1.bf16.msra.mxu0 %v6261_v63  ;;  %4867 = vmatpush1.bf16.msra.mxu1 %v6264_v0  ;;  %v6341_v63 = vld [vmem:[%s8882_s3 + $0x2c4] ss:$16 sps:$4 sm:$0xff]   ;;  %v6344_v0 = vld [vmem:[%s8882_s3 + $0x2cc] ss:$16 sps:$4 sm:$0xff]  }
 0x1c3   :  { %4704 = vmatprep.subr.bf16.mxu0 %v6269_v1  ;;  %4868 = vmatprep.subr.bf16.mxu1 %v6272_v2  ;;  %v6339_v1 = vld [vmem:[%s8882_s3 + $0x2c0] ss:$16 sps:$4 sm:$0xff]   ;;  %v6342_v2 = vld [vmem:[%s8882_s3 + $0x2c8] ss:$16 sps:$4 sm:$0xff]  }
 0x1c6   :  { %4705 = vmatpush1.bf16.msra.mxu0 %v6267_v3  ;;  %4869 = vmatpush1.bf16.msra.mxu1 %v6270_v4  ;;  %v6347_v3 = vld [vmem:[%s8882_s3 + $0x2e4] ss:$16 sps:$4 sm:$0xff]   ;;  %v6350_v4 = vld [vmem:[%s8882_s3 + $0x2ec] ss:$16 sps:$4 sm:$0xff]  }
 0x1c7   :  { %4706 = vmatprep.subr.bf16.mxu0 %v6275_v5  ;;  %4870 = vmatprep.subr.bf16.mxu1 %v6278_v6  ;;  %v6345_v5 = vld [vmem:[%s8882_s3 + $0x2e0] ss:$16 sps:$4 sm:$0xff]   ;;  %v6348_v6 = vld [vmem:[%s8882_s3 + $0x2e8] ss:$16 sps:$4 sm:$0xff]  }
 0x1ca   :  { %4707 = vmatpush1.bf16.msra.mxu0 %v6273_v7  ;;  %4871 = vmatpush1.bf16.msra.mxu1 %v6276_v57  ;;  %v6353_v7 = vld [vmem:[%s8882_s3 + $0x304] ss:$16 sps:$4 sm:$0xff]   ;;  %v6356_v57 = vld [vmem:[%s8882_s3 + $0x30c] ss:$16 sps:$4 sm:$0xff]  }
 0x1cb   :  { %4708 = vmatprep.subr.bf16.mxu0 %v6281_v8  ;;  %4872 = vmatprep.subr.bf16.mxu1 %v6284_v9  ;;  %v6351_v8 = vld [vmem:[%s8882_s3 + $0x300] ss:$16 sps:$4 sm:$0xff]   ;;  %v6354_v9 = vld [vmem:[%s8882_s3 + $0x308] ss:$16 sps:$4 sm:$0xff]  }
 0x1ce   :  { %4709 = vmatpush1.bf16.msra.mxu0 %v6279_v10  ;;  %4873 = vmatpush1.bf16.msra.mxu1 %v6282_v38  ;;  %v6359_v10 = vld [vmem:[%s8882_s3 + $0x324] ss:$16 sps:$4 sm:$0xff]   ;;  %v6362_v38 = vld [vmem:[%s8882_s3 + $0x32c] ss:$16 sps:$4 sm:$0xff]  }
 0x1cf   :  { %4710 = vmatprep.subr.bf16.mxu0 %v6287_v43  ;;  %4874 = vmatprep.subr.bf16.mxu1 %v6290_v13  ;;  %v6357_v43 = vld [vmem:[%s8882_s3 + $0x320] ss:$16 sps:$4 sm:$0xff]   ;;  %v6360_v13 = vld [vmem:[%s8882_s3 + $0x328] ss:$16 sps:$4 sm:$0xff]  }
 0x1d2   :  { %4711 = vmatpush1.bf16.msra.mxu0 %v6285_v53  ;;  %4875 = vmatpush1.bf16.msra.mxu1 %v6288_v25  ;;  %v6365_v53 = vld [vmem:[%s8882_s3 + $0x344] ss:$16 sps:$4 sm:$0xff]   ;;  %v6363_v25 = vld [vmem:[%s8882_s3 + $0x340] ss:$16 sps:$4 sm:$0xff]  }
 0x1d3   :  { %4712 = vmatprep.subr.bf16.mxu0 %v6293_v21  ;;  %4876 = vmatprep.subr.bf16.mxu1 %v6296_v19  ;;  %v6366_v21 = vld [vmem:[%s8882_s3 + $0x348] ss:$16 sps:$4 sm:$0xff]   ;;  %v6371_v19 = vld [vmem:[%s8882_s3 + $0x364] ss:$16 sps:$4 sm:$0xff]  }
 0x1d6   :  { %4713 = vmatpush1.bf16.msra.mxu0 %v6291_v22  ;;  %4877 = vmatpush1.bf16.msra.mxu1 %v6294_v33  ;;  %v6369_v22 = vld [vmem:[%s8882_s3 + $0x360] ss:$16 sps:$4 sm:$0xff]   ;;  %v6377_v33 = vld [vmem:[%s8882_s3 + $0x384] ss:$16 sps:$4 sm:$0xff]  }
 0x1d7   :  { %4714 = vmatprep.subr.bf16.mxu0 %v6299_v28  ;;  %4878 = vmatprep.subr.bf16.mxu1 %v6302_v30  ;;  %v6380_v28 = vld [vmem:[%s8882_s3 + $0x38c] ss:$16 sps:$4 sm:$0xff]   ;;  %v6375_v30 = vld [vmem:[%s8882_s3 + $0x380] ss:$16 sps:$4 sm:$0xff]  }
 0x1da   :  { %4715 = vmatpush1.bf16.msra.mxu0 %v6297_v23  ;;  %4879 = vmatpush1.bf16.msra.mxu1 %v6300_v32  ;;  %v6378_v23 = vld [vmem:[%s8882_s3 + $0x388] ss:$16 sps:$4 sm:$0xff]   ;;  %v6386_v32 = vld [vmem:[%s8882_s3 + $0x3ac] ss:$16 sps:$4 sm:$0xff]  }
 0x1db   :  { %4725 = vmatprep.subr.bf16.mxu0 %v6305_v34  ;;  %4889 = vmatprep.subr.bf16.mxu1 %v6308_v29  ;;  %v6381_v34 = vld [vmem:[%s8882_s3 + $0x3a0] ss:$16 sps:$4 sm:$0xff]   ;;  %v437_v29 = vrot.slane %v7977_v18, %v436_v31 }
 0x1dd   :  { %4717 = vmatmul.mubr.bf16.vlgmr.msra.gmra.mrb[8].mxu0 %v3118_v37  ;;  %4881 = vmatmul.mubr.bf16.vlgmr.msra.gmra.mrb[8].mxu1 %v3118_v37  ;;  %v6392_v37 = vld [vmem:[%s8882_s3 + $0x3cc] ss:$16 sps:$4 sm:$0xff]  }
 0x1de   :  { %4726 = vmatpush1.bf16.msra.mxu0 %v6303_v36  ;;  %4757 = vmatprep.mubr.bf16.mxu0 %v3121_v41  ;;  %v6389_v36 = vld [vmem:[%s8882_s3 + $0x3c4] ss:$16 sps:$4 sm:$0xff]  }
 0x1df   :  { %4890 = vmatpush1.bf16.msra.mxu1 %v6306_v39  ;;  %4921 = vmatprep.mubr.bf16.mxu1 %v3121_v41  ;;  %v6387_v39 = vld [vmem:[%s8882_s3 + $0x3c0] ss:$16 sps:$4 sm:$0xff]   ;;  %v6390_v41 = vld [vmem:[%s8882_s3 + $0x3c8] ss:$16 sps:$4 sm:$0xff]  }
 0x1e0   :  { %4727 = vmatprep.subr.bf16.mxu0 %v6311_v40  ;;  %4891 = vmatprep.subr.bf16.mxu1 %v6314_v42  ;;  %v6116_v40 = vadd.f32 %v7999_v27, %v437_v29  ;;  %v6395_v42 = vld [vmem:[%s8882_s3 + $0x3e4] ss:$16 sps:$4 sm:$0xff]   ;;  %v6393_v27 = vld [vmem:[%s8882_s3 + $0x3e0] ss:$16 sps:$4 sm:$0xff]   ;;  %v6470_v29 = vld [vmem:[%s8882_s3 + $0x56c] ss:$16 sps:$4 sm:$0xff]  }
 0x1e2   :  { %4728 = vmatpush1.bf16.msra.mxu0 %v6309_v24  ;;  %v6398_v24 = vld [vmem:[%s8882_s3 + $0x3ec] ss:$16 sps:$4 sm:$0xff]  }
 0x1e3   :  { %4892 = vmatpush1.bf16.msra.mxu1 %v6312_v44  ;;  %4729 = vmatprep.subr.bf16.mxu0 %v6317_v45  ;;  %v3112_v44 = vmax.f32 %v6116_v40, 0.0  ;;  %v6396_v45 = vld [vmem:[%s8882_s3 + $0x3e8] ss:$16 sps:$4 sm:$0xff]   ;;  %v6471_v40 = vld [vmem:[%s8882_s3 + $0x580] ss:$16 sps:$4 sm:$0xff]  }
 0x1e4   :  { %4893 = vmatprep.subr.bf16.mxu1 %v6320_v46  ;;  %v6401_v46 = vld [vmem:[%s8882_s3 + $0x404] ss:$16 sps:$4 sm:$0xff]  }
 0x1e6   :  { %4730 = vmatpush1.bf16.msra.mxu0 %v6315_v47  ;;  %v6404_v47 = vld [vmem:[%s8882_s3 + $0x40c] ss:$16 sps:$4 sm:$0xff]  }
 0x1e7   :  { %4894 = vmatpush1.bf16.msra.mxu1 %v6318_v48  ;;  %4731 = vmatprep.subr.bf16.mxu0 %v6323_v49  ;;  %v6399_v48 = vld [vmem:[%s8882_s3 + $0x400] ss:$16 sps:$4 sm:$0xff]   ;;  %v3120_v49 = vpack.c.bf16 %v3112_v44, %v3112_v44  ;;  %v6480_v44 = vld [vmem:[%s8882_s3 + $0x5a8] ss:$16 sps:$4 sm:$0xff]  }
 0x1e8   :  { %4895 = vmatprep.subr.bf16.mxu1 %v6326_v50  ;;  %v6402_v50 = vld [vmem:[%s8882_s3 + $0x408] ss:$16 sps:$4 sm:$0xff]  }
 0x1ea   :  { %4732 = vmatpush1.bf16.msra.mxu0 %v6321_v51  ;;  %v6407_v51 = vld [vmem:[%s8882_s3 + $0x424] ss:$16 sps:$4 sm:$0xff]  }
 0x1eb   :  { %4896 = vmatpush1.bf16.msra.mxu1 %v6324_v52  ;;  %4733 = vmatprep.subr.bf16.mxu0 %v6329_v54  ;;  %v6410_v52 = vld [vmem:[%s8882_s3 + $0x42c] ss:$16 sps:$4 sm:$0xff]   ;;  %v6405_v54 = vld [vmem:[%s8882_s3 + $0x420] ss:$16 sps:$4 sm:$0xff]  }
 0x1ec   :  { %4897 = vmatprep.subr.bf16.mxu1 %v6332_v55  ;;  %v6408_v55 = vld [vmem:[%s8882_s3 + $0x428] ss:$16 sps:$4 sm:$0xff]  }
 0x1ee   :  { %4734 = vmatpush1.bf16.msra.mxu0 %v6327_v56  ;;  %v6413_v56 = vld [vmem:[%s8882_s3 + $0x444] ss:$16 sps:$4 sm:$0xff]  }
 0x1ef   :  { %4898 = vmatpush1.bf16.msra.mxu1 %v6330_v58  ;;  %4735 = vmatprep.subr.bf16.mxu0 %v6335_v59  ;;  %v6416_v58 = vld [vmem:[%s8882_s3 + $0x44c] ss:$16 sps:$4 sm:$0xff]   ;;  %v6411_v59 = vld [vmem:[%s8882_s3 + $0x440] ss:$16 sps:$4 sm:$0xff]  }
 0x1f0   :  { %4899 = vmatprep.subr.bf16.mxu1 %v6338_v60  ;;  %v6414_v60 = vld [vmem:[%s8882_s3 + $0x448] ss:$16 sps:$4 sm:$0xff]  }
 0x1f2   :  { %4736 = vmatpush1.bf16.msra.mxu0 %v6333_v61  ;;  %v6419_v61 = vld [vmem:[%s8882_s3 + $0x464] ss:$16 sps:$4 sm:$0xff]  }
 0x1f3   :  { %4900 = vmatpush1.bf16.msra.mxu1 %v6336_v62  ;;  %4737 = vmatprep.subr.bf16.mxu0 %v6341_v63  ;;  %v6422_v62 = vld [vmem:[%s8882_s3 + $0x46c] ss:$16 sps:$4 sm:$0xff]   ;;  %v6417_v63 = vld [vmem:[%s8882_s3 + $0x460] ss:$16 sps:$4 sm:$0xff]  }
 0x1f4   :  { %4901 = vmatprep.subr.bf16.mxu1 %v6344_v0  ;;  %v6420_v0 = vld [vmem:[%s8882_s3 + $0x468] ss:$16 sps:$4 sm:$0xff]  }
 0x1f6   :  { %4738 = vmatpush1.bf16.msra.mxu0 %v6339_v1  ;;  %v6425_v1 = vld [vmem:[%s8882_s3 + $0x484] ss:$16 sps:$4 sm:$0xff]  }
 0x1f7   :  { %4902 = vmatpush1.bf16.msra.mxu1 %v6342_v2  ;;  %4739 = vmatprep.subr.bf16.mxu0 %v6347_v3  ;;  %v6428_v2 = vld [vmem:[%s8882_s3 + $0x48c] ss:$16 sps:$4 sm:$0xff]   ;;  %v6423_v3 = vld [vmem:[%s8882_s3 + $0x480] ss:$16 sps:$4 sm:$0xff]  }
 0x1f8   :  { %4903 = vmatprep.subr.bf16.mxu1 %v6350_v4  ;;  %v6426_v4 = vld [vmem:[%s8882_s3 + $0x488] ss:$16 sps:$4 sm:$0xff]  }
 0x1fa   :  { %4740 = vmatpush1.bf16.msra.mxu0 %v6345_v5  ;;  %v6431_v5 = vld [vmem:[%s8882_s3 + $0x4a4] ss:$16 sps:$4 sm:$0xff]  }
 0x1fb   :  { %4904 = vmatpush1.bf16.msra.mxu1 %v6348_v6  ;;  %4741 = vmatprep.subr.bf16.mxu0 %v6353_v7  ;;  %v6434_v6 = vld [vmem:[%s8882_s3 + $0x4ac] ss:$16 sps:$4 sm:$0xff]   ;;  %v6429_v7 = vld [vmem:[%s8882_s3 + $0x4a0] ss:$16 sps:$4 sm:$0xff]  }
 0x1fc   :  { %4905 = vmatprep.subr.bf16.mxu1 %v6356_v57  ;;  %v6432_v57 = vld [vmem:[%s8882_s3 + $0x4a8] ss:$16 sps:$4 sm:$0xff]  }
 0x1fe   :  { %4742 = vmatpush1.bf16.msra.mxu0 %v6351_v8  ;;  %v6437_v8 = vld [vmem:[%s8882_s3 + $0x4c4] ss:$16 sps:$4 sm:$0xff]  }
 0x1ff   :  { %4906 = vmatpush1.bf16.msra.mxu1 %v6354_v9  ;;  %4743 = vmatprep.subr.bf16.mxu0 %v6359_v10  ;;  %v6440_v9 = vld [vmem:[%s8882_s3 + $0x4cc] ss:$16 sps:$4 sm:$0xff]   ;;  %v6435_v10 = vld [vmem:[%s8882_s3 + $0x4c0] ss:$16 sps:$4 sm:$0xff]  }
 0x200   :  { %4907 = vmatprep.subr.bf16.mxu1 %v6362_v38  ;;  %v6438_v38 = vld [vmem:[%s8882_s3 + $0x4c8] ss:$16 sps:$4 sm:$0xff]  }
 0x202   :  { %4744 = vmatpush1.bf16.msra.mxu0 %v6357_v43  ;;  %v6443_v43 = vld [vmem:[%s8882_s3 + $0x4e4] ss:$16 sps:$4 sm:$0xff]  }
 0x203   :  { %4908 = vmatpush1.bf16.msra.mxu1 %v6360_v13  ;;  %4745 = vmatprep.subr.bf16.mxu0 %v6365_v53  ;;  %v6446_v13 = vld [vmem:[%s8882_s3 + $0x4ec] ss:$16 sps:$4 sm:$0xff]   ;;  %v6441_v53 = vld [vmem:[%s8882_s3 + $0x4e0] ss:$16 sps:$4 sm:$0xff]  }
 0x204   :  { %4909 = vmatprep.subr.bf16.mxu1 %v6368_v17  ;;  %v6444_v17 = vld [vmem:[%s8882_s3 + $0x4e8] ss:$16 sps:$4 sm:$0xff]  }
 0x206   :  { %4746 = vmatpush1.bf16.msra.mxu0 %v6363_v25  ;;  %v6449_v25 = vld [vmem:[%s8882_s3 + $0x504] ss:$16 sps:$4 sm:$0xff]  }
 0x207   :  { %4910 = vmatpush1.bf16.msra.mxu1 %v6366_v21  ;;  %4747 = vmatprep.subr.bf16.mxu0 %v6371_v19  ;;  %v6452_v21 = vld [vmem:[%s8882_s3 + $0x50c] ss:$16 sps:$4 sm:$0xff]   ;;  %v6447_v19 = vld [vmem:[%s8882_s3 + $0x500] ss:$16 sps:$4 sm:$0xff]  }
 0x208   :  { %4911 = vmatprep.subr.bf16.mxu1 %v6374_v20  ;;  %v6450_v20 = vld [vmem:[%s8882_s3 + $0x508] ss:$16 sps:$4 sm:$0xff]  }
 0x20a   :  { %4748 = vmatpush1.bf16.msra.mxu0 %v6369_v22  ;;  %v6455_v22 = vld [vmem:[%s8882_s3 + $0x524] ss:$16 sps:$4 sm:$0xff]  }
 0x20b   :  { %4912 = vmatpush1.bf16.msra.mxu1 %v6372_v26  ;;  %4749 = vmatprep.subr.bf16.mxu0 %v6377_v33  ;;  %v6458_v26 = vld [vmem:[%s8882_s3 + $0x52c] ss:$16 sps:$4 sm:$0xff]   ;;  %v6453_v33 = vld [vmem:[%s8882_s3 + $0x520] ss:$16 sps:$4 sm:$0xff]  }
 0x20c   :  { %4913 = vmatprep.subr.bf16.mxu1 %v6380_v28  ;;  %v6456_v28 = vld [vmem:[%s8882_s3 + $0x528] ss:$16 sps:$4 sm:$0xff]  }
 0x20e   :  { %4750 = vmatpush1.bf16.msra.mxu0 %v6375_v30  ;;  %v6461_v30 = vld [vmem:[%s8882_s3 + $0x544] ss:$16 sps:$4 sm:$0xff]  }
 0x20f   :  { %4914 = vmatpush1.bf16.msra.mxu1 %v6378_v23  ;;  %4751 = vmatprep.subr.bf16.mxu0 %v6383_v15  ;;  %v6464_v23 = vld [vmem:[%s8882_s3 + $0x54c] ss:$16 sps:$4 sm:$0xff]   ;;  %v6459_v15 = vld [vmem:[%s8882_s3 + $0x540] ss:$16 sps:$4 sm:$0xff]  }
 0x210   :  { %4915 = vmatprep.subr.bf16.mxu1 %v6386_v32  ;;  %v6462_v32 = vld [vmem:[%s8882_s3 + $0x548] ss:$16 sps:$4 sm:$0xff]  }
 0x212   :  { %4752 = vmatpush1.bf16.msra.mxu0 %v6381_v34  ;;  %v6467_v34 = vld [vmem:[%s8882_s3 + $0x564] ss:$16 sps:$4 sm:$0xff]  }
 0x213   :  { %4916 = vmatpush1.bf16.msra.mxu1 %v6384_v35  ;;  %4753 = vmatprep.subr.bf16.mxu0 %v6389_v36  ;;  %v6465_v35 = vld [vmem:[%s8882_s3 + $0x560] ss:$16 sps:$4 sm:$0xff]   ;;  %v6468_v36 = vld [vmem:[%s8882_s3 + $0x568] ss:$16 sps:$4 sm:$0xff]  }
 0x214   :  { %4917 = vmatprep.subr.bf16.mxu1 %v6392_v37  ;;  %v6473_v37 = vld [vmem:[%s8882_s3 + $0x584] ss:$16 sps:$4 sm:$0xff]  }
 0x216   :  { %4754 = vmatpush1.bf16.msra.mxu0 %v6387_v39  ;;  %v6476_v39 = vld [vmem:[%s8882_s3 + $0x58c] ss:$16 sps:$4 sm:$0xff]  }
 0x217   :  { %4918 = vmatpush1.bf16.msra.mxu1 %v6390_v41  ;;  %4755 = vmatprep.subr.bf16.mxu0 %v6395_v42  ;;  %v6474_v41 = vld [vmem:[%s8882_s3 + $0x588] ss:$16 sps:$4 sm:$0xff]   ;;  %v6479_v42 = vld [vmem:[%s8882_s3 + $0x5a4] ss:$16 sps:$4 sm:$0xff]  }
 0x218   :  { %4919 = vmatprep.subr.bf16.mxu1 %v6398_v24  ;;  %v6482_v24 = vld [vmem:[%s8882_s3 + $0x5ac] ss:$16 sps:$4 sm:$0xff]  }
 0x21a   :  { %4756 = vmatpush1.bf16.msra.mxu0 %v6393_v27  ;;  %v6477_v27 = vld [vmem:[%s8882_s3 + $0x5a0] ss:$16 sps:$4 sm:$0xff]  }
 0x21b   :  { %4920 = vmatpush1.bf16.msra.mxu1 %v6396_v45  ;;  %4766 = vmatprep.subr.bf16.mxu0 %v6401_v46  ;;  %v6485_v45 = vld [vmem:[%s8882_s3 + $0x5c4] ss:$16 sps:$4 sm:$0xff]   ;;  %v6488_v46 = vld [vmem:[%s8882_s3 + $0x5cc] ss:$16 sps:$4 sm:$0xff]  }
 0x21c   :  { %4930 = vmatprep.subr.bf16.mxu1 %v6404_v47  ;;  %v6483_v47 = vld [vmem:[%s8882_s3 + $0x5c0] ss:$16 sps:$4 sm:$0xff]  }
 0x21d   :  { %4758 = vmatmul.mubr.bf16.vlgmr.msra.gmra.mrb[8].mxu0 %v3120_v49 }
 0x21e   :  { %4922 = vmatmul.mubr.bf16.vlgmr.msra.gmra.mrb[8].mxu1 %v3120_v49  ;;  %4767 = vmatpush1.bf16.msra.mxu0 %v6399_v48  ;;  %v6486_v48 = vld [vmem:[%s8882_s3 + $0x5c8] ss:$16 sps:$4 sm:$0xff]   ;;  %v6491_v49 = vld [vmem:[%s8882_s3 + $0x5e4] ss:$16 sps:$4 sm:$0xff]  }
 0x21f   :  { %4931 = vmatpush1.bf16.msra.mxu1 %v6402_v50  ;;  %4768 = vmatprep.subr.bf16.mxu0 %v6407_v51  ;;  %v6494_v50 = vld [vmem:[%s8882_s3 + $0x5ec] ss:$16 sps:$4 sm:$0xff]   ;;  %v6489_v51 = vld [vmem:[%s8882_s3 + $0x5e0] ss:$16 sps:$4 sm:$0xff]  }
 0x220   :  { %4932 = vmatprep.subr.bf16.mxu1 %v6410_v52  ;;  %v6492_v52 = vld [vmem:[%s8882_s3 + $0x5e8] ss:$16 sps:$4 sm:$0xff]  }
 0x222   :  { %4769 = vmatpush1.bf16.msra.mxu0 %v6405_v54  ;;  %v6497_v54 = vld [vmem:[%s8882_s3 + $0x604] ss:$16 sps:$4 sm:$0xff]  }
 0x223   :  { %4933 = vmatpush1.bf16.msra.mxu1 %v6408_v55  ;;  %4770 = vmatprep.subr.bf16.mxu0 %v6413_v56  ;;  %v6500_v55 = vld [vmem:[%s8882_s3 + $0x60c] ss:$16 sps:$4 sm:$0xff]   ;;  %v444_v56 = vsub.s32 4, %v7948_v12 }
 0x224   :  { %4934 = vmatprep.subr.bf16.mxu1 %v6416_v58  ;;  %v448_v58 = vsub.s32 5, %v7948_v12 }
 0x226   :  { %4771 = vmatpush1.bf16.msra.mxu0 %v6411_v59  ;;  %v456_v59 = vsub.s32 7, %v7948_v12 }
 0x227   :  { %4935 = vmatpush1.bf16.msra.mxu1 %v6414_v60  ;;  %4772 = vmatprep.subr.bf16.mxu0 %v6419_v61  ;;  %v445_v60 = vrot.slane %v7977_v18, %v444_v56  ;;  %v449_v61 = vrot.slane %v7977_v18, %v448_v58  ;;  %v6549_v56 = vld [vmem:[%s8882_s3 + $0x720] ss:$16 sps:$4 sm:$0xff]   ;;  %v6552_v58 = vld [vmem:[%s8882_s3 + $0x728] ss:$16 sps:$4 sm:$0xff]  }
 0x228   :  { %4936 = vmatprep.subr.bf16.mxu1 %v6422_v62  ;;  %v457_v62 = vrot.slane %v7977_v18, %v456_v59  ;;  %v6495_v18 = vld [vmem:[%s8882_s3 + $0x600] ss:$16 sps:$4 sm:$0xff]   ;;  %v6557_v59 = vld [vmem:[%s8882_s3 + $0x744] ss:$16 sps:$4 sm:$0xff]  }
 0x22a   :  { %4773 = vmatpush1.bf16.msra.mxu0 %v6417_v63 }
 0x22b   :  { %4937 = vmatpush1.bf16.msra.mxu1 %v6420_v0  ;;  %4774 = vmatprep.subr.bf16.mxu0 %v6425_v1 }
 0x22c   :  { %4938 = vmatprep.subr.bf16.mxu1 %v6428_v2 }
 0x22e   :  { %4775 = vmatpush1.bf16.msra.mxu0 %v6423_v3 }
 0x22f   :  { %4939 = vmatpush1.bf16.msra.mxu1 %v6426_v4  ;;  %4776 = vmatprep.subr.bf16.mxu0 %v6431_v5 }
 0x230   :  { %4940 = vmatprep.subr.bf16.mxu1 %v6434_v6 }
 0x232   :  { %4777 = vmatpush1.bf16.msra.mxu0 %v6429_v7 }
 0x233   :  { %4941 = vmatpush1.bf16.msra.mxu1 %v6432_v57  ;;  %4778 = vmatprep.subr.bf16.mxu0 %v6437_v8 }
 0x234   :  { %4942 = vmatprep.subr.bf16.mxu1 %v6440_v9 }
 0x236   :  { %4779 = vmatpush1.bf16.msra.mxu0 %v6435_v10 }
 0x237   :  { %4943 = vmatpush1.bf16.msra.mxu1 %v6438_v38  ;;  %4780 = vmatprep.subr.bf16.mxu0 %v6443_v43 }
 0x238   :  { %4944 = vmatprep.subr.bf16.mxu1 %v6446_v13  ;;  %v6498_v13 = vld [vmem:[%s8882_s3 + $0x608] ss:$16 sps:$4 sm:$0xff]  }
 0x23a   :  { %4781 = vmatpush1.bf16.msra.mxu0 %v6441_v53 }
 0x23b   :  { %4945 = vmatpush1.bf16.msra.mxu1 %v6444_v17  ;;  %4782 = vmatprep.subr.bf16.mxu0 %v6449_v25  ;;  %v6503_v17 = vld [vmem:[%s8882_s3 + $0x624] ss:$16 sps:$4 sm:$0xff]   ;;  %v6506_v25 = vld [vmem:[%s8882_s3 + $0x62c] ss:$16 sps:$4 sm:$0xff]  }
 0x23c   :  { %4946 = vmatprep.subr.bf16.mxu1 %v6452_v21 }
 0x23e   :  { %4783 = vmatpush1.bf16.msra.mxu0 %v6447_v19  ;;  %v6501_v19 = vld [vmem:[%s8882_s3 + $0x620] ss:$16 sps:$4 sm:$0xff]  }
 0x23f   :  { %4947 = vmatpush1.bf16.msra.mxu1 %v6450_v20  ;;  %4784 = vmatprep.subr.bf16.mxu0 %v6455_v22  ;;  %v6504_v20 = vld [vmem:[%s8882_s3 + $0x628] ss:$16 sps:$4 sm:$0xff]   ;;  %v6509_v22 = vld [vmem:[%s8882_s3 + $0x644] ss:$16 sps:$4 sm:$0xff]  }
 0x240   :  { %4948 = vmatprep.subr.bf16.mxu1 %v6458_v26  ;;  %v6512_v26 = vld [vmem:[%s8882_s3 + $0x64c] ss:$16 sps:$4 sm:$0xff]  }
 0x242   :  { %4785 = vmatpush1.bf16.msra.mxu0 %v6453_v33  ;;  %v6507_v33 = vld [vmem:[%s8882_s3 + $0x640] ss:$16 sps:$4 sm:$0xff]  }
 0x243   :  { %4949 = vmatpush1.bf16.msra.mxu1 %v6456_v28  ;;  %4786 = vmatprep.subr.bf16.mxu0 %v6461_v30  ;;  %v6510_v28 = vld [vmem:[%s8882_s3 + $0x648] ss:$16 sps:$4 sm:$0xff]   ;;  %v6515_v30 = vld [vmem:[%s8882_s3 + $0x664] ss:$16 sps:$4 sm:$0xff]  }
 0x244   :  { %4950 = vmatprep.subr.bf16.mxu1 %v6464_v23  ;;  %v6518_v23 = vld [vmem:[%s8882_s3 + $0x66c] ss:$16 sps:$4 sm:$0xff]  }
 0x246   :  { %4787 = vmatpush1.bf16.msra.mxu0 %v6459_v15  ;;  %v6513_v15 = vld [vmem:[%s8882_s3 + $0x660] ss:$16 sps:$4 sm:$0xff]  }
 0x247   :  { %4951 = vmatpush1.bf16.msra.mxu1 %v6462_v32  ;;  %4788 = vmatprep.subr.bf16.mxu0 %v6467_v34  ;;  %v6516_v32 = vld [vmem:[%s8882_s3 + $0x668] ss:$16 sps:$4 sm:$0xff]   ;;  %v6521_v34 = vld [vmem:[%s8882_s3 + $0x684] ss:$16 sps:$4 sm:$0xff]  }
 0x248   :  { %4952 = vmatprep.subr.bf16.mxu1 %v6470_v29  ;;  %v6524_v29 = vld [vmem:[%s8882_s3 + $0x68c] ss:$16 sps:$4 sm:$0xff]  }
 0x24a   :  { %4789 = vmatpush1.bf16.msra.mxu0 %v6465_v35  ;;  %v6519_v35 = vld [vmem:[%s8882_s3 + $0x680] ss:$16 sps:$4 sm:$0xff]  }
 0x24b   :  { %4953 = vmatpush1.bf16.msra.mxu1 %v6468_v36  ;;  %4790 = vmatprep.subr.bf16.mxu0 %v6473_v37  ;;  %v6522_v36 = vld [vmem:[%s8882_s3 + $0x688] ss:$16 sps:$4 sm:$0xff]   ;;  %v6527_v37 = vld [vmem:[%s8882_s3 + $0x6a4] ss:$16 sps:$4 sm:$0xff]  }
 0x24c   :  { %4954 = vmatprep.subr.bf16.mxu1 %v6476_v39  ;;  %v6530_v39 = vld [vmem:[%s8882_s3 + $0x6ac] ss:$16 sps:$4 sm:$0xff]  }
 0x24e   :  { %4791 = vmatpush1.bf16.msra.mxu0 %v6471_v40  ;;  %v6525_v40 = vld [vmem:[%s8882_s3 + $0x6a0] ss:$16 sps:$4 sm:$0xff]  }
 0x24f   :  { %4955 = vmatpush1.bf16.msra.mxu1 %v6474_v41  ;;  %4792 = vmatprep.subr.bf16.mxu0 %v6479_v42  ;;  %v6528_v41 = vld [vmem:[%s8882_s3 + $0x6a8] ss:$16 sps:$4 sm:$0xff]   ;;  %v6533_v42 = vld [vmem:[%s8882_s3 + $0x6c4] ss:$16 sps:$4 sm:$0xff]  }
 0x250   :  { %4956 = vmatprep.subr.bf16.mxu1 %v6482_v24  ;;  %v6536_v24 = vld [vmem:[%s8882_s3 + $0x6cc] ss:$16 sps:$4 sm:$0xff]  }
 0x252   :  { %4793 = vmatpush1.bf16.msra.mxu0 %v6477_v27  ;;  %v6531_v27 = vld [vmem:[%s8882_s3 + $0x6c0] ss:$16 sps:$4 sm:$0xff]  }
 0x253   :  { %4957 = vmatpush1.bf16.msra.mxu1 %v6480_v44  ;;  %4794 = vmatprep.subr.bf16.mxu0 %v6485_v45  ;;  %v6534_v44 = vld [vmem:[%s8882_s3 + $0x6c8] ss:$16 sps:$4 sm:$0xff]   ;;  %v6539_v45 = vld [vmem:[%s8882_s3 + $0x6e4] ss:$16 sps:$4 sm:$0xff]  }
 0x254   :  { %4958 = vmatprep.subr.bf16.mxu1 %v6488_v46  ;;  %v6542_v46 = vld [vmem:[%s8882_s3 + $0x6ec] ss:$16 sps:$4 sm:$0xff]  }
 0x256   :  { %4795 = vmatpush1.bf16.msra.mxu0 %v6483_v47  ;;  %v6537_v47 = vld [vmem:[%s8882_s3 + $0x6e0] ss:$16 sps:$4 sm:$0xff]  }
 0x257   :  { %4959 = vmatpush1.bf16.msra.mxu1 %v6486_v48  ;;  %4796 = vmatprep.subr.bf16.mxu0 %v6491_v49  ;;  %v6540_v48 = vld [vmem:[%s8882_s3 + $0x6e8] ss:$16 sps:$4 sm:$0xff]   ;;  %v6545_v49 = vld [vmem:[%s8882_s3 + $0x704] ss:$16 sps:$4 sm:$0xff]  }
 0x258   :  { %4960 = vmatprep.subr.bf16.mxu1 %v6494_v50  ;;  %v6548_v50 = vld [vmem:[%s8882_s3 + $0x70c] ss:$16 sps:$4 sm:$0xff]  }
 0x25a   :  { %4797 = vmatpush1.bf16.msra.mxu0 %v6489_v51  ;;  %v6543_v51 = vld [vmem:[%s8882_s3 + $0x700] ss:$16 sps:$4 sm:$0xff]  }
 0x25b   :  { %4961 = vmatpush1.bf16.msra.mxu1 %v6492_v52  ;;  %4807 = vmatprep.subr.bf16.mxu0 %v6497_v54  ;;  %v6546_v52 = vld [vmem:[%s8882_s3 + $0x708] ss:$16 sps:$4 sm:$0xff]   ;;  %v6551_v54 = vld [vmem:[%s8882_s3 + $0x724] ss:$16 sps:$4 sm:$0xff]  }
 0x25c   :  { %4971 = vmatprep.subr.bf16.mxu1 %v6500_v55  ;;  %v6554_v55 = vld [vmem:[%s8882_s3 + $0x72c] ss:$16 sps:$4 sm:$0xff]  }
 0x270   :  { %v2939_v63 = vpop.f32.mrb[4].mxu0  ;;  %v8564_v1 = vpop.f32.mrb[4].mxu1 }
 0x271   :  { %v6118_v0 = vadd.f32 %v2939_v63, %v445_v60  ;;  %v2941_v2 = vpop.f32.mrb[5].mxu0  ;;  %v3105_v4 = vpop.f32.mrb[5].mxu1  ;;  %v6560_v60 = vld [vmem:[%s8882_s3 + $0x74c] ss:$16 sps:$4 sm:$0xff]   ;;  %v6563_v63 = vld [vmem:[%s8882_s3 + $0x764] ss:$16 sps:$4 sm:$0xff]  }
 0x272   :  { %v6119_v3 = vadd.f32 %v2941_v2, %v449_v61  ;;  %v2943_v5 = vpop.f32.mrb[6].mxu0  ;;  %v6121_v7 = vadd.f32 %v3105_v4, %v457_v62  ;;  %v3107_v57 = vpop.f32.mrb[6].mxu1  ;;  %v6555_v61 = vld [vmem:[%s8882_s3 + $0x740] ss:$16 sps:$4 sm:$0xff]   ;;  %v6558_v62 = vld [vmem:[%s8882_s3 + $0x748] ss:$16 sps:$4 sm:$0xff]  }
 0x273   :  { %v3114_v6 = vmax.f32 %v6118_v0, 0.0  ;;  %v2944_v8 = vpop.f32.mrb[7].mxu0  ;;  %v3108_v10 = vpop.f32.mrb[7].mxu1  ;;  %v6566_v0 = vld [vmem:[%s8882_s3 + $0x76c] ss:$16 sps:$4 sm:$0xff]   ;;  %v452_v57 = vsub.s32 6, %v7948_v12 }
 0x274   :  { %v3115_v9 = vmax.f32 %v6119_v3, 0.0  ;;  %v3117_v38 = vmax.f32 %v6121_v7, 0.0  ;;  %v6561_v2 = vld [vmem:[%s8882_s3 + $0x760] ss:$16 sps:$4 sm:$0xff]   ;;  %v6564_v3 = vld [vmem:[%s8882_s3 + $0x768] ss:$16 sps:$4 sm:$0xff]  }
 0x275   :  { %v3122_v53 = vpack.c.bf16 %v3114_v6, %v3114_v6  ;;  %v6569_v4 = vld [vmem:[%s8882_s3 + $0x784] ss:$16 sps:$4 sm:$0xff]   ;;  %v6572_v5 = vld [vmem:[%s8882_s3 + $0x78c] ss:$16 sps:$4 sm:$0xff]   ;;  %v6567_v6 = vld [vmem:[%s8882_s3 + $0x780] ss:$16 sps:$4 sm:$0xff]  }
 0x276   :  { %v3123_v43 = vpack.c.bf16 %v3115_v9, %v3115_v9  ;;  %v3125_v21 = vpack.c.bf16 %v3117_v38, %v3117_v38  ;;  %v6570_v7 = vld [vmem:[%s8882_s3 + $0x788] ss:$16 sps:$4 sm:$0xff]   ;;  %v6575_v8 = vld [vmem:[%s8882_s3 + $0x7a4] ss:$16 sps:$4 sm:$0xff]   ;;  %v6578_v9 = vld [vmem:[%s8882_s3 + $0x7ac] ss:$16 sps:$4 sm:$0xff]  }
 0x277   :  { %v6573_v10 = vld [vmem:[%s8882_s3 + $0x7a0] ss:$16 sps:$4 sm:$0xff]   ;;  %v6576_v38 = vld [vmem:[%s8882_s3 + $0x7a8] ss:$16 sps:$4 sm:$0xff]  }
 0x278   :  { %4798 = vmatprep.mubr.bf16.mxu0 %v3123_v43  ;;  %4962 = vmatprep.mubr.bf16.mxu1 %v3123_v43  ;;  %v6624_v43 = vld [vmem:[%s8881_s2] sm:$0xff] }
 0x279   :  { %4799 = vmatmul.mubr.bf16.vlgmr.msra.gmra.mrb[8].mxu0 %v3122_v53  ;;  %4963 = vmatmul.mubr.bf16.vlgmr.msra.gmra.mrb[8].mxu1 %v3122_v53  ;;  %v6584_v53 = vld [vmem:[%s8882_s3 + $0x7cc] ss:$16 sps:$4 sm:$0xff]  }
 0x27a   :  { %4808 = vmatpush1.bf16.msra.mxu0 %v6495_v18  ;;  %4972 = vmatpush1.bf16.msra.mxu1 %v6498_v13  ;;  %v453_v18 = vrot.slane %v6624_v43, %v452_v57  ;;  %v6581_v13 = vld [vmem:[%s8882_s3 + $0x7c4] ss:$16 sps:$4 sm:$0xff]  }
 0x27b   :  { %4839 = vmatprep.mubr.bf16.mxu0 %v3125_v21  ;;  %5003 = vmatprep.mubr.bf16.mxu1 %v3125_v21 }
 0x27c   :  { %4809 = vmatprep.subr.bf16.mxu0 %v6503_v17  ;;  %4973 = vmatprep.subr.bf16.mxu1 %v6506_v25  ;;  %v6579_v17 = vld [vmem:[%s8882_s3 + $0x7c0] ss:$16 sps:$4 sm:$0xff]   ;;  %v6582_v25 = vld [vmem:[%s8882_s3 + $0x7c8] ss:$16 sps:$4 sm:$0xff]   ;;  %v6120_v21 = vadd.f32 %v8564_v1, %v453_v18 }
 0x27d   :  { %v6588_v1 = vld [vmem:[%s8882_s3 + $0x7e8] ss:$16 sps:$4 sm:$0xff]  }
 0x27e   :  { %4810 = vmatpush1.bf16.msra.mxu0 %v6501_v19  ;;  %4974 = vmatpush1.bf16.msra.mxu1 %v6504_v20  ;;  %v6587_v19 = vld [vmem:[%s8882_s3 + $0x7e4] ss:$16 sps:$4 sm:$0xff]   ;;  %v6590_v20 = vld [vmem:[%s8882_s3 + $0x7ec] ss:$16 sps:$4 sm:$0xff]  }
 0x27f   :  { %4811 = vmatprep.subr.bf16.mxu0 %v6509_v22  ;;  %4975 = vmatprep.subr.bf16.mxu1 %v6512_v26  ;;  %v6585_v22 = vld [vmem:[%s8882_s3 + $0x7e0] ss:$16 sps:$4 sm:$0xff]   ;;  %v3116_v26 = vmax.f32 %v6120_v21, 0.0 }
 0x282   :  { %4812 = vmatpush1.bf16.msra.mxu0 %v6507_v33  ;;  %4976 = vmatpush1.bf16.msra.mxu1 %v6510_v28  ;;  %v6591_v33 = vld [vmem:[%s8884_s5 + $0x40] sm:$0xff]  }
 0x283   :  { %4813 = vmatprep.subr.bf16.mxu0 %v6515_v30  ;;  %4977 = vmatprep.subr.bf16.mxu1 %v6518_v23  ;;  %v6592_v28 = vld [vmem:[%s8884_s5 + $0xc0] sm:$0xff]  }
 0x284   :  { %v6593_v30 = vld [vmem:[%s8884_s5] sm:$0xff]  }
 0x285   :  { %v6594_v23 = vld [vmem:[%s8884_s5 + $0x80] sm:$0xff]  }
 0x286   :  { %4814 = vmatpush1.bf16.msra.mxu0 %v6513_v15  ;;  %4978 = vmatpush1.bf16.msra.mxu1 %v6516_v32  ;;  %v3124_v15 = vpack.c.bf16 %v3116_v26, %v3116_v26  ;;  %v6595_v32 = vld [vmem:[%s8884_s5 + $0x48] sm:$0xff]  }
 0x287   :  { %4815 = vmatprep.subr.bf16.mxu0 %v6521_v34  ;;  %4979 = vmatprep.subr.bf16.mxu1 %v6524_v29  ;;  %v6596_v34 = vld [vmem:[%s8884_s5 + $0xc8] sm:$0xff]  }
 0x288   :  { %v6597_v29 = vld [vmem:[%s8884_s5 + $0x8] sm:$0xff]  }
 0x28a   :  { %4816 = vmatpush1.bf16.msra.mxu0 %v6519_v35  ;;  %4980 = vmatpush1.bf16.msra.mxu1 %v6522_v36  ;;  %v6598_v35 = vld [vmem:[%s8884_s5 + $0x88] sm:$0xff]   ;;  %v6599_v36 = vld [vmem:[%s8884_s5 + $0x50] sm:$0xff]  }
 0x28b   :  { %4817 = vmatprep.subr.bf16.mxu0 %v6527_v37  ;;  %4981 = vmatprep.subr.bf16.mxu1 %v6530_v39  ;;  %v6600_v37 = vld [vmem:[%s8884_s5 + $0xd0] sm:$0xff]  }
 0x28c   :  { %v6601_v39 = vld [vmem:[%s8884_s5 + $0x10] sm:$0xff]  }
 0x28e   :  { %4818 = vmatpush1.bf16.msra.mxu0 %v6525_v40  ;;  %4982 = vmatpush1.bf16.msra.mxu1 %v6528_v41  ;;  %v6602_v40 = vld [vmem:[%s8884_s5 + $0x90] sm:$0xff]   ;;  %v6603_v41 = vld [vmem:[%s8884_s5 + $0x58] sm:$0xff]  }
 0x28f   :  { %4819 = vmatprep.subr.bf16.mxu0 %v6533_v42  ;;  %4983 = vmatprep.subr.bf16.mxu1 %v6536_v24  ;;  %v6604_v42 = vld [vmem:[%s8884_s5 + $0xd8] sm:$0xff]  }
 0x290   :  { %v6605_v24 = vld [vmem:[%s8884_s5 + $0x18] sm:$0xff]  }
 0x292   :  { %4820 = vmatpush1.bf16.msra.mxu0 %v6531_v27  ;;  %4984 = vmatpush1.bf16.msra.mxu1 %v6534_v44  ;;  %v6606_v27 = vld [vmem:[%s8884_s5 + $0x98] sm:$0xff]   ;;  %v6607_v44 = vld [vmem:[%s8884_s5 + $0x60] sm:$0xff]  }
 0x293   :  { %4821 = vmatprep.subr.bf16.mxu0 %v6539_v45  ;;  %4985 = vmatprep.subr.bf16.mxu1 %v6542_v46  ;;  %v6608_v45 = vld [vmem:[%s8884_s5 + $0xe0] sm:$0xff]  }
 0x294   :  { %v6609_v46 = vld [vmem:[%s8884_s5 + $0x20] sm:$0xff]  }
 0x296   :  { %4822 = vmatpush1.bf16.msra.mxu0 %v6537_v47  ;;  %4986 = vmatpush1.bf16.msra.mxu1 %v6540_v48  ;;  %v6610_v47 = vld [vmem:[%s8884_s5 + $0xa0] sm:$0xff]   ;;  %v6611_v48 = vld [vmem:[%s8884_s5 + $0x68] sm:$0xff]  }
 0x297   :  { %4823 = vmatprep.subr.bf16.mxu0 %v6545_v49  ;;  %4987 = vmatprep.subr.bf16.mxu1 %v6548_v50  ;;  %v6612_v49 = vld [vmem:[%s8884_s5 + $0xe8] sm:$0xff]  }
 0x298   :  { %v6613_v50 = vld [vmem:[%s8884_s5 + $0x28] sm:$0xff]  }
 0x29a   :  { %4824 = vmatpush1.bf16.msra.mxu0 %v6543_v51  ;;  %4988 = vmatpush1.bf16.msra.mxu1 %v6546_v52  ;;  %v6614_v51 = vld [vmem:[%s8884_s5 + $0xa8] sm:$0xff]   ;;  %v6615_v52 = vld [vmem:[%s8884_s5 + $0x70] sm:$0xff]  }
 0x29b   :  { %4825 = vmatprep.subr.bf16.mxu0 %v6551_v54  ;;  %4989 = vmatprep.subr.bf16.mxu1 %v6554_v55  ;;  %v6616_v54 = vld [vmem:[%s8884_s5 + $0xf0] sm:$0xff]  }
 0x29c   :  { %v6617_v55 = vld [vmem:[%s8884_s5 + $0x30] sm:$0xff]  }
 0x29e   :  { %4826 = vmatpush1.bf16.msra.mxu0 %v6549_v56  ;;  %4990 = vmatpush1.bf16.msra.mxu1 %v6552_v58  ;;  %v6618_v56 = vld [vmem:[%s8884_s5 + $0xb0] sm:$0xff]   ;;  %v6619_v58 = vld [vmem:[%s8884_s5 + $0x78] sm:$0xff]  }
 0x29f   :  { %4827 = vmatprep.subr.bf16.mxu0 %v6557_v59  ;;  %4991 = vmatprep.subr.bf16.mxu1 %v6560_v60  ;;  %v6620_v59 = vld [vmem:[%s8884_s5 + $0xf8] sm:$0xff]  }
 0x2a0   :  { %v6621_v60 = vld [vmem:[%s8884_s5 + $0x38] sm:$0xff]  }
 0x2a2   :  { %4828 = vmatpush1.bf16.msra.mxu0 %v6555_v61  ;;  %4992 = vmatpush1.bf16.msra.mxu1 %v6558_v62  ;;  %v6622_v61 = vld [vmem:[%s8884_s5 + $0xb8] sm:$0xff]   ;;  %v3382_v62 = vld [vmem:[%s8883_s4] sm:$0xf] }
 0x2a3   :  { %4829 = vmatprep.subr.bf16.mxu0 %v6563_v63  ;;  %4993 = vmatprep.subr.bf16.mxu1 %v6566_v0  ;;  %v3387_v63 = vrot.slane %v3382_v62, %v428_v11  ;;  %v3395_v0 = vrot.slane %v3382_v62, %v436_v31 }
 0x2a6   :  { %4830 = vmatpush1.bf16.msra.mxu0 %v6561_v2  ;;  %4994 = vmatpush1.bf16.msra.mxu1 %v6564_v3  ;;  %v3391_v2 = vrot.slane %v3382_v62, %v432_v16  ;;  %v3399_v3 = vrot.slane %v3382_v62, %v440_v14 }
 0x2a7   :  { %4831 = vmatprep.subr.bf16.mxu0 %v6569_v4  ;;  %4995 = vmatprep.subr.bf16.mxu1 %v6572_v5 }
 0x2aa   :  { %4832 = vmatpush1.bf16.msra.mxu0 %v6567_v6  ;;  %4996 = vmatpush1.bf16.msra.mxu1 %v6570_v7 }
 0x2ab   :  { %4833 = vmatprep.subr.bf16.mxu0 %v6575_v8  ;;  %4997 = vmatprep.subr.bf16.mxu1 %v6578_v9 }
 0x2ae   :  { %4834 = vmatpush1.bf16.msra.mxu0 %v6573_v10  ;;  %4998 = vmatpush1.bf16.msra.mxu1 %v6576_v38 }
 0x2af   :  { %4835 = vmatprep.subr.bf16.mxu0 %v6581_v13  ;;  %4999 = vmatprep.subr.bf16.mxu1 %v6584_v53 }
 0x2b2   :  { %4836 = vmatpush1.bf16.msra.mxu0 %v6579_v17  ;;  %5000 = vmatpush1.bf16.msra.mxu1 %v6582_v25 }
 0x2b3   :  { %4837 = vmatprep.subr.bf16.mxu0 %v6587_v19  ;;  %5001 = vmatprep.subr.bf16.mxu1 %v6590_v20  ;;  %v6037_v20 = vld [vmem:[%s8885_s6] ss:$0 sm:$0xff] }
 0x2b6   :  { %4838 = vmatpush1.bf16.msra.mxu0 %v6585_v22  ;;  %5002 = vmatpush1.bf16.msra.mxu1 %v6588_v1 }
 0x2b7   :  { %6070 = vmatprep.subr.bf16.mxu0 %v6591_v33  ;;  %6092 = vmatprep.subr.bf16.mxu1 %v6592_v28 }
 0x2b9   :  { %4840 = vmatmul.mubr.bf16.vlgmr.msra.gmra.mrb[8].mxu0 %v3124_v15  ;;  %5004 = vmatmul.mubr.bf16.vlgmr.msra.gmra.mrb[8].mxu1 %v3124_v15 }
 0x2ba   :  { %6071 = vmatpush3.bf16.msra.mxu0 %v6593_v30  ;;  %6093 = vmatpush3.bf16.msra.mxu1 %v6594_v23 }
 0x2bb   :  { %6072 = vmatprep.subr.bf16.mxu0 %v6595_v32  ;;  %6094 = vmatprep.subr.bf16.mxu1 %v6596_v34 }
 0x2be   :  { %6073 = vmatpush3.bf16.msra.mxu0 %v6597_v29  ;;  %6095 = vmatpush3.bf16.msra.mxu1 %v6598_v35 }
 0x2bf   :  { %6074 = vmatprep.subr.bf16.mxu0 %v6599_v36  ;;  %6096 = vmatprep.subr.bf16.mxu1 %v6600_v37 }
 0x2c2   :  { %6075 = vmatpush3.bf16.msra.mxu0 %v6601_v39  ;;  %6097 = vmatpush3.bf16.msra.mxu1 %v6602_v40 }
 0x2c3   :  { %6076 = vmatprep.subr.bf16.mxu0 %v6603_v41  ;;  %6098 = vmatprep.subr.bf16.mxu1 %v6604_v42 }
 0x2c6   :  { %6077 = vmatpush3.bf16.msra.mxu0 %v6605_v24  ;;  %6099 = vmatpush3.bf16.msra.mxu1 %v6606_v27 }
 0x2c7   :  { %6078 = vmatprep.subr.bf16.mxu0 %v6607_v44  ;;  %6100 = vmatprep.subr.bf16.mxu1 %v6608_v45 }
 0x2ca   :  { %6079 = vmatpush3.bf16.msra.mxu0 %v6609_v46  ;;  %6101 = vmatpush3.bf16.msra.mxu1 %v6610_v47 }
 0x2cb   :  { %6080 = vmatprep.subr.bf16.mxu0 %v6611_v48  ;;  %6102 = vmatprep.subr.bf16.mxu1 %v6612_v49 }
 0x2ce   :  { %6081 = vmatpush3.bf16.msra.mxu0 %v6613_v50  ;;  %6103 = vmatpush3.bf16.msra.mxu1 %v6614_v51 }
 0x2cf   :  { %6082 = vmatprep.subr.bf16.mxu0 %v6615_v52  ;;  %6104 = vmatprep.subr.bf16.mxu1 %v6616_v54 }
 0x2d2   :  { %6083 = vmatpush3.bf16.msra.mxu0 %v6617_v55  ;;  %6105 = vmatpush3.bf16.msra.mxu1 %v6618_v56 }
 0x2d3   :  { %6084 = vmatprep.subr.bf16.mxu0 %v6619_v58  ;;  %6106 = vmatprep.subr.bf16.mxu1 %v6620_v59 }
 0x2d6   :  { %6085 = vmatpush3.bf16.msra.mxu0 %v6621_v60  ;;  %6107 = vmatpush3.bf16.msra.mxu1 %v6622_v61 }
 0x38c   :  { %v4841_v4 = vpop.f32.mrb[8].mxu0  ;;  %v5005_v5 = vpop.f32.mrb[8].mxu1 }
 0x38d   :  { %v6122_v6 = vadd.f32 %v4841_v4, %v3387_v63  ;;  %v6124_v7 = vadd.f32 %v5005_v5, %v3395_v0  ;;  %v4843_v57 = vpop.f32.mrb[9].mxu0  ;;  %v5007_v8 = vpop.f32.mrb[9].mxu1 }
 0x38e   :  { %v6123_v9 = vadd.f32 %v4843_v57, %v3391_v2  ;;  %v6125_v10 = vadd.f32 %v5007_v8, %v3399_v3  ;;  %v4845_v38 = vpop.f32.mrb[10].mxu0  ;;  %v5009_v43 = vpop.f32.mrb[10].mxu1 }
 0x38f   :  { %v5012_v11 = vmax.f32 %v6122_v6, 0.0  ;;  %v5014_v18 = vmax.f32 %v6124_v7, 0.0  ;;  %v4846_v13 = vpop.f32.mrb[11].mxu0  ;;  %v5010_v31 = vpop.f32.mrb[11].mxu1 }
 0x390   :  { %v5013_v53 = vmax.f32 %v6123_v9, 0.0  ;;  %v5015_v17 = vmax.f32 %v6125_v10, 0.0 }
 0x391   :  { %v5016_v12 = vpack.c.bf16 %v5012_v11, %v5012_v11  ;;  %v5018_v14 = vpack.c.bf16 %v5014_v18, %v5014_v18 }
 0x392   :  { %v5017_v16 = vpack.c.bf16 %v5013_v53, %v5013_v53  ;;  %v5019_v25 = vpack.c.bf16 %v5015_v17, %v5015_v17 }
 0x394   :  { %5315 = vmatprep.mubr.bf16.mxu0 %v5017_v16  ;;  %5355 = vmatprep.mubr.bf16.mxu1 %v5019_v25 }
 0x395   :  { %5316 = vmatmul.mubr.bf16.vlgmr.msra.gmra.mrb[12].mxu0 %v5016_v12  ;;  %5356 = vmatmul.mubr.bf16.vlgmr.msra.gmra.mrb[12].mxu1 %v5018_v14 }
 0x468   :  { %v6086_v21 = vpop.f32.mrb[12].mxu0  ;;  %v6108_v19 = vpop.f32.mrb[12].mxu1 }
 0x469   :  { %v6087_v22 = vpop.f32.mrb[13].mxu0  ;;  %v6109_v1 = vpop.f32.mrb[13].mxu1 }
 0x46a   :  { %v6088_v26 = vadd.f32 %v6087_v22, %v6086_v21  ;;  %v6110_v33 = vadd.f32 %v6109_v1, %v6108_v19  ;;  %v6089_v28 = vpop.f32.mrb[14].mxu0  ;;  %v6111_v30 = vpop.f32.mrb[14].mxu1 }
 0x46b   :  { %v6090_v23 = vpop.f32.mrb[15].mxu0  ;;  %v6112_v15 = vpop.f32.mrb[15].mxu1 }
 0x46c   :  { %v5318_v32 = vadd.f32 %v6088_v26, %v6037_v20 }
 0x46e   :  { %v5358_v34 = vadd.f32 %v6110_v33, %v5318_v32 }
 0x470   :  { %5363 = vst [vmem:[#allocation2] sm:$0xff] %v5358_v34 }
 0x471   :  { %6636 = shalt.err (!%p6633_p4)
}
 0x472   :  { %s6637_s17 = scalar_lea.hbm %s8886_s7, 128 }
 0x473   :  { %p6638_p5 = scmp.ne.s32.totalorder %s8886_s7, %s6637_s17  ;;  %p6641_p6 = scmp.lt.u32.totalorder %s6637_s17, %s8886_s7 }
 0x475   :  { %p6643_p7 = pnand %p6641_p6, %p6638_p5 }
 0x477   :  { %6646 = shalt.err (!%p6643_p7)
}
 0x478   :  { %5373 = dma.vmem_to_hbm [thread:$0]  %s5371_s14, 128, %s8886_s7, [#allocation3]  }
 0x479   :  { %6647 = dma.done.wait [#allocation3], 128  }
 0x47a   :  { %6648 = vsyncadd [#allocation3], 4294967168 }
 0x47b   :  { %5377 = vsyncpa [#allocation3], 1 }

</bundles_post_ra>
